<compile_context>
chip_gen: v6e
topology: v6e:2x2x1
jax: 0.10.0
libtpu: 0.0.40
codegen_flags: <defaults>
</compile_context>

<pallas_src>
import math
import numpy as np
import jax
import jax.numpy as jnp
from jax.experimental import pallas as pl
from jax.experimental.pallas import tpu as pltpu

# ----------------------------- model config ----------------------------------
B            = 2
NUM_CLASSES  = 10          # x has last dim == num_classes
DIM          = 64          # model dim
TIMESTEP_DIM = 64
NUM_LAYERS   = 6
ADA_DIM      = 512         # Resnet default ada_dim -> context last dim
NUM_FREQS    = 32
TEMPERATURE  = 100.0
MID_DIM      = 2 * DIM
FOUR_DIM     = 2 * NUM_FREQS * NUM_CLASSES   # 640
ADA_COLS     = 2 * DIM + 2 * MID_DIM         # 384 per layer (scale1|shift1|scale2|shift2)
ADA_TOT      = NUM_LAYERS * ADA_COLS         # 2304
EPS          = 1e-5

# Row offsets inside the packed 64-column weight stack W64.
_WT1_OFF  = 0
_WT2_OFF  = DIM
_WPIF_OFF = 2 * DIM
_WPIT_OFF = 2 * DIM + FOUR_DIM
_WPO_OFF  = 3 * DIM + FOUR_DIM
_W64_ROWS = 4 * DIM + FOUR_DIM               # 896


def _silu(x):
    # silu(x) = x*sigmoid(x) = 0.5*x*(1 + tanh(x/2)): one EUP push per vreg.
    return 0.5 * x * (1.0 + jnp.tanh(0.5 * x))


def _layernorm(x, eps=EPS):
    # Two INDEPENDENT cross-lane reductions (mu and E[x^2]) -> shorter XLU
    # critical path than mean -> center -> mean-of-squares.
    mu = jnp.mean(x, axis=-1, keepdims=True)
    ms = jnp.mean(x * x, axis=-1, keepdims=True)
    var = ms - mu * mu
    return (x - mu) * jax.lax.rsqrt(var + eps)


# ------------------------------------ kernel ---------------------------------
def dc_kernel(x_ref, t_ref, ctx_ref, gaug_ref, c64_ref, w64_ref,
              wl1_ref, wl2_ref, bl12_ref, wada_hbm_ref, bada_ref,
              o_ref, wada_vmem, ada_s, dma_sem):
    f32 = jnp.float32
    bf16 = jnp.bfloat16

    # Kick off the big w_ada HBM->VMEM DMA immediately; it overlaps with the
    # timestep / fourier / proj_in compute below (none of which needs it).
    wada_cp = pltpu.make_async_copy(wada_hbm_ref, wada_vmem, dma_sem)
    wada_cp.start()

    # ---- TimestepEmbedding: sin(t*freq + phase) -> linear -> SiLU -> linear ----
    # zt via VPU broadcast-FMA (c64 rows 4/5 = duplicated freqs / phase row).
    zt = t_ref[...] * c64_ref[4:5, :] + c64_ref[5:6, :]                   # (B, 64)
    temb0 = jnp.sin(zt)
    h_t = _silu(jnp.dot(temb0.astype(bf16), w64_ref[_WT1_OFF:_WT1_OFF + DIM, :],
                        preferred_element_type=f32) + c64_ref[0:1, :])
    temb = jnp.dot(h_t.astype(bf16), w64_ref[_WT2_OFF:_WT2_OFF + DIM, :],
                   preferred_element_type=f32) + c64_ref[1:2, :]

    # ---- FourierEmbedder(x): sin([x,1] @ G_aug) == interleaved sin/cos (f32) ----
    zx = jnp.dot(x_ref[...], gaug_ref[...], preferred_element_type=f32)   # (B, 640)
    four = jnp.sin(zx)

    # ---- proj_in: split weight, no lane-concat; two dots accumulate ----
    h = (jnp.dot(four.astype(bf16), w64_ref[_WPIF_OFF:_WPIF_OFF + FOUR_DIM, :],
                 preferred_element_type=f32)
         + jnp.dot(temb.astype(bf16), w64_ref[_WPIT_OFF:_WPIT_OFF + DIM, :],
                   preferred_element_type=f32)
         + c64_ref[2:3, :])

    # ---- fused AdaNorm context projection for ALL layers (one matmul) ----
    sctx = _silu(ctx_ref[...])                                            # (B, 512)
    wada_cp.wait()                                                        # DMA mostly hidden
    ada = (jnp.dot(sctx.astype(bf16), wada_vmem[...],
                   preferred_element_type=f32) + bada_ref[...])           # (B, 2304)
    # Stage in VMEM so the 18 f32 vregs of `ada` are not live across the whole
    # unrolled 6-layer chain (narrow live ranges; vld slot has slack).
    ada_s[...] = ada

    # ---- decoder: NUM_LAYERS x Resnet(dim, mid=2*dim, ada_dim=512) ----
    for l in range(NUM_LAYERS):
        off = l * ADA_COLS
        scale1 = ada_s[:, off            : off + DIM]            # "+1" folded into b_ada
        shift1 = ada_s[:, off + DIM      : off + 2 * DIM]
        scale2 = ada_s[:, off + 2 * DIM  : off + 2 * DIM + MID_DIM]
        shift2 = ada_s[:, off + 2 * DIM + MID_DIM : off + ADA_COLS]

        resid = h
        # AdaNorm 1 (dim) -> SiLU -> linear1 (dim -> mid)
        hn = _layernorm(h)
        a1 = _silu(hn * scale1 + shift1)
        h1 = (jnp.dot(a1.astype(bf16), wl1_ref[l], preferred_element_type=f32)
              + bl12_ref[l:l + 1, :])                                     # (B, 128)
        # AdaNorm 2 (mid) -> SiLU -> dropout(p=0)=id -> linear2 (mid -> dim)
        hn2 = _layernorm(h1)
        a2 = _silu(hn2 * scale2 + shift2)
        h2 = (jnp.dot(a2.astype(bf16), wl2_ref[l], preferred_element_type=f32)
              + bl12_ref[NUM_LAYERS + l:NUM_LAYERS + l + 1, :DIM])        # (B, 64)
        h = h2 + resid

    # ---- norm_out + proj_out (output affine folded into wpo / c64 row 3) ----
    hf = _layernorm(h)
    out = (jnp.dot(hf.astype(bf16), w64_ref[_WPO_OFF:_WPO_OFF + DIM, :],
                   preferred_element_type=f32) + c64_ref[3:4, :])
    o_ref[...] = out[:, :NUM_CLASSES]


# ------------------------------- constants -----------------------------------
def build_constants():
    # FourierEmbedder: freq_bands = temperature ** (arange(num_freqs)/num_freqs)
    # G_aug has an extra phase row (0 for sin cols, pi/2 for cos cols) so that
    # sin([x, 1] @ G_aug) == interleaved [sin(f x), cos(f x)] of the torch loop.
    freqs = (TEMPERATURE ** (np.arange(NUM_FREQS, dtype=np.float64) / NUM_FREQS)).astype(np.float32)
    G = np.zeros((NUM_CLASSES + 1, FOUR_DIM), np.float32)
    for f in range(NUM_FREQS):
        base = f * 2 * NUM_CLASSES
        for c in range(NUM_CLASSES):
            G[c, base + c] = freqs[f]                     # sin block
            G[c, base + NUM_CLASSES + c] = freqs[f]       # cos block
        G[NUM_CLASSES, base + NUM_CLASSES: base + 2 * NUM_CLASSES] = math.pi / 2.0

    # get_timestep_embedding(t, DIM, downscale_freq_shift=1):
    # Gt row0 = freqs duplicated, row1 = phase; consumed as sin(t*row0 + row1).
    half = DIM // 2
    exponent = -math.log(10000.0) * np.arange(half, dtype=np.float32) / (half - 1.0)
    ef = np.exp(exponent).astype(np.float32)
    Gt = np.zeros((2, DIM), np.float32)
    Gt[0, :half] = ef
    Gt[0, half:] = ef
    Gt[1, half:] = math.pi / 2.0
    return jnp.asarray(G), jnp.asarray(Gt)


# ------------------------------- parameters ----------------------------------
def init_params(key):
    keys = jax.random.split(key, 17)

    def nrm(k, shape, scale=0.02):
        return scale * jax.random.normal(k, shape, dtype=jnp.float32)

    p = {}
    p['wt1'] = nrm(keys[0], (DIM, TIMESTEP_DIM));           p['bt1'] = nrm(keys[1], (1, TIMESTEP_DIM))
    p['wt2'] = nrm(keys[2], (TIMESTEP_DIM, TIMESTEP_DIM));  p['bt2'] = nrm(keys[3], (1, TIMESTEP_DIM))
    p['wpi'] = nrm(keys[4], (FOUR_DIM + TIMESTEP_DIM, DIM)); p['bpi'] = nrm(keys[5], (1, DIM))
    p['wn1'] = nrm(keys[6], (NUM_LAYERS, ADA_DIM, 2 * DIM));     p['bn1'] = nrm(keys[7], (NUM_LAYERS, 1, 2 * DIM))
    p['wl1'] = nrm(keys[8], (NUM_LAYERS, DIM, MID_DIM));         p['bl1'] = nrm(keys[9], (NUM_LAYERS, 1, MID_DIM))
    p['wn2'] = nrm(keys[10], (NUM_LAYERS, ADA_DIM, 2 * MID_DIM)); p['bn2'] = nrm(keys[11], (NUM_LAYERS, 1, 2 * MID_DIM))
    p['wl2'] = nrm(keys[12], (NUM_LAYERS, MID_DIM, DIM));        p['bl2'] = nrm(keys[13], (NUM_LAYERS, 1, DIM))
    p['gout'] = 1.0 + nrm(keys[14], (1, DIM));  p['bout'] = nrm(keys[15], (1, DIM))
    p['wpo'] = nrm(keys[16], (DIM, NUM_CLASSES))
    return p


def prepare_params(p):
    """One-time packing (outside the hot path): bf16 weights, fused adaLN
    projection with folded '+1', packed weight stack / bias tables, folded
    output affine, Gt folded into the small f32 constant table."""
    bf16 = jnp.bfloat16
    f32 = jnp.float32
    prep = {}

    # ---- packed 64-column weight stack: [wt1; wt2; wpi_four; wpi_temb; wpo_pad]
    wpi_four = p['wpi'][:FOUR_DIM, :]
    wpi_temb = p['wpi'][FOUR_DIM:, :]
    # Fold norm_out's elementwise gain into proj_out: (ln(h)*g) @ W = ln(h) @ (g[:,None]*W)
    wpo_fused = p['gout'].reshape(DIM, 1) * p['wpo']                      # (64, 10)
    wpo_pad = jnp.zeros((DIM, DIM), f32).at[:, :NUM_CLASSES].set(wpo_fused)
    prep['W64'] = jnp.concatenate(
        [p['wt1'], p['wt2'], wpi_four, wpi_temb, wpo_pad], axis=0).astype(bf16)  # (896, 64)

    # ---- fused AdaNorm projection: per layer [scale1|shift1|scale2|shift2] ----
    w_ada = jnp.concatenate(
        [jnp.concatenate([p['wn1'][l], p['wn2'][l]], axis=1) for l in range(NUM_LAYERS)],
        axis=1)                                                           # (512, 2304)
    plus1_layer = jnp.concatenate(
        [jnp.ones((1, DIM), f32), jnp.zeros((1, DIM), f32),
         jnp.ones((1, MID_DIM), f32), jnp.zeros((1, MID_DIM), f32)], axis=1)
    plus1 = jnp.concatenate([plus1_layer] * NUM_LAYERS, axis=1)           # (1, 2304)
    b_ada = jnp.concatenate(
        [jnp.concatenate([p['bn1'][l], p['bn2'][l]], axis=1) for l in range(NUM_LAYERS)],
        axis=1) + plus1                                                   # '+1' folded
    prep['w_ada'] = w_ada.astype(bf16)
    prep['b_ada'] = b_ada.astype(f32)

    prep['wl1'] = p['wl1'].astype(bf16)                                   # (6, 64, 128)
    prep['wl2'] = p['wl2'].astype(bf16)                                   # (6, 128, 64)
    bl1 = p['bl1'].reshape(NUM_LAYERS, MID_DIM)
    bl2_pad = jnp.zeros((NUM_LAYERS, MID_DIM), f32).at[:, :DIM].set(
        p['bl2'].reshape(NUM_LAYERS, DIM))
    prep['bl12'] = jnp.concatenate([bl1, bl2_pad], axis=0)                # (12, 128)

    # ---- small f32 constants: [bt1; bt2; bpi; bout_folded; Gt_freq; Gt_phase]
    b_out = p['bout'] @ p['wpo']                                          # (1, 10)
    b_out_pad = jnp.zeros((1, DIM), f32).at[:, :NUM_CLASSES].set(b_out)
    G_aug, Gt = build_constants()                                         # keep f32 (phase accuracy)
    prep['const64'] = jnp.concatenate(
        [p['bt1'], p['bt2'], p['bpi'], b_out_pad, Gt], axis=0)            # (6, 64)
    prep['G_aug'] = G_aug                                                 # (11, 640) f32
    return prep


# ------------------------------- wrapper --------------------------------------
def forward_pallas(x, t, ctx, prep):
    batch = x.shape[0]
    ones = jnp.ones((batch, 1), jnp.float32)
    x_aug = jnp.concatenate([x.astype(jnp.float32), ones], axis=-1)       # (B, 11)
    t_col = t.astype(jnp.float32)[:, None]                                # (B, 1)

    args = (
        x_aug, t_col, ctx.astype(jnp.float32),
        prep['G_aug'], prep['const64'], prep['W64'],
        prep['wl1'], prep['wl2'], prep['bl12'],
        prep['w_ada'], prep['b_ada'],
    )
    vmem = pl.BlockSpec(memory_space=pltpu.MemorySpace.VMEM)
    in_specs = [vmem] * len(args)
    in_specs[9] = pl.BlockSpec(memory_space=pl.ANY)   # w_ada stays in HBM; manual overlapped DMA

    return pl.pallas_call(
        dc_kernel,
        out_shape=jax.ShapeDtypeStruct((batch, NUM_CLASSES), jnp.float32),
        in_specs=in_specs,
        out_specs=pl.BlockSpec(memory_space=pltpu.MemorySpace.VMEM),
        scratch_shapes=[
            pltpu.VMEM((ADA_DIM, ADA_TOT), jnp.bfloat16),   # w_ada landing buffer (~2.4 MB)
            pltpu.VMEM((batch, ADA_TOT), jnp.float32),      # staged per-layer scale/shift
            pltpu.SemaphoreType.DMA(()),
        ],
        compiler_params=pltpu.CompilerParams(vmem_limit_bytes=8 * 1024 * 1024),
    )(*args)


# --------------------------- pure-JAX reference (verification) ----------------
def _ref_layernorm(x, eps=EPS):
    mu = jnp.mean(x, axis=-1, keepdims=True)
    xc = x - mu
    var = jnp.mean(xc * xc, axis=-1, keepdims=True)
    return xc * jax.lax.rsqrt(var + eps)


def reference_forward(x, t, ctx, p):
    silu = jax.nn.silu
    # timestep embedding
    half = DIM // 2
    exponent = -math.log(10000.0) * jnp.arange(half, dtype=jnp.float32) / (half - 1.0)
    emb = t.astype(jnp.float32)[:, None] * jnp.exp(exponent)[None, :]
    emb = jnp.concatenate([jnp.sin(emb), jnp.cos(emb)], axis=-1)
    temb = silu(emb @ p['wt1'] + p['bt1']) @ p['wt2'] + p['bt2']
    # fourier embedding (interleaved order of the torch loop)
    freqs = TEMPERATURE ** (jnp.arange(NUM_FREQS, dtype=jnp.float32) / NUM_FREQS)
    outs = []
    for f in range(NUM_FREQS):
        outs.append(jnp.sin(freqs[f] * x))
        outs.append(jnp.cos(freqs[f] * x))
    four = jnp.concatenate(outs, axis=-1)
    h = jnp.concatenate([four, temb], axis=-1) @ p['wpi'] + p['bpi']
    sctx = silu(ctx)
    for l in range(NUM_LAYERS):
        resid = h
        hn = _ref_layernorm(h)
        se = sctx @ p['wn1'][l] + p['bn1'][l]
        scale, shift = se[:, :DIM], se[:, DIM:]
        h1 = silu(hn * (scale + 1.0) + shift) @ p['wl1'][l] + p['bl1'][l]
        hn2 = _ref_layernorm(h1)
        se2 = sctx @ p['wn2'][l] + p['bn2'][l]
        scale2, shift2 = se2[:, :MID_DIM], se2[:, MID_DIM:]
        h2 = silu(hn2 * (scale2 + 1.0) + shift2) @ p['wl2'][l] + p['bl2'][l]
        h = h2 + resid
    hf = _ref_layernorm(h) * p['gout'] + p['bout']
    return hf @ p['wpo']


# TODO(synk): DDIMScheduler sampling (`generate`) and the external image encoder
# (`encode_context`) are host-side / external-dependency code paths, not part of
# the forward() hot path, and are not implemented here.

if __name__ == "__main__":
    key = jax.random.PRNGKey(0)
    kx, kt, kc, kp = jax.random.split(key, 4)
    x = jax.random.normal(kx, (B, NUM_CLASSES), dtype=jnp.float32)
    t = jax.random.uniform(kt, (B,), dtype=jnp.float32, minval=0.0, maxval=1000.0)
    ctx = jax.random.normal(kc, (B, ADA_DIM), dtype=jnp.float32)

    params = init_params(kp)
    prep = prepare_params(params)     # one-time packing (outside the hot path)

    fwd = jax.jit(forward_pallas)
    out = jax.block_until_ready(fwd(x, t, ctx, prep))
    assert out.shape == (B, NUM_CLASSES)

    ref = reference_forward(x, t, ctx, params)
    max_err = float(jnp.max(jnp.abs(out - ref)))
    assert np.allclose(np.asarray(out), np.asarray(ref), rtol=2e-2, atol=2e-2), (
        f"max abs err {max_err}")

    print("KERNEL_OK")
</pallas_src>

<mosaic_0001>
module attributes {stable_mosaic.version = 11 : i64} {
  func.func @dc_kernel(%arg0: memref<2x11xf32, #tpu.memory_space<vmem>>, %arg1: memref<2x1xf32, #tpu.memory_space<vmem>>, %arg2: memref<2x512xf32, #tpu.memory_space<vmem>>, %arg3: memref<11x640xf32, #tpu.memory_space<vmem>>, %arg4: memref<6x64xf32, #tpu.memory_space<vmem>>, %arg5: memref<896x64xbf16, #tpu.memory_space<vmem>>, %arg6: memref<6x64x128xbf16, #tpu.memory_space<vmem>>, %arg7: memref<6x128x64xbf16, #tpu.memory_space<vmem>>, %arg8: memref<12x128xf32, #tpu.memory_space<vmem>>, %arg9: memref<512x2304xbf16, #tpu.memory_space<any>>, %arg10: memref<1x2304xf32, #tpu.memory_space<vmem>>, %arg11: memref<2x10xf32, #tpu.memory_space<vmem>>, %arg12: memref<512x2304xbf16, #tpu.memory_space<vmem>>, %arg13: memref<2x2304xf32, #tpu.memory_space<vmem>>, %arg14: memref<!tpu.dma_semaphore, #tpu.memory_space<semaphore_mem>>) attributes {dimension_semantics = [], scalar_prefetch = 0 : i64, scratch_operands = 3 : i64, tpu.core_type = #tpu.core_type<tc>} {
    tpu.enqueue_dma source(%arg9 : memref<512x2304xbf16, #tpu.memory_space<any>>) target(%arg12 : memref<512x2304xbf16, #tpu.memory_space<vmem>>) target_semaphore(%arg14 : memref<!tpu.dma_semaphore, #tpu.memory_space<semaphore_mem>>)
    %c0 = arith.constant 0 : index
    %c0_0 = arith.constant 0 : index
    %0 = vector.load %arg1[%c0, %c0_0] : memref<2x1xf32, #tpu.memory_space<vmem>>, vector<2x1xf32>
    %c4 = arith.constant 4 : index
    %c0_1 = arith.constant 0 : index
    %1 = vector.load %arg4[%c4, %c0_1] : memref<6x64xf32, #tpu.memory_space<vmem>>, vector<1x64xf32>
    %2 = vector.broadcast %0 : vector<2x1xf32> to vector<2x64xf32>
    %3 = vector.broadcast %1 : vector<1x64xf32> to vector<2x64xf32>
    %4 = arith.mulf %2, %3 : vector<2x64xf32>
    %c5 = arith.constant 5 : index
    %c0_2 = arith.constant 0 : index
    %5 = vector.load %arg4[%c5, %c0_2] : memref<6x64xf32, #tpu.memory_space<vmem>>, vector<1x64xf32>
    %6 = vector.broadcast %5 : vector<1x64xf32> to vector<2x64xf32>
    %7 = arith.addf %4, %6 : vector<2x64xf32>
    %8 = math.sin %7 : vector<2x64xf32>
    %9 = arith.truncf %8 : vector<2x64xf32> to vector<2x64xbf16>
    %c0_3 = arith.constant 0 : index
    %c0_4 = arith.constant 0 : index
    %10 = vector.load %arg5[%c0_3, %c0_4] : memref<896x64xbf16, #tpu.memory_space<vmem>>, vector<64x64xbf16>
    %cst = arith.constant dense<0.000000e+00> : vector<2x64xf32>
    %11 = tpu.matmul %9, %10, %cst {dimension_numbers = #tpu.dot_dimension_numbers<[1], [0], [0], [1], [0, 0, 1, 1], [], []>} : vector<2x64xbf16>, vector<64x64xbf16>, vector<2x64xf32> -> vector<2x64xf32>
    %c0_5 = arith.constant 0 : index
    %c0_6 = arith.constant 0 : index
    %12 = vector.load %arg4[%c0_5, %c0_6] : memref<6x64xf32, #tpu.memory_space<vmem>>, vector<1x64xf32>
    %13 = vector.broadcast %12 : vector<1x64xf32> to vector<2x64xf32>
    %14 = arith.addf %11, %13 : vector<2x64xf32>
    %cst_7 = arith.constant 5.000000e-01 : f32
    %15 = vector.broadcast %cst_7 : f32 to vector<2x64xf32>
    %16 = arith.mulf %15, %14 : vector<2x64xf32>
    %cst_8 = arith.constant 5.000000e-01 : f32
    %17 = vector.broadcast %cst_8 : f32 to vector<2x64xf32>
    %18 = arith.mulf %17, %14 : vector<2x64xf32>
    %19 = math.tanh %18 : vector<2x64xf32>
    %cst_9 = arith.constant 1.000000e+00 : f32
    %20 = vector.broadcast %cst_9 : f32 to vector<2x64xf32>
    %21 = arith.addf %20, %19 : vector<2x64xf32>
    %22 = arith.mulf %16, %21 : vector<2x64xf32>
    %23 = arith.truncf %22 : vector<2x64xf32> to vector<2x64xbf16>
    %c64 = arith.constant 64 : index
    %c0_10 = arith.constant 0 : index
    %24 = vector.load %arg5[%c64, %c0_10] : memref<896x64xbf16, #tpu.memory_space<vmem>>, vector<64x64xbf16>
    %cst_11 = arith.constant dense<0.000000e+00> : vector<2x64xf32>
    %25 = tpu.matmul %23, %24, %cst_11 {dimension_numbers = #tpu.dot_dimension_numbers<[1], [0], [0], [1], [0, 0, 1, 1], [], []>} : vector<2x64xbf16>, vector<64x64xbf16>, vector<2x64xf32> -> vector<2x64xf32>
    %c1 = arith.constant 1 : index
    %c0_12 = arith.constant 0 : index
    %26 = vector.load %arg4[%c1, %c0_12] : memref<6x64xf32, #tpu.memory_space<vmem>>, vector<1x64xf32>
    %27 = vector.broadcast %26 : vector<1x64xf32> to vector<2x64xf32>
    %28 = arith.addf %25, %27 : vector<2x64xf32>
    %c0_13 = arith.constant 0 : index
    %c0_14 = arith.constant 0 : index
    %29 = vector.load %arg0[%c0_13, %c0_14] : memref<2x11xf32, #tpu.memory_space<vmem>>, vector<2x11xf32>
    %c0_15 = arith.constant 0 : index
    %c0_16 = arith.constant 0 : index
    %30 = vector.load %arg3[%c0_15, %c0_16] : memref<11x640xf32, #tpu.memory_space<vmem>>, vector<11x640xf32>
    %cst_17 = arith.constant dense<0.000000e+00> : vector<2x640xf32>
    %31 = tpu.matmul %29, %30, %cst_17 {dimension_numbers = #tpu.dot_dimension_numbers<[1], [0], [0], [1], [0, 0, 1, 1], [], []>} : vector<2x11xf32>, vector<11x640xf32>, vector<2x640xf32> -> vector<2x640xf32>
    %32 = math.sin %31 : vector<2x640xf32>
    %33 = arith.truncf %32 : vector<2x640xf32> to vector<2x640xbf16>
    %c128 = arith.constant 128 : index
    %c0_18 = arith.constant 0 : index
    %34 = vector.load %arg5[%c128, %c0_18] : memref<896x64xbf16, #tpu.memory_space<vmem>>, vector<640x64xbf16>
    %cst_19 = arith.constant dense<0.000000e+00> : vector<2x64xf32>
    %35 = tpu.matmul %33, %34, %cst_19 {dimension_numbers = #tpu.dot_dimension_numbers<[1], [0], [0], [1], [0, 0, 1, 1], [], []>} : vector<2x640xbf16>, vector<640x64xbf16>, vector<2x64xf32> -> vector<2x64xf32>
    %36 = arith.truncf %28 : vector<2x64xf32> to vector<2x64xbf16>
    %c768 = arith.constant 768 : index
    %c0_20 = arith.constant 0 : index
    %37 = vector.load %arg5[%c768, %c0_20] : memref<896x64xbf16, #tpu.memory_space<vmem>>, vector<64x64xbf16>
    %cst_21 = arith.constant dense<0.000000e+00> : vector<2x64xf32>
    %38 = tpu.matmul %36, %37, %cst_21 {dimension_numbers = #tpu.dot_dimension_numbers<[1], [0], [0], [1], [0, 0, 1, 1], [], []>} : vector<2x64xbf16>, vector<64x64xbf16>, vector<2x64xf32> -> vector<2x64xf32>
    %39 = arith.addf %35, %38 : vector<2x64xf32>
    %c2 = arith.constant 2 : index
    %c0_22 = arith.constant 0 : index
    %40 = vector.load %arg4[%c2, %c0_22] : memref<6x64xf32, #tpu.memory_space<vmem>>, vector<1x64xf32>
    %41 = vector.broadcast %40 : vector<1x64xf32> to vector<2x64xf32>
    %42 = arith.addf %39, %41 : vector<2x64xf32>
    %c0_23 = arith.constant 0 : index
    %c0_24 = arith.constant 0 : index
    %43 = vector.load %arg2[%c0_23, %c0_24] : memref<2x512xf32, #tpu.memory_space<vmem>>, vector<2x512xf32>
    %cst_25 = arith.constant 5.000000e-01 : f32
    %44 = vector.broadcast %cst_25 : f32 to vector<2x512xf32>
    %45 = arith.mulf %44, %43 : vector<2x512xf32>
    %cst_26 = arith.constant 5.000000e-01 : f32
    %46 = vector.broadcast %cst_26 : f32 to vector<2x512xf32>
    %47 = arith.mulf %46, %43 : vector<2x512xf32>
    %48 = math.tanh %47 : vector<2x512xf32>
    %cst_27 = arith.constant 1.000000e+00 : f32
    %49 = vector.broadcast %cst_27 : f32 to vector<2x512xf32>
    %50 = arith.addf %49, %48 : vector<2x512xf32>
    %51 = arith.mulf %45, %50 : vector<2x512xf32>
    tpu.wait_dma2 semaphore(%arg14 : memref<!tpu.dma_semaphore, #tpu.memory_space<semaphore_mem>>) src(%arg9 : memref<512x2304xbf16, #tpu.memory_space<any>>) dst(%arg12 : memref<512x2304xbf16, #tpu.memory_space<vmem>>)
    %52 = arith.truncf %51 : vector<2x512xf32> to vector<2x512xbf16>
    %c0_28 = arith.constant 0 : index
    %c0_29 = arith.constant 0 : index
    %53 = vector.load %arg12[%c0_28, %c0_29] : memref<512x2304xbf16, #tpu.memory_space<vmem>>, vector<512x2304xbf16>
    %cst_30 = arith.constant dense<0.000000e+00> : vector<2x2304xf32>
    %54 = tpu.matmul %52, %53, %cst_30 {dimension_numbers = #tpu.dot_dimension_numbers<[1], [0], [0], [1], [0, 0, 1, 1], [], []>} : vector<2x512xbf16>, vector<512x2304xbf16>, vector<2x2304xf32> -> vector<2x2304xf32>
    %c0_31 = arith.constant 0 : index
    %c0_32 = arith.constant 0 : index
    %55 = vector.load %arg10[%c0_31, %c0_32] : memref<1x2304xf32, #tpu.memory_space<vmem>>, vector<1x2304xf32>
    %56 = vector.broadcast %55 : vector<1x2304xf32> to vector<2x2304xf32>
    %57 = arith.addf %54, %56 : vector<2x2304xf32>
    %c0_33 = arith.constant 0 : index
    %c0_34 = arith.constant 0 : index
    %58 = vector.load %arg13[%c0_33, %c0_34] : memref<2x2304xf32, #tpu.memory_space<vmem>>, vector<2x2304xf32>
    tpu.vector_store %arg13[%c0_33, %c0_34], %57 {strides = array<i32>} : memref<2x2304xf32, #tpu.memory_space<vmem>>, vector<2x2304xf32>,
    %c0_35 = arith.constant 0 : index
    %c0_36 = arith.constant 0 : index
    %59 = vector.load %arg13[%c0_35, %c0_36] : memref<2x2304xf32, #tpu.memory_space<vmem>>, vector<2x64xf32>
    %c0_37 = arith.constant 0 : index
    %c64_38 = arith.constant 64 : index
    %60 = vector.load %arg13[%c0_37, %c64_38] : memref<2x2304xf32, #tpu.memory_space<vmem>>, vector<2x64xf32>
    %c0_39 = arith.constant 0 : index
    %c128_40 = arith.constant 128 : index
    %61 = vector.load %arg13[%c0_39, %c128_40] : memref<2x2304xf32, #tpu.memory_space<vmem>>, vector<2x128xf32>
    %c0_41 = arith.constant 0 : index
    %c256 = arith.constant 256 : index
    %62 = vector.load %arg13[%c0_41, %c256] : memref<2x2304xf32, #tpu.memory_space<vmem>>, vector<2x128xf32>
    %cst_42 = arith.constant dense<0.000000e+00> : vector<2xf32>
    %63 = vector.multi_reduction <add>, %42, %cst_42 [1] : vector<2x64xf32> to vector<2xf32>
    %64 = vector.shape_cast %63 : vector<2xf32> to vector<2x1xf32>
    %cst_43 = arith.constant 6.400000e+01 : f32
    %65 = vector.broadcast %cst_43 : f32 to vector<2x1xf32>
    %66 = arith.divf %64, %65 : vector<2x1xf32>
    %67 = arith.mulf %42, %42 : vector<2x64xf32>
    %cst_44 = arith.constant dense<0.000000e+00> : vector<2xf32>
    %68 = vector.multi_reduction <add>, %67, %cst_44 [1] : vector<2x64xf32> to vector<2xf32>
    %69 = vector.shape_cast %68 : vector<2xf32> to vector<2x1xf32>
    %cst_45 = arith.constant 6.400000e+01 : f32
    %70 = vector.broadcast %cst_45 : f32 to vector<2x1xf32>
    %71 = arith.divf %69, %70 : vector<2x1xf32>
    %72 = arith.mulf %66, %66 : vector<2x1xf32>
    %73 = arith.subf %71, %72 : vector<2x1xf32>
    %74 = vector.broadcast %66 : vector<2x1xf32> to vector<2x64xf32>
    %75 = arith.subf %42, %74 : vector<2x64xf32>
    %cst_46 = arith.constant 9.99999974E-6 : f32
    %76 = vector.broadcast %cst_46 : f32 to vector<2x1xf32>
    %77 = arith.addf %73, %76 : vector<2x1xf32>
    %78 = math.rsqrt %77 : vector<2x1xf32>
    %79 = vector.broadcast %78 : vector<2x1xf32> to vector<2x64xf32>
    %80 = arith.mulf %75, %79 : vector<2x64xf32>
    %81 = arith.mulf %80, %59 : vector<2x64xf32>
    %82 = arith.addf %81, %60 : vector<2x64xf32>
    %cst_47 = arith.constant 5.000000e-01 : f32
    %83 = vector.broadcast %cst_47 : f32 to vector<2x64xf32>
    %84 = arith.mulf %83, %82 : vector<2x64xf32>
    %cst_48 = arith.constant 5.000000e-01 : f32
    %85 = vector.broadcast %cst_48 : f32 to vector<2x64xf32>
    %86 = arith.mulf %85, %82 : vector<2x64xf32>
    %87 = math.tanh %86 : vector<2x64xf32>
    %cst_49 = arith.constant 1.000000e+00 : f32
    %88 = vector.broadcast %cst_49 : f32 to vector<2x64xf32>
    %89 = arith.addf %88, %87 : vector<2x64xf32>
    %90 = arith.mulf %84, %89 : vector<2x64xf32>
    %91 = arith.truncf %90 : vector<2x64xf32> to vector<2x64xbf16>
    %c0_50 = arith.constant 0 : index
    %c0_51 = arith.constant 0 : index
    %c0_52 = arith.constant 0 : index
    %92 = vector.load %arg6[%c0_50, %c0_51, %c0_52] : memref<6x64x128xbf16, #tpu.memory_space<vmem>>, vector<1x64x128xbf16>
    %93 = vector.shape_cast %92 : vector<1x64x128xbf16> to vector<64x128xbf16>
    %cst_53 = arith.constant dense<0.000000e+00> : vector<2x128xf32>
    %94 = tpu.matmul %91, %93, %cst_53 {dimension_numbers = #tpu.dot_dimension_numbers<[1], [0], [0], [1], [0, 0, 1, 1], [], []>} : vector<2x64xbf16>, vector<64x128xbf16>, vector<2x128xf32> -> vector<2x128xf32>
    %c0_54 = arith.constant 0 : index
    %c0_55 = arith.constant 0 : index
    %95 = vector.load %arg8[%c0_54, %c0_55] : memref<12x128xf32, #tpu.memory_space<vmem>>, vector<1x128xf32>
    %96 = vector.broadcast %95 : vector<1x128xf32> to vector<2x128xf32>
    %97 = arith.addf %94, %96 : vector<2x128xf32>
    %cst_56 = arith.constant dense<0.000000e+00> : vector<2xf32>
    %98 = vector.multi_reduction <add>, %97, %cst_56 [1] : vector<2x128xf32> to vector<2xf32>
    %99 = vector.shape_cast %98 : vector<2xf32> to vector<2x1xf32>
    %cst_57 = arith.constant 1.280000e+02 : f32
    %100 = vector.broadcast %cst_57 : f32 to vector<2x1xf32>
    %101 = arith.divf %99, %100 : vector<2x1xf32>
    %102 = arith.mulf %97, %97 : vector<2x128xf32>
    %cst_58 = arith.constant dense<0.000000e+00> : vector<2xf32>
    %103 = vector.multi_reduction <add>, %102, %cst_58 [1] : vector<2x128xf32> to vector<2xf32>
    %104 = vector.shape_cast %103 : vector<2xf32> to vector<2x1xf32>
    %cst_59 = arith.constant 1.280000e+02 : f32
    %105 = vector.broadcast %cst_59 : f32 to vector<2x1xf32>
    %106 = arith.divf %104, %105 : vector<2x1xf32>
    %107 = arith.mulf %101, %101 : vector<2x1xf32>
    %108 = arith.subf %106, %107 : vector<2x1xf32>
    %109 = vector.broadcast %101 : vector<2x1xf32> to vector<2x128xf32>
    %110 = arith.subf %97, %109 : vector<2x128xf32>
    %cst_60 = arith.constant 9.99999974E-6 : f32
    %111 = vector.broadcast %cst_60 : f32 to vector<2x1xf32>
    %112 = arith.addf %108, %111 : vector<2x1xf32>
    %113 = math.rsqrt %112 : vector<2x1xf32>
    %114 = vector.broadcast %113 : vector<2x1xf32> to vector<2x128xf32>
    %115 = arith.mulf %110, %114 : vector<2x128xf32>
    %116 = arith.mulf %115, %61 : vector<2x128xf32>
    %117 = arith.addf %116, %62 : vector<2x128xf32>
    %cst_61 = arith.constant 5.000000e-01 : f32
    %118 = vector.broadcast %cst_61 : f32 to vector<2x128xf32>
    %119 = arith.mulf %118, %117 : vector<2x128xf32>
    %cst_62 = arith.constant 5.000000e-01 : f32
    %120 = vector.broadcast %cst_62 : f32 to vector<2x128xf32>
    %121 = arith.mulf %120, %117 : vector<2x128xf32>
    %122 = math.tanh %121 : vector<2x128xf32>
    %cst_63 = arith.constant 1.000000e+00 : f32
    %123 = vector.broadcast %cst_63 : f32 to vector<2x128xf32>
    %124 = arith.addf %123, %122 : vector<2x128xf32>
    %125 = arith.mulf %119, %124 : vector<2x128xf32>
    %126 = arith.truncf %125 : vector<2x128xf32> to vector<2x128xbf16>
    %c0_64 = arith.constant 0 : index
    %c0_65 = arith.constant 0 : index
    %c0_66 = arith.constant 0 : index
    %127 = vector.load %arg7[%c0_64, %c0_65, %c0_66] : memref<6x128x64xbf16, #tpu.memory_space<vmem>>, vector<1x128x64xbf16>
    %128 = vector.shape_cast %127 : vector<1x128x64xbf16> to vector<128x64xbf16>
    %cst_67 = arith.constant dense<0.000000e+00> : vector<2x64xf32>
    %129 = tpu.matmul %126, %128, %cst_67 {dimension_numbers = #tpu.dot_dimension_numbers<[1], [0], [0], [1], [0, 0, 1, 1], [], []>} : vector<2x128xbf16>, vector<128x64xbf16>, vector<2x64xf32> -> vector<2x64xf32>
    %c6 = arith.constant 6 : index
    %c0_68 = arith.constant 0 : index
    %130 = vector.load %arg8[%c6, %c0_68] : memref<12x128xf32, #tpu.memory_space<vmem>>, vector<1x64xf32>
    %131 = vector.broadcast %130 : vector<1x64xf32> to vector<2x64xf32>
    %132 = arith.addf %129, %131 : vector<2x64xf32>
    %133 = arith.addf %132, %42 : vector<2x64xf32>
    %c0_69 = arith.constant 0 : index
    %c384 = arith.constant 384 : index
    %134 = vector.load %arg13[%c0_69, %c384] : memref<2x2304xf32, #tpu.memory_space<vmem>>, vector<2x64xf32>
    %c0_70 = arith.constant 0 : index
    %c448 = arith.constant 448 : index
    %135 = vector.load %arg13[%c0_70, %c448] : memref<2x2304xf32, #tpu.memory_space<vmem>>, vector<2x64xf32>
    %c0_71 = arith.constant 0 : index
    %c512 = arith.constant 512 : index
    %136 = vector.load %arg13[%c0_71, %c512] : memref<2x2304xf32, #tpu.memory_space<vmem>>, vector<2x128xf32>
    %c0_72 = arith.constant 0 : index
    %c640 = arith.constant 640 : index
    %137 = vector.load %arg13[%c0_72, %c640] : memref<2x2304xf32, #tpu.memory_space<vmem>>, vector<2x128xf32>
    %cst_73 = arith.constant dense<0.000000e+00> : vector<2xf32>
    %138 = vector.multi_reduction <add>, %133, %cst_73 [1] : vector<2x64xf32> to vector<2xf32>
    %139 = vector.shape_cast %138 : vector<2xf32> to vector<2x1xf32>
    %cst_74 = arith.constant 6.400000e+01 : f32
    %140 = vector.broadcast %cst_74 : f32 to vector<2x1xf32>
    %141 = arith.divf %139, %140 : vector<2x1xf32>
    %142 = arith.mulf %133, %133 : vector<2x64xf32>
    %cst_75 = arith.constant dense<0.000000e+00> : vector<2xf32>
    %143 = vector.multi_reduction <add>, %142, %cst_75 [1] : vector<2x64xf32> to vector<2xf32>
    %144 = vector.shape_cast %143 : vector<2xf32> to vector<2x1xf32>
    %cst_76 = arith.constant 6.400000e+01 : f32
    %145 = vector.broadcast %cst_76 : f32 to vector<2x1xf32>
    %146 = arith.divf %144, %145 : vector<2x1xf32>
    %147 = arith.mulf %141, %141 : vector<2x1xf32>
    %148 = arith.subf %146, %147 : vector<2x1xf32>
    %149 = vector.broadcast %141 : vector<2x1xf32> to vector<2x64xf32>
    %150 = arith.subf %133, %149 : vector<2x64xf32>
    %cst_77 = arith.constant 9.99999974E-6 : f32
    %151 = vector.broadcast %cst_77 : f32 to vector<2x1xf32>
    %152 = arith.addf %148, %151 : vector<2x1xf32>
    %153 = math.rsqrt %152 : vector<2x1xf32>
    %154 = vector.broadcast %153 : vector<2x1xf32> to vector<2x64xf32>
    %155 = arith.mulf %150, %154 : vector<2x64xf32>
    %156 = arith.mulf %155, %134 : vector<2x64xf32>
    %157 = arith.addf %156, %135 : vector<2x64xf32>
    %cst_78 = arith.constant 5.000000e-01 : f32
    %158 = vector.broadcast %cst_78 : f32 to vector<2x64xf32>
    %159 = arith.mulf %158, %157 : vector<2x64xf32>
    %cst_79 = arith.constant 5.000000e-01 : f32
    %160 = vector.broadcast %cst_79 : f32 to vector<2x64xf32>
    %161 = arith.mulf %160, %157 : vector<2x64xf32>
    %162 = math.tanh %161 : vector<2x64xf32>
    %cst_80 = arith.constant 1.000000e+00 : f32
    %163 = vector.broadcast %cst_80 : f32 to vector<2x64xf32>
    %164 = arith.addf %163, %162 : vector<2x64xf32>
    %165 = arith.mulf %159, %164 : vector<2x64xf32>
    %166 = arith.truncf %165 : vector<2x64xf32> to vector<2x64xbf16>
    %c1_81 = arith.constant 1 : index
    %c0_82 = arith.constant 0 : index
    %c0_83 = arith.constant 0 : index
    %167 = vector.load %arg6[%c1_81, %c0_82, %c0_83] : memref<6x64x128xbf16, #tpu.memory_space<vmem>>, vector<1x64x128xbf16>
    %168 = vector.shape_cast %167 : vector<1x64x128xbf16> to vector<64x128xbf16>
    %cst_84 = arith.constant dense<0.000000e+00> : vector<2x128xf32>
    %169 = tpu.matmul %166, %168, %cst_84 {dimension_numbers = #tpu.dot_dimension_numbers<[1], [0], [0], [1], [0, 0, 1, 1], [], []>} : vector<2x64xbf16>, vector<64x128xbf16>, vector<2x128xf32> -> vector<2x128xf32>
    %c1_85 = arith.constant 1 : index
    %c0_86 = arith.constant 0 : index
    %170 = vector.load %arg8[%c1_85, %c0_86] : memref<12x128xf32, #tpu.memory_space<vmem>>, vector<1x128xf32>
    %171 = vector.broadcast %170 : vector<1x128xf32> to vector<2x128xf32>
    %172 = arith.addf %169, %171 : vector<2x128xf32>
    %cst_87 = arith.constant dense<0.000000e+00> : vector<2xf32>
    %173 = vector.multi_reduction <add>, %172, %cst_87 [1] : vector<2x128xf32> to vector<2xf32>
    %174 = vector.shape_cast %173 : vector<2xf32> to vector<2x1xf32>
    %cst_88 = arith.constant 1.280000e+02 : f32
    %175 = vector.broadcast %cst_88 : f32 to vector<2x1xf32>
    %176 = arith.divf %174, %175 : vector<2x1xf32>
    %177 = arith.mulf %172, %172 : vector<2x128xf32>
    %cst_89 = arith.constant dense<0.000000e+00> : vector<2xf32>
    %178 = vector.multi_reduction <add>, %177, %cst_89 [1] : vector<2x128xf32> to vector<2xf32>
    %179 = vector.shape_cast %178 : vector<2xf32> to vector<2x1xf32>
    %cst_90 = arith.constant 1.280000e+02 : f32
    %180 = vector.broadcast %cst_90 : f32 to vector<2x1xf32>
    %181 = arith.divf %179, %180 : vector<2x1xf32>
    %182 = arith.mulf %176, %176 : vector<2x1xf32>
    %183 = arith.subf %181, %182 : vector<2x1xf32>
    %184 = vector.broadcast %176 : vector<2x1xf32> to vector<2x128xf32>
    %185 = arith.subf %172, %184 : vector<2x128xf32>
    %cst_91 = arith.constant 9.99999974E-6 : f32
    %186 = vector.broadcast %cst_91 : f32 to vector<2x1xf32>
    %187 = arith.addf %183, %186 : vector<2x1xf32>
    %188 = math.rsqrt %187 : vector<2x1xf32>
    %189 = vector.broadcast %188 : vector<2x1xf32> to vector<2x128xf32>
    %190 = arith.mulf %185, %189 : vector<2x128xf32>
    %191 = arith.mulf %190, %136 : vector<2x128xf32>
    %192 = arith.addf %191, %137 : vector<2x128xf32>
    %cst_92 = arith.constant 5.000000e-01 : f32
    %193 = vector.broadcast %cst_92 : f32 to vector<2x128xf32>
    %194 = arith.mulf %193, %192 : vector<2x128xf32>
    %cst_93 = arith.constant 5.000000e-01 : f32
    %195 = vector.broadcast %cst_93 : f32 to vector<2x128xf32>
    %196 = arith.mulf %195, %192 : vector<2x128xf32>
    %197 = math.tanh %196 : vector<2x128xf32>
    %cst_94 = arith.constant 1.000000e+00 : f32
    %198 = vector.broadcast %cst_94 : f32 to vector<2x128xf32>
    %199 = arith.addf %198, %197 : vector<2x128xf32>
    %200 = arith.mulf %194, %199 : vector<2x128xf32>
    %201 = arith.truncf %200 : vector<2x128xf32> to vector<2x128xbf16>
    %c1_95 = arith.constant 1 : index
    %c0_96 = arith.constant 0 : index
    %c0_97 = arith.constant 0 : index
    %202 = vector.load %arg7[%c1_95, %c0_96, %c0_97] : memref<6x128x64xbf16, #tpu.memory_space<vmem>>, vector<1x128x64xbf16>
    %203 = vector.shape_cast %202 : vector<1x128x64xbf16> to vector<128x64xbf16>
    %cst_98 = arith.constant dense<0.000000e+00> : vector<2x64xf32>
    %204 = tpu.matmul %201, %203, %cst_98 {dimension_numbers = #tpu.dot_dimension_numbers<[1], [0], [0], [1], [0, 0, 1, 1], [], []>} : vector<2x128xbf16>, vector<128x64xbf16>, vector<2x64xf32> -> vector<2x64xf32>
    %c7 = arith.constant 7 : index
    %c0_99 = arith.constant 0 : index
    %205 = vector.load %arg8[%c7, %c0_99] : memref<12x128xf32, #tpu.memory_space<vmem>>, vector<1x64xf32>
    %206 = vector.broadcast %205 : vector<1x64xf32> to vector<2x64xf32>
    %207 = arith.addf %204, %206 : vector<2x64xf32>
    %208 = arith.addf %207, %133 : vector<2x64xf32>
    %c0_100 = arith.constant 0 : index
    %c768_101 = arith.constant 768 : index
    %209 = vector.load %arg13[%c0_100, %c768_101] : memref<2x2304xf32, #tpu.memory_space<vmem>>, vector<2x64xf32>
    %c0_102 = arith.constant 0 : index
    %c832 = arith.constant 832 : index
    %210 = vector.load %arg13[%c0_102, %c832] : memref<2x2304xf32, #tpu.memory_space<vmem>>, vector<2x64xf32>
    %c0_103 = arith.constant 0 : index
    %c896 = arith.constant 896 : index
    %211 = vector.load %arg13[%c0_103, %c896] : memref<2x2304xf32, #tpu.memory_space<vmem>>, vector<2x128xf32>
    %c0_104 = arith.constant 0 : index
    %c1024 = arith.constant 1024 : index
    %212 = vector.load %arg13[%c0_104, %c1024] : memref<2x2304xf32, #tpu.memory_space<vmem>>, vector<2x128xf32>
    %cst_105 = arith.constant dense<0.000000e+00> : vector<2xf32>
    %213 = vector.multi_reduction <add>, %208, %cst_105 [1] : vector<2x64xf32> to vector<2xf32>
    %214 = vector.shape_cast %213 : vector<2xf32> to vector<2x1xf32>
    %cst_106 = arith.constant 6.400000e+01 : f32
    %215 = vector.broadcast %cst_106 : f32 to vector<2x1xf32>
    %216 = arith.divf %214, %215 : vector<2x1xf32>
    %217 = arith.mulf %208, %208 : vector<2x64xf32>
    %cst_107 = arith.constant dense<0.000000e+00> : vector<2xf32>
    %218 = vector.multi_reduction <add>, %217, %cst_107 [1] : vector<2x64xf32> to vector<2xf32>
    %219 = vector.shape_cast %218 : vector<2xf32> to vector<2x1xf32>
    %cst_108 = arith.constant 6.400000e+01 : f32
    %220 = vector.broadcast %cst_108 : f32 to vector<2x1xf32>
    %221 = arith.divf %219, %220 : vector<2x1xf32>
    %222 = arith.mulf %216, %216 : vector<2x1xf32>
    %223 = arith.subf %221, %222 : vector<2x1xf32>
    %224 = vector.broadcast %216 : vector<2x1xf32> to vector<2x64xf32>
    %225 = arith.subf %208, %224 : vector<2x64xf32>
    %cst_109 = arith.constant 9.99999974E-6 : f32
    %226 = vector.broadcast %cst_109 : f32 to vector<2x1xf32>
    %227 = arith.addf %223, %226 : vector<2x1xf32>
    %228 = math.rsqrt %227 : vector<2x1xf32>
    %229 = vector.broadcast %228 : vector<2x1xf32> to vector<2x64xf32>
    %230 = arith.mulf %225, %229 : vector<2x64xf32>
    %231 = arith.mulf %230, %209 : vector<2x64xf32>
    %232 = arith.addf %231, %210 : vector<2x64xf32>
    %cst_110 = arith.constant 5.000000e-01 : f32
    %233 = vector.broadcast %cst_110 : f32 to vector<2x64xf32>
    %234 = arith.mulf %233, %232 : vector<2x64xf32>
    %cst_111 = arith.constant 5.000000e-01 : f32
    %235 = vector.broadcast %cst_111 : f32 to vector<2x64xf32>
    %236 = arith.mulf %235, %232 : vector<2x64xf32>
    %237 = math.tanh %236 : vector<2x64xf32>
    %cst_112 = arith.constant 1.000000e+00 : f32
    %238 = vector.broadcast %cst_112 : f32 to vector<2x64xf32>
    %239 = arith.addf %238, %237 : vector<2x64xf32>
    %240 = arith.mulf %234, %239 : vector<2x64xf32>
    %241 = arith.truncf %240 : vector<2x64xf32> to vector<2x64xbf16>
    %c2_113 = arith.constant 2 : index
    %c0_114 = arith.constant 0 : index
    %c0_115 = arith.constant 0 : index
    %242 = vector.load %arg6[%c2_113, %c0_114, %c0_115] : memref<6x64x128xbf16, #tpu.memory_space<vmem>>, vector<1x64x128xbf16>
    %243 = vector.shape_cast %242 : vector<1x64x128xbf16> to vector<64x128xbf16>
    %cst_116 = arith.constant dense<0.000000e+00> : vector<2x128xf32>
    %244 = tpu.matmul %241, %243, %cst_116 {dimension_numbers = #tpu.dot_dimension_numbers<[1], [0], [0], [1], [0, 0, 1, 1], [], []>} : vector<2x64xbf16>, vector<64x128xbf16>, vector<2x128xf32> -> vector<2x128xf32>
    %c2_117 = arith.constant 2 : index
    %c0_118 = arith.constant 0 : index
    %245 = vector.load %arg8[%c2_117, %c0_118] : memref<12x128xf32, #tpu.memory_space<vmem>>, vector<1x128xf32>
    %246 = vector.broadcast %245 : vector<1x128xf32> to vector<2x128xf32>
    %247 = arith.addf %244, %246 : vector<2x128xf32>
    %cst_119 = arith.constant dense<0.000000e+00> : vector<2xf32>
    %248 = vector.multi_reduction <add>, %247, %cst_119 [1] : vector<2x128xf32> to vector<2xf32>
    %249 = vector.shape_cast %248 : vector<2xf32> to vector<2x1xf32>
    %cst_120 = arith.constant 1.280000e+02 : f32
    %250 = vector.broadcast %cst_120 : f32 to vector<2x1xf32>
    %251 = arith.divf %249, %250 : vector<2x1xf32>
    %252 = arith.mulf %247, %247 : vector<2x128xf32>
    %cst_121 = arith.constant dense<0.000000e+00> : vector<2xf32>
    %253 = vector.multi_reduction <add>, %252, %cst_121 [1] : vector<2x128xf32> to vector<2xf32>
    %254 = vector.shape_cast %253 : vector<2xf32> to vector<2x1xf32>
    %cst_122 = arith.constant 1.280000e+02 : f32
    %255 = vector.broadcast %cst_122 : f32 to vector<2x1xf32>
    %256 = arith.divf %254, %255 : vector<2x1xf32>
    %257 = arith.mulf %251, %251 : vector<2x1xf32>
    %258 = arith.subf %256, %257 : vector<2x1xf32>
    %259 = vector.broadcast %251 : vector<2x1xf32> to vector<2x128xf32>
    %260 = arith.subf %247, %259 : vector<2x128xf32>
    %cst_123 = arith.constant 9.99999974E-6 : f32
    %261 = vector.broadcast %cst_123 : f32 to vector<2x1xf32>
    %262 = arith.addf %258, %261 : vector<2x1xf32>
    %263 = math.rsqrt %262 : vector<2x1xf32>
    %264 = vector.broadcast %263 : vector<2x1xf32> to vector<2x128xf32>
    %265 = arith.mulf %260, %264 : vector<2x128xf32>
    %266 = arith.mulf %265, %211 : vector<2x128xf32>
    %267 = arith.addf %266, %212 : vector<2x128xf32>
    %cst_124 = arith.constant 5.000000e-01 : f32
    %268 = vector.broadcast %cst_124 : f32 to vector<2x128xf32>
    %269 = arith.mulf %268, %267 : vector<2x128xf32>
    %cst_125 = arith.constant 5.000000e-01 : f32
    %270 = vector.broadcast %cst_125 : f32 to vector<2x128xf32>
    %271 = arith.mulf %270, %267 : vector<2x128xf32>
    %272 = math.tanh %271 : vector<2x128xf32>
    %cst_126 = arith.constant 1.000000e+00 : f32
    %273 = vector.broadcast %cst_126 : f32 to vector<2x128xf32>
    %274 = arith.addf %273, %272 : vector<2x128xf32>
    %275 = arith.mulf %269, %274 : vector<2x128xf32>
    %276 = arith.truncf %275 : vector<2x128xf32> to vector<2x128xbf16>
    %c2_127 = arith.constant 2 : index
    %c0_128 = arith.constant 0 : index
    %c0_129 = arith.constant 0 : index
    %277 = vector.load %arg7[%c2_127, %c0_128, %c0_129] : memref<6x128x64xbf16, #tpu.memory_space<vmem>>, vector<1x128x64xbf16>
    %278 = vector.shape_cast %277 : vector<1x128x64xbf16> to vector<128x64xbf16>
    %cst_130 = arith.constant dense<0.000000e+00> : vector<2x64xf32>
    %279 = tpu.matmul %276, %278, %cst_130 {dimension_numbers = #tpu.dot_dimension_numbers<[1], [0], [0], [1], [0, 0, 1, 1], [], []>} : vector<2x128xbf16>, vector<128x64xbf16>, vector<2x64xf32> -> vector<2x64xf32>
    %c8 = arith.constant 8 : index
    %c0_131 = arith.constant 0 : index
    %280 = vector.load %arg8[%c8, %c0_131] : memref<12x128xf32, #tpu.memory_space<vmem>>, vector<1x64xf32>
    %281 = vector.broadcast %280 : vector<1x64xf32> to vector<2x64xf32>
    %282 = arith.addf %279, %281 : vector<2x64xf32>
    %283 = arith.addf %282, %208 : vector<2x64xf32>
    %c0_132 = arith.constant 0 : index
    %c1152 = arith.constant 1152 : index
    %284 = vector.load %arg13[%c0_132, %c1152] : memref<2x2304xf32, #tpu.memory_space<vmem>>, vector<2x64xf32>
    %c0_133 = arith.constant 0 : index
    %c1216 = arith.constant 1216 : index
    %285 = vector.load %arg13[%c0_133, %c1216] : memref<2x2304xf32, #tpu.memory_space<vmem>>, vector<2x64xf32>
    %c0_134 = arith.constant 0 : index
    %c1280 = arith.constant 1280 : index
    %286 = vector.load %arg13[%c0_134, %c1280] : memref<2x2304xf32, #tpu.memory_space<vmem>>, vector<2x128xf32>
    %c0_135 = arith.constant 0 : index
    %c1408 = arith.constant 1408 : index
    %287 = vector.load %arg13[%c0_135, %c1408] : memref<2x2304xf32, #tpu.memory_space<vmem>>, vector<2x128xf32>
    %cst_136 = arith.constant dense<0.000000e+00> : vector<2xf32>
    %288 = vector.multi_reduction <add>, %283, %cst_136 [1] : vector<2x64xf32> to vector<2xf32>
    %289 = vector.shape_cast %288 : vector<2xf32> to vector<2x1xf32>
    %cst_137 = arith.constant 6.400000e+01 : f32
    %290 = vector.broadcast %cst_137 : f32 to vector<2x1xf32>
    %291 = arith.divf %289, %290 : vector<2x1xf32>
    %292 = arith.mulf %283, %283 : vector<2x64xf32>
    %cst_138 = arith.constant dense<0.000000e+00> : vector<2xf32>
    %293 = vector.multi_reduction <add>, %292, %cst_138 [1] : vector<2x64xf32> to vector<2xf32>
    %294 = vector.shape_cast %293 : vector<2xf32> to vector<2x1xf32>
    %cst_139 = arith.constant 6.400000e+01 : f32
    %295 = vector.broadcast %cst_139 : f32 to vector<2x1xf32>
    %296 = arith.divf %294, %295 : vector<2x1xf32>
    %297 = arith.mulf %291, %291 : vector<2x1xf32>
    %298 = arith.subf %296, %297 : vector<2x1xf32>
    %299 = vector.broadcast %291 : vector<2x1xf32> to vector<2x64xf32>
    %300 = arith.subf %283, %299 : vector<2x64xf32>
    %cst_140 = arith.constant 9.99999974E-6 : f32
    %301 = vector.broadcast %cst_140 : f32 to vector<2x1xf32>
    %302 = arith.addf %298, %301 : vector<2x1xf32>
    %303 = math.rsqrt %302 : vector<2x1xf32>
    %304 = vector.broadcast %303 : vector<2x1xf32> to vector<2x64xf32>
    %305 = arith.mulf %300, %304 : vector<2x64xf32>
    %306 = arith.mulf %305, %284 : vector<2x64xf32>
    %307 = arith.addf %306, %285 : vector<2x64xf32>
    %cst_141 = arith.constant 5.000000e-01 : f32
    %308 = vector.broadcast %cst_141 : f32 to vector<2x64xf32>
    %309 = arith.mulf %308, %307 : vector<2x64xf32>
    %cst_142 = arith.constant 5.000000e-01 : f32
    %310 = vector.broadcast %cst_142 : f32 to vector<2x64xf32>
    %311 = arith.mulf %310, %307 : vector<2x64xf32>
    %312 = math.tanh %311 : vector<2x64xf32>
    %cst_143 = arith.constant 1.000000e+00 : f32
    %313 = vector.broadcast %cst_143 : f32 to vector<2x64xf32>
    %314 = arith.addf %313, %312 : vector<2x64xf32>
    %315 = arith.mulf %309, %314 : vector<2x64xf32>
    %316 = arith.truncf %315 : vector<2x64xf32> to vector<2x64xbf16>
    %c3 = arith.constant 3 : index
    %c0_144 = arith.constant 0 : index
    %c0_145 = arith.constant 0 : index
    %317 = vector.load %arg6[%c3, %c0_144, %c0_145] : memref<6x64x128xbf16, #tpu.memory_space<vmem>>, vector<1x64x128xbf16>
    %318 = vector.shape_cast %317 : vector<1x64x128xbf16> to vector<64x128xbf16>
    %cst_146 = arith.constant dense<0.000000e+00> : vector<2x128xf32>
    %319 = tpu.matmul %316, %318, %cst_146 {dimension_numbers = #tpu.dot_dimension_numbers<[1], [0], [0], [1], [0, 0, 1, 1], [], []>} : vector<2x64xbf16>, vector<64x128xbf16>, vector<2x128xf32> -> vector<2x128xf32>
    %c3_147 = arith.constant 3 : index
    %c0_148 = arith.constant 0 : index
    %320 = vector.load %arg8[%c3_147, %c0_148] : memref<12x128xf32, #tpu.memory_space<vmem>>, vector<1x128xf32>
    %321 = vector.broadcast %320 : vector<1x128xf32> to vector<2x128xf32>
    %322 = arith.addf %319, %321 : vector<2x128xf32>
    %cst_149 = arith.constant dense<0.000000e+00> : vector<2xf32>
    %323 = vector.multi_reduction <add>, %322, %cst_149 [1] : vector<2x128xf32> to vector<2xf32>
    %324 = vector.shape_cast %323 : vector<2xf32> to vector<2x1xf32>
    %cst_150 = arith.constant 1.280000e+02 : f32
    %325 = vector.broadcast %cst_150 : f32 to vector<2x1xf32>
    %326 = arith.divf %324, %325 : vector<2x1xf32>
    %327 = arith.mulf %322, %322 : vector<2x128xf32>
    %cst_151 = arith.constant dense<0.000000e+00> : vector<2xf32>
    %328 = vector.multi_reduction <add>, %327, %cst_151 [1] : vector<2x128xf32> to vector<2xf32>
    %329 = vector.shape_cast %328 : vector<2xf32> to vector<2x1xf32>
    %cst_152 = arith.constant 1.280000e+02 : f32
    %330 = vector.broadcast %cst_152 : f32 to vector<2x1xf32>
    %331 = arith.divf %329, %330 : vector<2x1xf32>
    %332 = arith.mulf %326, %326 : vector<2x1xf32>
    %333 = arith.subf %331, %332 : vector<2x1xf32>
    %334 = vector.broadcast %326 : vector<2x1xf32> to vector<2x128xf32>
    %335 = arith.subf %322, %334 : vector<2x128xf32>
    %cst_153 = arith.constant 9.99999974E-6 : f32
    %336 = vector.broadcast %cst_153 : f32 to vector<2x1xf32>
    %337 = arith.addf %333, %336 : vector<2x1xf32>
    %338 = math.rsqrt %337 : vector<2x1xf32>
    %339 = vector.broadcast %338 : vector<2x1xf32> to vector<2x128xf32>
    %340 = arith.mulf %335, %339 : vector<2x128xf32>
    %341 = arith.mulf %340, %286 : vector<2x128xf32>
    %342 = arith.addf %341, %287 : vector<2x128xf32>
    %cst_154 = arith.constant 5.000000e-01 : f32
    %343 = vector.broadcast %cst_154 : f32 to vector<2x128xf32>
    %344 = arith.mulf %343, %342 : vector<2x128xf32>
    %cst_155 = arith.constant 5.000000e-01 : f32
    %345 = vector.broadcast %cst_155 : f32 to vector<2x128xf32>
    %346 = arith.mulf %345, %342 : vector<2x128xf32>
    %347 = math.tanh %346 : vector<2x128xf32>
    %cst_156 = arith.constant 1.000000e+00 : f32
    %348 = vector.broadcast %cst_156 : f32 to vector<2x128xf32>
    %349 = arith.addf %348, %347 : vector<2x128xf32>
    %350 = arith.mulf %344, %349 : vector<2x128xf32>
    %351 = arith.truncf %350 : vector<2x128xf32> to vector<2x128xbf16>
    %c3_157 = arith.constant 3 : index
    %c0_158 = arith.constant 0 : index
    %c0_159 = arith.constant 0 : index
    %352 = vector.load %arg7[%c3_157, %c0_158, %c0_159] : memref<6x128x64xbf16, #tpu.memory_space<vmem>>, vector<1x128x64xbf16>
    %353 = vector.shape_cast %352 : vector<1x128x64xbf16> to vector<128x64xbf16>
    %cst_160 = arith.constant dense<0.000000e+00> : vector<2x64xf32>
    %354 = tpu.matmul %351, %353, %cst_160 {dimension_numbers = #tpu.dot_dimension_numbers<[1], [0], [0], [1], [0, 0, 1, 1], [], []>} : vector<2x128xbf16>, vector<128x64xbf16>, vector<2x64xf32> -> vector<2x64xf32>
    %c9 = arith.constant 9 : index
    %c0_161 = arith.constant 0 : index
    %355 = vector.load %arg8[%c9, %c0_161] : memref<12x128xf32, #tpu.memory_space<vmem>>, vector<1x64xf32>
    %356 = vector.broadcast %355 : vector<1x64xf32> to vector<2x64xf32>
    %357 = arith.addf %354, %356 : vector<2x64xf32>
    %358 = arith.addf %357, %283 : vector<2x64xf32>
    %c0_162 = arith.constant 0 : index
    %c1536 = arith.constant 1536 : index
    %359 = vector.load %arg13[%c0_162, %c1536] : memref<2x2304xf32, #tpu.memory_space<vmem>>, vector<2x64xf32>
    %c0_163 = arith.constant 0 : index
    %c1600 = arith.constant 1600 : index
    %360 = vector.load %arg13[%c0_163, %c1600] : memref<2x2304xf32, #tpu.memory_space<vmem>>, vector<2x64xf32>
    %c0_164 = arith.constant 0 : index
    %c1664 = arith.constant 1664 : index
    %361 = vector.load %arg13[%c0_164, %c1664] : memref<2x2304xf32, #tpu.memory_space<vmem>>, vector<2x128xf32>
    %c0_165 = arith.constant 0 : index
    %c1792 = arith.constant 1792 : index
    %362 = vector.load %arg13[%c0_165, %c1792] : memref<2x2304xf32, #tpu.memory_space<vmem>>, vector<2x128xf32>
    %cst_166 = arith.constant dense<0.000000e+00> : vector<2xf32>
    %363 = vector.multi_reduction <add>, %358, %cst_166 [1] : vector<2x64xf32> to vector<2xf32>
    %364 = vector.shape_cast %363 : vector<2xf32> to vector<2x1xf32>
    %cst_167 = arith.constant 6.400000e+01 : f32
    %365 = vector.broadcast %cst_167 : f32 to vector<2x1xf32>
    %366 = arith.divf %364, %365 : vector<2x1xf32>
    %367 = arith.mulf %358, %358 : vector<2x64xf32>
    %cst_168 = arith.constant dense<0.000000e+00> : vector<2xf32>
    %368 = vector.multi_reduction <add>, %367, %cst_168 [1] : vector<2x64xf32> to vector<2xf32>
    %369 = vector.shape_cast %368 : vector<2xf32> to vector<2x1xf32>
    %cst_169 = arith.constant 6.400000e+01 : f32
    %370 = vector.broadcast %cst_169 : f32 to vector<2x1xf32>
    %371 = arith.divf %369, %370 : vector<2x1xf32>
    %372 = arith.mulf %366, %366 : vector<2x1xf32>
    %373 = arith.subf %371, %372 : vector<2x1xf32>
    %374 = vector.broadcast %366 : vector<2x1xf32> to vector<2x64xf32>
    %375 = arith.subf %358, %374 : vector<2x64xf32>
    %cst_170 = arith.constant 9.99999974E-6 : f32
    %376 = vector.broadcast %cst_170 : f32 to vector<2x1xf32>
    %377 = arith.addf %373, %376 : vector<2x1xf32>
    %378 = math.rsqrt %377 : vector<2x1xf32>
    %379 = vector.broadcast %378 : vector<2x1xf32> to vector<2x64xf32>
    %380 = arith.mulf %375, %379 : vector<2x64xf32>
    %381 = arith.mulf %380, %359 : vector<2x64xf32>
    %382 = arith.addf %381, %360 : vector<2x64xf32>
    %cst_171 = arith.constant 5.000000e-01 : f32
    %383 = vector.broadcast %cst_171 : f32 to vector<2x64xf32>
    %384 = arith.mulf %383, %382 : vector<2x64xf32>
    %cst_172 = arith.constant 5.000000e-01 : f32
    %385 = vector.broadcast %cst_172 : f32 to vector<2x64xf32>
    %386 = arith.mulf %385, %382 : vector<2x64xf32>
    %387 = math.tanh %386 : vector<2x64xf32>
    %cst_173 = arith.constant 1.000000e+00 : f32
    %388 = vector.broadcast %cst_173 : f32 to vector<2x64xf32>
    %389 = arith.addf %388, %387 : vector<2x64xf32>
    %390 = arith.mulf %384, %389 : vector<2x64xf32>
    %391 = arith.truncf %390 : vector<2x64xf32> to vector<2x64xbf16>
    %c4_174 = arith.constant 4 : index
    %c0_175 = arith.constant 0 : index
    %c0_176 = arith.constant 0 : index
    %392 = vector.load %arg6[%c4_174, %c0_175, %c0_176] : memref<6x64x128xbf16, #tpu.memory_space<vmem>>, vector<1x64x128xbf16>
    %393 = vector.shape_cast %392 : vector<1x64x128xbf16> to vector<64x128xbf16>
    %cst_177 = arith.constant dense<0.000000e+00> : vector<2x128xf32>
    %394 = tpu.matmul %391, %393, %cst_177 {dimension_numbers = #tpu.dot_dimension_numbers<[1], [0], [0], [1], [0, 0, 1, 1], [], []>} : vector<2x64xbf16>, vector<64x128xbf16>, vector<2x128xf32> -> vector<2x128xf32>
    %c4_178 = arith.constant 4 : index
    %c0_179 = arith.constant 0 : index
    %395 = vector.load %arg8[%c4_178, %c0_179] : memref<12x128xf32, #tpu.memory_space<vmem>>, vector<1x128xf32>
    %396 = vector.broadcast %395 : vector<1x128xf32> to vector<2x128xf32>
    %397 = arith.addf %394, %396 : vector<2x128xf32>
    %cst_180 = arith.constant dense<0.000000e+00> : vector<2xf32>
    %398 = vector.multi_reduction <add>, %397, %cst_180 [1] : vector<2x128xf32> to vector<2xf32>
    %399 = vector.shape_cast %398 : vector<2xf32> to vector<2x1xf32>
    %cst_181 = arith.constant 1.280000e+02 : f32
    %400 = vector.broadcast %cst_181 : f32 to vector<2x1xf32>
    %401 = arith.divf %399, %400 : vector<2x1xf32>
    %402 = arith.mulf %397, %397 : vector<2x128xf32>
    %cst_182 = arith.constant dense<0.000000e+00> : vector<2xf32>
    %403 = vector.multi_reduction <add>, %402, %cst_182 [1] : vector<2x128xf32> to vector<2xf32>
    %404 = vector.shape_cast %403 : vector<2xf32> to vector<2x1xf32>
    %cst_183 = arith.constant 1.280000e+02 : f32
    %405 = vector.broadcast %cst_183 : f32 to vector<2x1xf32>
    %406 = arith.divf %404, %405 : vector<2x1xf32>
    %407 = arith.mulf %401, %401 : vector<2x1xf32>
    %408 = arith.subf %406, %407 : vector<2x1xf32>
    %409 = vector.broadcast %401 : vector<2x1xf32> to vector<2x128xf32>
    %410 = arith.subf %397, %409 : vector<2x128xf32>
    %cst_184 = arith.constant 9.99999974E-6 : f32
    %411 = vector.broadcast %cst_184 : f32 to vector<2x1xf32>
    %412 = arith.addf %408, %411 : vector<2x1xf32>
    %413 = math.rsqrt %412 : vector<2x1xf32>
    %414 = vector.broadcast %413 : vector<2x1xf32> to vector<2x128xf32>
    %415 = arith.mulf %410, %414 : vector<2x128xf32>
    %416 = arith.mulf %415, %361 : vector<2x128xf32>
    %417 = arith.addf %416, %362 : vector<2x128xf32>
    %cst_185 = arith.constant 5.000000e-01 : f32
    %418 = vector.broadcast %cst_185 : f32 to vector<2x128xf32>
    %419 = arith.mulf %418, %417 : vector<2x128xf32>
    %cst_186 = arith.constant 5.000000e-01 : f32
    %420 = vector.broadcast %cst_186 : f32 to vector<2x128xf32>
    %421 = arith.mulf %420, %417 : vector<2x128xf32>
    %422 = math.tanh %421 : vector<2x128xf32>
    %cst_187 = arith.constant 1.000000e+00 : f32
    %423 = vector.broadcast %cst_187 : f32 to vector<2x128xf32>
    %424 = arith.addf %423, %422 : vector<2x128xf32>
    %425 = arith.mulf %419, %424 : vector<2x128xf32>
    %426 = arith.truncf %425 : vector<2x128xf32> to vector<2x128xbf16>
    %c4_188 = arith.constant 4 : index
    %c0_189 = arith.constant 0 : index
    %c0_190 = arith.constant 0 : index
    %427 = vector.load %arg7[%c4_188, %c0_189, %c0_190] : memref<6x128x64xbf16, #tpu.memory_space<vmem>>, vector<1x128x64xbf16>
    %428 = vector.shape_cast %427 : vector<1x128x64xbf16> to vector<128x64xbf16>
    %cst_191 = arith.constant dense<0.000000e+00> : vector<2x64xf32>
    %429 = tpu.matmul %426, %428, %cst_191 {dimension_numbers = #tpu.dot_dimension_numbers<[1], [0], [0], [1], [0, 0, 1, 1], [], []>} : vector<2x128xbf16>, vector<128x64xbf16>, vector<2x64xf32> -> vector<2x64xf32>
    %c10 = arith.constant 10 : index
    %c0_192 = arith.constant 0 : index
    %430 = vector.load %arg8[%c10, %c0_192] : memref<12x128xf32, #tpu.memory_space<vmem>>, vector<1x64xf32>
    %431 = vector.broadcast %430 : vector<1x64xf32> to vector<2x64xf32>
    %432 = arith.addf %429, %431 : vector<2x64xf32>
    %433 = arith.addf %432, %358 : vector<2x64xf32>
    %c0_193 = arith.constant 0 : index
    %c1920 = arith.constant 1920 : index
    %434 = vector.load %arg13[%c0_193, %c1920] : memref<2x2304xf32, #tpu.memory_space<vmem>>, vector<2x64xf32>
    %c0_194 = arith.constant 0 : index
    %c1984 = arith.constant 1984 : index
    %435 = vector.load %arg13[%c0_194, %c1984] : memref<2x2304xf32, #tpu.memory_space<vmem>>, vector<2x64xf32>
    %c0_195 = arith.constant 0 : index
    %c2048 = arith.constant 2048 : index
    %436 = vector.load %arg13[%c0_195, %c2048] : memref<2x2304xf32, #tpu.memory_space<vmem>>, vector<2x128xf32>
    %c0_196 = arith.constant 0 : index
    %c2176 = arith.constant 2176 : index
    %437 = vector.load %arg13[%c0_196, %c2176] : memref<2x2304xf32, #tpu.memory_space<vmem>>, vector<2x128xf32>
    %cst_197 = arith.constant dense<0.000000e+00> : vector<2xf32>
    %438 = vector.multi_reduction <add>, %433, %cst_197 [1] : vector<2x64xf32> to vector<2xf32>
    %439 = vector.shape_cast %438 : vector<2xf32> to vector<2x1xf32>
    %cst_198 = arith.constant 6.400000e+01 : f32
    %440 = vector.broadcast %cst_198 : f32 to vector<2x1xf32>
    %441 = arith.divf %439, %440 : vector<2x1xf32>
    %442 = arith.mulf %433, %433 : vector<2x64xf32>
    %cst_199 = arith.constant dense<0.000000e+00> : vector<2xf32>
    %443 = vector.multi_reduction <add>, %442, %cst_199 [1] : vector<2x64xf32> to vector<2xf32>
    %444 = vector.shape_cast %443 : vector<2xf32> to vector<2x1xf32>
    %cst_200 = arith.constant 6.400000e+01 : f32
    %445 = vector.broadcast %cst_200 : f32 to vector<2x1xf32>
    %446 = arith.divf %444, %445 : vector<2x1xf32>
    %447 = arith.mulf %441, %441 : vector<2x1xf32>
    %448 = arith.subf %446, %447 : vector<2x1xf32>
    %449 = vector.broadcast %441 : vector<2x1xf32> to vector<2x64xf32>
    %450 = arith.subf %433, %449 : vector<2x64xf32>
    %cst_201 = arith.constant 9.99999974E-6 : f32
    %451 = vector.broadcast %cst_201 : f32 to vector<2x1xf32>
    %452 = arith.addf %448, %451 : vector<2x1xf32>
    %453 = math.rsqrt %452 : vector<2x1xf32>
    %454 = vector.broadcast %453 : vector<2x1xf32> to vector<2x64xf32>
    %455 = arith.mulf %450, %454 : vector<2x64xf32>
    %456 = arith.mulf %455, %434 : vector<2x64xf32>
    %457 = arith.addf %456, %435 : vector<2x64xf32>
    %cst_202 = arith.constant 5.000000e-01 : f32
    %458 = vector.broadcast %cst_202 : f32 to vector<2x64xf32>
    %459 = arith.mulf %458, %457 : vector<2x64xf32>
    %cst_203 = arith.constant 5.000000e-01 : f32
    %460 = vector.broadcast %cst_203 : f32 to vector<2x64xf32>
    %461 = arith.mulf %460, %457 : vector<2x64xf32>
    %462 = math.tanh %461 : vector<2x64xf32>
    %cst_204 = arith.constant 1.000000e+00 : f32
    %463 = vector.broadcast %cst_204 : f32 to vector<2x64xf32>
    %464 = arith.addf %463, %462 : vector<2x64xf32>
    %465 = arith.mulf %459, %464 : vector<2x64xf32>
    %466 = arith.truncf %465 : vector<2x64xf32> to vector<2x64xbf16>
    %c5_205 = arith.constant 5 : index
    %c0_206 = arith.constant 0 : index
    %c0_207 = arith.constant 0 : index
    %467 = vector.load %arg6[%c5_205, %c0_206, %c0_207] : memref<6x64x128xbf16, #tpu.memory_space<vmem>>, vector<1x64x128xbf16>
    %468 = vector.shape_cast %467 : vector<1x64x128xbf16> to vector<64x128xbf16>
    %cst_208 = arith.constant dense<0.000000e+00> : vector<2x128xf32>
    %469 = tpu.matmul %466, %468, %cst_208 {dimension_numbers = #tpu.dot_dimension_numbers<[1], [0], [0], [1], [0, 0, 1, 1], [], []>} : vector<2x64xbf16>, vector<64x128xbf16>, vector<2x128xf32> -> vector<2x128xf32>
    %c5_209 = arith.constant 5 : index
    %c0_210 = arith.constant 0 : index
    %470 = vector.load %arg8[%c5_209, %c0_210] : memref<12x128xf32, #tpu.memory_space<vmem>>, vector<1x128xf32>
    %471 = vector.broadcast %470 : vector<1x128xf32> to vector<2x128xf32>
    %472 = arith.addf %469, %471 : vector<2x128xf32>
    %cst_211 = arith.constant dense<0.000000e+00> : vector<2xf32>
    %473 = vector.multi_reduction <add>, %472, %cst_211 [1] : vector<2x128xf32> to vector<2xf32>
    %474 = vector.shape_cast %473 : vector<2xf32> to vector<2x1xf32>
    %cst_212 = arith.constant 1.280000e+02 : f32
    %475 = vector.broadcast %cst_212 : f32 to vector<2x1xf32>
    %476 = arith.divf %474, %475 : vector<2x1xf32>
    %477 = arith.mulf %472, %472 : vector<2x128xf32>
    %cst_213 = arith.constant dense<0.000000e+00> : vector<2xf32>
    %478 = vector.multi_reduction <add>, %477, %cst_213 [1] : vector<2x128xf32> to vector<2xf32>
    %479 = vector.shape_cast %478 : vector<2xf32> to vector<2x1xf32>
    %cst_214 = arith.constant 1.280000e+02 : f32
    %480 = vector.broadcast %cst_214 : f32 to vector<2x1xf32>
    %481 = arith.divf %479, %480 : vector<2x1xf32>
    %482 = arith.mulf %476, %476 : vector<2x1xf32>
    %483 = arith.subf %481, %482 : vector<2x1xf32>
    %484 = vector.broadcast %476 : vector<2x1xf32> to vector<2x128xf32>
    %485 = arith.subf %472, %484 : vector<2x128xf32>
    %cst_215 = arith.constant 9.99999974E-6 : f32
    %486 = vector.broadcast %cst_215 : f32 to vector<2x1xf32>
    %487 = arith.addf %483, %486 : vector<2x1xf32>
    %488 = math.rsqrt %487 : vector<2x1xf32>
    %489 = vector.broadcast %488 : vector<2x1xf32> to vector<2x128xf32>
    %490 = arith.mulf %485, %489 : vector<2x128xf32>
    %491 = arith.mulf %490, %436 : vector<2x128xf32>
    %492 = arith.addf %491, %437 : vector<2x128xf32>
    %cst_216 = arith.constant 5.000000e-01 : f32
    %493 = vector.broadcast %cst_216 : f32 to vector<2x128xf32>
    %494 = arith.mulf %493, %492 : vector<2x128xf32>
    %cst_217 = arith.constant 5.000000e-01 : f32
    %495 = vector.broadcast %cst_217 : f32 to vector<2x128xf32>
    %496 = arith.mulf %495, %492 : vector<2x128xf32>
    %497 = math.tanh %496 : vector<2x128xf32>
    %cst_218 = arith.constant 1.000000e+00 : f32
    %498 = vector.broadcast %cst_218 : f32 to vector<2x128xf32>
    %499 = arith.addf %498, %497 : vector<2x128xf32>
    %500 = arith.mulf %494, %499 : vector<2x128xf32>
    %501 = arith.truncf %500 : vector<2x128xf32> to vector<2x128xbf16>
    %c5_219 = arith.constant 5 : index
    %c0_220 = arith.constant 0 : index
    %c0_221 = arith.constant 0 : index
    %502 = vector.load %arg7[%c5_219, %c0_220, %c0_221] : memref<6x128x64xbf16, #tpu.memory_space<vmem>>, vector<1x128x64xbf16>
    %503 = vector.shape_cast %502 : vector<1x128x64xbf16> to vector<128x64xbf16>
    %cst_222 = arith.constant dense<0.000000e+00> : vector<2x64xf32>
    %504 = tpu.matmul %501, %503, %cst_222 {dimension_numbers = #tpu.dot_dimension_numbers<[1], [0], [0], [1], [0, 0, 1, 1], [], []>} : vector<2x128xbf16>, vector<128x64xbf16>, vector<2x64xf32> -> vector<2x64xf32>
    %c11 = arith.constant 11 : index
    %c0_223 = arith.constant 0 : index
    %505 = vector.load %arg8[%c11, %c0_223] : memref<12x128xf32, #tpu.memory_space<vmem>>, vector<1x64xf32>
    %506 = vector.broadcast %505 : vector<1x64xf32> to vector<2x64xf32>
    %507 = arith.addf %504, %506 : vector<2x64xf32>
    %508 = arith.addf %507, %433 : vector<2x64xf32>
    %cst_224 = arith.constant dense<0.000000e+00> : vector<2xf32>
    %509 = vector.multi_reduction <add>, %508, %cst_224 [1] : vector<2x64xf32> to vector<2xf32>
    %510 = vector.shape_cast %509 : vector<2xf32> to vector<2x1xf32>
    %cst_225 = arith.constant 6.400000e+01 : f32
    %511 = vector.broadcast %cst_225 : f32 to vector<2x1xf32>
    %512 = arith.divf %510, %511 : vector<2x1xf32>
    %513 = arith.mulf %508, %508 : vector<2x64xf32>
    %cst_226 = arith.constant dense<0.000000e+00> : vector<2xf32>
    %514 = vector.multi_reduction <add>, %513, %cst_226 [1] : vector<2x64xf32> to vector<2xf32>
    %515 = vector.shape_cast %514 : vector<2xf32> to vector<2x1xf32>
    %cst_227 = arith.constant 6.400000e+01 : f32
    %516 = vector.broadcast %cst_227 : f32 to vector<2x1xf32>
    %517 = arith.divf %515, %516 : vector<2x1xf32>
    %518 = arith.mulf %512, %512 : vector<2x1xf32>
    %519 = arith.subf %517, %518 : vector<2x1xf32>
    %520 = vector.broadcast %512 : vector<2x1xf32> to vector<2x64xf32>
    %521 = arith.subf %508, %520 : vector<2x64xf32>
    %cst_228 = arith.constant 9.99999974E-6 : f32
    %522 = vector.broadcast %cst_228 : f32 to vector<2x1xf32>
    %523 = arith.addf %519, %522 : vector<2x1xf32>
    %524 = math.rsqrt %523 : vector<2x1xf32>
    %525 = vector.broadcast %524 : vector<2x1xf32> to vector<2x64xf32>
    %526 = arith.mulf %521, %525 : vector<2x64xf32>
    %527 = arith.truncf %526 : vector<2x64xf32> to vector<2x64xbf16>
    %c832_229 = arith.constant 832 : index
    %c0_230 = arith.constant 0 : index
    %528 = vector.load %arg5[%c832_229, %c0_230] : memref<896x64xbf16, #tpu.memory_space<vmem>>, vector<64x64xbf16>
    %cst_231 = arith.constant dense<0.000000e+00> : vector<2x64xf32>
    %529 = tpu.matmul %527, %528, %cst_231 {dimension_numbers = #tpu.dot_dimension_numbers<[1], [0], [0], [1], [0, 0, 1, 1], [], []>} : vector<2x64xbf16>, vector<64x64xbf16>, vector<2x64xf32> -> vector<2x64xf32>
    %c3_232 = arith.constant 3 : index
    %c0_233 = arith.constant 0 : index
    %530 = vector.load %arg4[%c3_232, %c0_233] : memref<6x64xf32, #tpu.memory_space<vmem>>, vector<1x64xf32>
    %531 = vector.broadcast %530 : vector<1x64xf32> to vector<2x64xf32>
    %532 = arith.addf %529, %531 : vector<2x64xf32>
    %533 = vector.extract_strided_slice %532 {offsets = [0, 0], sizes = [2, 10], strides = [1, 1]} : vector<2x64xf32> to vector<2x10xf32>
    %c0_234 = arith.constant 0 : index
    %c0_235 = arith.constant 0 : index
    %534 = vector.load %arg11[%c0_234, %c0_235] : memref<2x10xf32, #tpu.memory_space<vmem>>, vector<2x10xf32>
    tpu.vector_store %arg11[%c0_234, %c0_235], %533 {strides = array<i32>} : memref<2x10xf32, #tpu.memory_space<vmem>>, vector<2x10xf32>,
    return
  }
}

</mosaic_0001>

<bundles_post_ra>
// kernel: forward_pallas.1
= control target key start
LH: loop header
LB: loop body
LE: loop exit
PB: predicated region body
PF: predicated region fallthrough
CT: control target
= control target key end

     0   :  { %16 = vsyncpa [#allocation6], 0  ;;  %s11504_s0 = inlined_call_operand.vmem [shape: f32[2,11], index: 0, kind: input, shape index: {}]   ;;  %s11505_s1 = inlined_call_operand.vmem [shape: f32[2,1], index: 1, kind: input, shape index: {}]   ;;  %s11506_s2 = inlined_call_operand.hbm [shape: f32[2,512], index: 2, kind: input, shape index: {}]   ;;  %s11507_s3 = inlined_call_operand.hbm [shape: f32[11,640], index: 3, kind: input, shape index: {}]   ;;  %s11508_s4 = inlined_call_operand.hbm [shape: f32[6,64], index: 4, kind: input, shape index: {}]   ;;  %s11509_s5 = inlined_call_operand.vmem [shape: bf16[896,64], index: 5, kind: input, shape index: {}]   ;;  %s11510_s6 = inlined_call_operand.hbm [shape: bf16[6,64,128], index: 6, kind: input, shape index: {}]   ;;  %s11511_s7 = inlined_call_operand.vmem [shape: bf16[6,128,64], index: 7, kind: input, shape index: {}]   ;;  %s11512_s8 = inlined_call_operand.hbm [shape: f32[12,128], index: 8, kind: input, shape index: {}]   ;;  %s11513_s9 = inlined_call_operand.hbm [shape: bf16[512,2304], index: 9, kind: input, shape index: {}]   ;;  %s11514_s10 = inlined_call_operand.hbm [shape: f32[1,2304], index: 10, kind: input, shape index: {}]   ;;  %s11515_s11 = inlined_call_operand.hbm [shape: f32[2,10], index: 11, kind: output, shape index: {}]  }
   0x1   :  { %17 = vsyncpa [#allocation9], 0 }
   0x2   :  { %18 = vsyncpa [#allocation12], 0 }
   0x3   :  { %19 = vsyncpa [#allocation15], 0 }
   0x4   :  { %20 = vsyncpa [#allocation7], 0  ;;  %s10324_s17 = smov [#allocation8]  }
   0x5   :  { %s40_s18 = sshll.u32 %s10324_s17, 4  ;;  %s41_s18 = int_to_ptr.vmem [resolvable:$true] %s40_s18 }
   0x6   :  { %s10160_s19 = scalar_lea.vmem %s41_s18, 1280  ;;  %p10165_p1 = scmp.lt.s32.totalorder %s41_s18, %s41_s18 }
   0x7   :  { %p10161_p0 = scmp.ne.s32.totalorder %s41_s18, %s10160_s19  ;;  %p10166_p2 = scmp.lt.s32.totalorder %s10160_s19, %s10160_s19 }
   0x9   :  { %p10167_p3 = por %p10166_p2, %p10165_p1 }
   0xb   :  { %p10168_p4 = pnand %p10167_p3, %p10161_p0 }
   0xd   :  { %10171 = shalt.err (!%p10168_p4)
}
   0xe   :  { %s10325_s20 = smov 640   ;;  %s10326_s21 = smov 40  }
   0xf   :  { %46 = dma.hbm_to_vmem [thread:$0]  %s11507_s3, 1280, %s41_s18, [#allocation9], %s10325_s20, %s10325_s20, %s10326_s21  }
  0x10   :  { %s10327_s24 = smov [#allocation11]  }
  0x11   :  { %s64_s25 = sshll.u32 %s10327_s24, 4  ;;  %s65_s25 = int_to_ptr.vmem [resolvable:$true] %s64_s25 }
  0x12   :  { %s10180_s26 = scalar_lea.vmem %s65_s25, 3072  ;;  %p10185_p6 = scmp.lt.s32.totalorder %s65_s25, %s65_s25 }
  0x13   :  { %p10181_p5 = scmp.ne.s32.totalorder %s65_s25, %s10180_s26  ;;  %p10186_p7 = scmp.lt.s32.totalorder %s10180_s26, %s10180_s26 }
  0x15   :  { %p10187_p8 = por %p10186_p7, %p10185_p6 }
  0x17   :  { %p10188_p9 = pnand %p10187_p8, %p10181_p5 }
  0x19   :  { %10191 = shalt.err (!%p10188_p9)
}
  0x1a   :  { %s10328_s27 = smov 64   ;;  %s10329_s28 = smov 4  }
  0x1b   :  { %70 = dma.hbm_to_vmem [thread:$0]  %s11510_s6, 3072, %s65_s25, [#allocation12], %s10328_s27, %s10328_s27, %s10329_s28  }
  0x1c   :  { %s10330_s12 = smov [#allocation5]   ;;  %s10331_s13 = smov [#allocation10]  }
  0x1d   :  { %s31_s3 = sshll.u32 %s10330_s12, 4  ;;  %s53_s14 = sshll.u32 %s10331_s13, 4  ;;  %s32_s3 = int_to_ptr.vmem [resolvable:$true] %s31_s3  ;;  %s54_s14 = int_to_ptr.vmem [resolvable:$true] %s53_s14 }
  0x1e   :  { %s10200_s15 = scalar_lea.vmem %s32_s3, 128  ;;  %p10205_p11 = scmp.lt.s32.totalorder %s32_s3, %s32_s3 }
  0x1f   :  { %p10201_p10 = scmp.ne.s32.totalorder %s32_s3, %s10200_s15  ;;  %p10206_p12 = scmp.lt.s32.totalorder %s10200_s15, %s10200_s15 }
  0x21   :  { %p10207_p13 = por %p10206_p12, %p10205_p11 }
  0x23   :  { %p10208_p0 = pnand %p10207_p13, %p10201_p10 }
  0x25   :  { %10211 = shalt.err (!%p10208_p0)
}
  0x26   :  { %34 = dma.hbm_to_vmem [thread:$0]  %s11506_s2, 128, %s32_s3, [#allocation6]  }
  0x27   :  { %s10220_s18 = scalar_lea.vmem %s54_s14, 128  ;;  %p10225_p2 = scmp.lt.s32.totalorder %s54_s14, %s54_s14 }
  0x28   :  { %p10221_p1 = scmp.ne.s32.totalorder %s54_s14, %s10220_s18  ;;  %p10226_p3 = scmp.lt.s32.totalorder %s10220_s18, %s10220_s18 }
  0x2a   :  { %p10227_p4 = por %p10226_p3, %p10225_p2 }
  0x2c   :  { %p10228_p5 = pnand %p10227_p4, %p10221_p1 }
  0x2e   :  { %10231 = shalt.err (!%p10228_p5)
}
  0x2f   :  { %56 = dma.hbm_to_vmem [thread:$0]  %s11508_s4, 128, %s54_s14, [#allocation9]  }
  0x30   :  { %s10332_s20 = smov [#allocation13]  }
  0x31   :  { %s78_s21 = sshll.u32 %s10332_s20, 4  ;;  %s79_s21 = int_to_ptr.vmem [resolvable:$true] %s78_s21 }
  0x32   :  { %s10240_s22 = scalar_lea.vmem %s79_s21, 256  ;;  %p10245_p7 = scmp.lt.s32.totalorder %s79_s21, %s79_s21 }
  0x33   :  { %p10241_p6 = scmp.ne.s32.totalorder %s79_s21, %s10240_s22  ;;  %p10246_p8 = scmp.lt.s32.totalorder %s10240_s22, %s10240_s22 }
  0x35   :  { %p10247_p9 = por %p10246_p8, %p10245_p7 }
  0x37   :  { %p10248_p10 = pnand %p10247_p9, %p10241_p6 }
  0x39   :  { %10251 = shalt.err (!%p10248_p10)
}
  0x3a   :  { %s10333_s2 = smov 128   ;;  %s10334_s23 = smov 8  }
  0x3b   :  { %84 = dma.hbm_to_vmem [thread:$0]  %s11512_s8, 256, %s79_s21, [#allocation12], %s10333_s2, %s10333_s2, %s10334_s23  }
  0x3c   :  { %s10335_s26 = smov [#allocation14]  }
  0x3d   :  { %s91_s28 = sshll.u32 %s10335_s26, 4  ;;  %s92_s28 = int_to_ptr.vmem [resolvable:$true] %s91_s28 }
  0x3e   :  { %s10260_s4 = scalar_lea.vmem %s92_s28, 288  ;;  %p10265_p12 = scmp.lt.s32.totalorder %s92_s28, %s92_s28 }
  0x3f   :  { %p10261_p11 = scmp.ne.s32.totalorder %s92_s28, %s10260_s4  ;;  %p10266_p13 = scmp.lt.s32.totalorder %s10260_s4, %s10260_s4 }
  0x41   :  { %p10267_p0 = por %p10266_p13, %p10265_p12 }
  0x43   :  { %p10268_p1 = pnand %p10267_p0, %p10261_p11 }
  0x45   :  { %10271 = shalt.err (!%p10268_p1)
}
  0x46   :  { %94 = dma.hbm_to_vmem [thread:$0]  %s11514_s10, 288, %s92_s28, [#allocation15]  }
  0x47   :  { %10312 = dma.done.wait [#allocation6], 128  }
  0x48   :  { %10313 = vsyncadd [#allocation6], 4294967168 }
  0x49   :  { %10314 = dma.done.wait [#allocation9], 1408  }
  0x4a   :  { %10315 = vsyncadd [#allocation9], 4294965888 }
  0x4b   :  { %10316 = dma.done.wait [#allocation12], 3328  }
  0x4c   :  { %10317 = vsyncadd [#allocation12], 4294963968 }
  0x4d   :  { %10318 = dma.done.wait [#allocation15], 288  }
  0x4e   :  { %10319 = vsyncadd [#allocation15], 4294967008  ;;  %v10336_v0 = vmov 0   ;;  %v1704_v1 = vld [vmem:[#allocation5] sm:$0xff]  ;;  %v125_v2 = vld [vmem:[%s11505_s1] sm:$0x3] }
  0x4f   :  { %9078 = vset.pattern.permute.xlu0 %v10336_v0  ;;  %v1705_v3 = vmul.f32 0.5, %v1704_v1  ;;  %v9079_v7 = vld [vmem:[%s11509_s5 + $0x18] sm:$0xff]   ;;  %v10337_v8 = vmov 0.0   ;;  %vm10338_vm0 = vmmov 0   ;;  %v9080_v9 = vld [vmem:[%s11509_s5 + $0x10] sm:$0xff]   ;;  %v9081_v10 = vld [vmem:[%s11509_s5 + $0x8] sm:$0xff]  }
  0x50   :  { %129 = vperm.xlu0 %9078, %v125_v2   ;;  %8763 = vmatprep.subr.bf16.mxu0 %v10337_v8  ;;  %v9082_v11 = vld [vmem:[%s11509_s5] sm:$0xff]   ;;  %v421_v12 = vld [vmem:[#allocation8 + $0x30] sm:$0x7]  ;;  %vm429_vm1 = vcmask 1042432   ;;  %v10339_v28 = vmov 683565275  }
  0x51   :  { %9131 = vtanh.f32 %v1705_v3  ;;  %8771 = vmatprep.mubr.msk.bf16.mxu0 %vm10338_vm0, %v10337_v8  ;;  %8764 = vmatpush3.bf16.msra.mxu0 %v9079_v7  ;;  %v7757_v13 = vld [vmem:[#allocation10 + $0x4] ss:$0 sm:$0xff]  ;;  %v7758_v14 = vld [vmem:[#allocation10 + $0x5] ss:$0 sm:$0xff]  ;;  %v10340_v30 = vmov 2475754826  }
  0x52   :  { %8775 = vmatprep.subr.bf16.mxu1 %v10337_v8  ;;  %8765 = vmatprep.subr.bf16.mxu0 %v10337_v8  ;;  %v10341_v33 = vmov 2131351028   ;;  %v10342_v36 = vmov 2102212464   ;;  %v10343_v39 = vmov 920167782  }
  0x53   :  { %8783 = vmatprep.mubr.msk.bf16.mxu1 %vm10338_vm0, %v10337_v8  ;;  %v10344_v42 = vmov 1326507024   ;;  %vm285_vm15 = vcmask 523264   ;;  %s10345_s1 = smov [#allocation2]  }
  0x54   :  { %s121_s13 = sshll.u32 %s10345_s1, 4  ;;  %s122_s13 = int_to_ptr.vmem [resolvable:$true] %s121_s13 }
  0x55   :  { %8766 = vmatpush3.bf16.msra.mxu0 %v9080_v9  ;;  %s10280_s14 = scalar_lea.vmem %s122_s13, 73728  ;;  %p10285_p3 = scmp.lt.s32.totalorder %s122_s13, %s122_s13 }
  0x56   :  { %8767 = vmatprep.subr.bf16.mxu0 %v10337_v8  ;;  %p10281_p2 = scmp.ne.s32.totalorder %s122_s13, %s10280_s14  ;;  %p10286_p4 = scmp.lt.s32.totalorder %s10280_s14, %s10280_s14 }
  0x58   :  { %p10287_p5 = por %p10286_p4, %p10285_p3 }
  0x59   :  { %8768 = vmatpush3.bf16.msra.mxu0 %v9081_v10 }
  0x5a   :  { %8769 = vmatprep.subr.bf16.mxu0 %v10337_v8  ;;  %p10288_p6 = pnand %p10287_p5, %p10281_p2 }
  0x5d   :  { %8770 = vmatpush3.bf16.msra.mxu0 %v9082_v11 }
  0x5e   :  { %v9132_v4 = vpop.eup %9131  ;;  %7775 = vmatprep.subr.msk.mxu0 %vm429_vm1, %v421_v12 }
  0x5f   :  { %v1707_v5 = vadd.f32 1.0, %v9132_v4 }
  0x61   :  { %v10431_v6 = vmul.f32 %v1707_v5, %v1705_v3 }
  0xcb   :  { %v130_v15 = vpop.permute.xlu0 %129 }
  0xcc   :  { %v136_v16 = vmul.f32 %v7757_v13, %v130_v15 }
  0xce   :  { %v10455_v17 = vadd.f32 %v7758_v14, %v136_v16 }
  0xd0   :  { %v146_v18 = vand.u32 2139095040, %v10455_v17  ;;  %v143_v22 = vand.u32 2147483647, %v10455_v17  ;;  %vm145_vm9 = vcmp.lt.s32.totalorder %v10455_v17, 0  ;;  %vm235_vm14 = vweird.f32 %v10455_v17 }
  0xd2   :  { %v147_v19 = vshrl.u32 %v146_v18, 23  ;;  %v150_v25 = vand.u32 8388607, %v143_v22  ;;  %vm144_vm10 = vcmp.le.f32.partialorder %v143_v22, 0.7853982 }
  0xd4   :  { %v7759_v20 = vadd.s32 4294967169, %v147_v19  ;;  %v151_v44 = vor.u32 8388608, %v150_v25 }
  0xd6   :  { %v153_v21 = vadd.s32 1, %v7759_v20  ;;  %v191_v58 = vshll.u32 %v151_v44, 8 }
  0xd8   :  { %vm154_vm2 = vcmp.gt.s32.totalorder %v153_v21, 0 }
  0xd9   :  { %v155_v23 = vsel %vm154_vm2, %v153_v21, 0  ;;  %vm425_vm2 = vcmask 89088  }
  0xda   :  { %v157_v24 = vand.u32 31, %v155_v23  ;;  %v156_v27 = vshrl.u32 %v155_v23, 5 }
  0xdc   :  { %v158_v26 = vsub.s32 32, %v157_v24  ;;  %v160_v29 = vshll.u32 %v10339_v28, %v157_v24  ;;  %v163_v31 = vshll.u32 %v10340_v30, %v157_v24  ;;  %v166_v35 = vshll.u32 %v10341_v33, %v157_v24 }
  0xdd   :  { %v169_v38 = vshll.u32 %v10342_v36, %v157_v24  ;;  %v172_v41 = vshll.u32 %v10343_v39, %v157_v24  ;;  %vm175_vm3 = vcmp.lt.s32.totalorder %v156_v27, 1  ;;  %vm178_vm4 = vcmp.lt.s32.totalorder %v156_v27, 4 }
  0xde   :  { %v161_v32 = vshrl.u32 %v10340_v30, %v158_v26  ;;  %v164_v34 = vshrl.u32 %v10341_v33, %v158_v26  ;;  %v167_v37 = vshrl.u32 %v10342_v36, %v158_v26  ;;  %v170_v40 = vshrl.u32 %v10343_v39, %v158_v26 }
  0xdf   :  { %v173_v43 = vshrl.u32 %v10344_v42, %v158_v26  ;;  %v159_v53 = vshrl.u32 %v10339_v28, %v158_v26  ;;  %vm177_vm5 = vcmp.lt.s32.totalorder %v156_v27, 3  ;;  %vm176_vm6 = vcmp.lt.s32.totalorder %v156_v27, 2 }
  0xe0   :  { %v162_v45 = vor.u32 %v161_v32, %v160_v29  ;;  %v165_v46 = vor.u32 %v164_v34, %v163_v31  ;;  %v168_v47 = vor.u32 %v167_v37, %v166_v35  ;;  %v171_v48 = vor.u32 %v170_v40, %v169_v38 }
  0xe1   :  { %v174_v49 = vor.u32 %v173_v43, %v172_v41 }
  0xe2   :  { %v180_v50 = vsel %vm178_vm4, %v168_v47, 2102212464  ;;  %v183_v51 = vsel %vm175_vm3, %v162_v45, %v165_v46  ;;  %v187_v52 = vsel %vm175_vm3, %v165_v46, %v168_v47  ;;  %v184_v54 = vsel %vm178_vm4, %v171_v48, 920167782 }
  0xe3   :  { %v188_v55 = vsel %vm178_vm4, %v174_v49, 1326507024  ;;  %v185_v56 = vsel %vm177_vm5, %v168_v47, %v184_v54  ;;  %v179_v59 = vsel %vm175_vm3, %v159_v53, %v162_v45  ;;  %v181_v60 = vsel %vm177_vm5, %v165_v46, %v180_v50 }
  0xe4   :  { %v189_v57 = vsel %vm177_vm5, %v171_v48, %v188_v55  ;;  %v186_v61 = vsel %vm176_vm6, %v183_v51, %v185_v56  ;;  %v182_v3 = vsel %vm176_vm6, %v179_v59, %v181_v60  ;;  %v420_v55 = vld [vmem:[#allocation8 + $0x28] sm:$0x7]  ;;  %v419_v59 = vld [vmem:[#allocation8 + $0x20] sm:$0xff]  ;;  %v9083_v60 = vld [vmem:[%s11509_s5 + $0x38] sm:$0xff]  }
  0xe5   :  { %v190_v62 = vsel %vm176_vm6, %v187_v52, %v189_v57  ;;  %v10475_v1 = vmul.u32.u64.low %v191_v58, %v186_v61  ;;  %v10476_v2 = vmul.u32.u64.high %v191_v58, %v186_v61, %v10475_v1  ;;  %v198_v5 = vmul.u32 %v191_v58, %v182_v3  ;;  %v416_v56 = vld [vmem:[#allocation8 + $0x8] sm:$0xff]  ;;  %v415_v57 = vld [vmem:[#allocation8] sm:$0xff]  ;;  %8776 = vmatpush3.bf16.msra.mxu1 %v9083_v60 }
  0xe6   :  { %v10472_v63 = vmul.u32.u64.low %v191_v58, %v190_v62  ;;  %v10473_v0 = vmul.u32.u64.high %v191_v58, %v190_v62, %v10472_v63  ;;  %v424_v58 = vld [vmem:[#allocation8 + $0x48] sm:$0x7]  ;;  %8777 = vmatprep.subr.bf16.mxu1 %v10337_v8  ;;  %v9085_v62 = vld [vmem:[%s11509_s5 + $0x28] sm:$0xff]  }
  0xe7   :  { %v201_v4 = vadd.s32 1, %v10476_v2  ;;  %v9084_v61 = vld [vmem:[%s11509_s5 + $0x30] sm:$0xff]   ;;  %v9086_v63 = vld [vmem:[%s11509_s5 + $0x20] sm:$0xff]  }
  0xe8   :  { %vm200_vm7 = vc.u32 %v10473_v0, %v10475_v1  ;;  %v199_v20 = vadd.s32 %v10475_v1, %v10473_v0  ;;  %v423_v0 = vld [vmem:[#allocation8 + $0x40] sm:$0x7]  ;;  %v9087_v1 = vld [vmem:[%s11509_s5 + $0xb8] sm:$0xff]   ;;  %v9089_v3 = vld [vmem:[%s11509_s5 + $0xb0] sm:$0xff]  }
  0xe9   :  { %v202_v7 = vsel %vm200_vm7, %v201_v4, %v10476_v2  ;;  %8778 = vmatpush3.bf16.msra.mxu1 %v9084_v61  ;;  %v9088_v2 = vld [vmem:[%s11509_s5 + $0x78] sm:$0xff]   ;;  %v9090_v4 = vld [vmem:[%s11509_s5 + $0x70] sm:$0xff]  }
  0xea   :  { %v203_v9 = vadd.s32 %v202_v7, %v198_v5  ;;  %8779 = vmatprep.subr.bf16.mxu1 %v10337_v8  ;;  %v9091_v5 = vld [vmem:[%s11509_s5 + $0xa8] sm:$0xff]  }
  0xeb   :  { %v9092_v7 = vld [vmem:[%s11509_s5 + $0x68] sm:$0xff]  }
  0xec   :  { %v204_v10 = vadd.s32 536870912, %v203_v9 }
  0xed   :  { %8780 = vmatpush3.bf16.msra.mxu1 %v9085_v62 }
  0xee   :  { %v205_v11 = vshrl.u32 %v204_v10, 30  ;;  %8781 = vmatprep.subr.bf16.mxu1 %v10337_v8  ;;  %v9094_v10 = vld [vmem:[%s11509_s5 + $0x60] sm:$0xff]  }
  0xf0   :  { %v206_v12 = vshll.u32 %v205_v11, 30  ;;  %v229_v38 = vsub.s32 4, %v205_v11 }
  0xf1   :  { %8782 = vmatpush3.bf16.msra.mxu1 %v9086_v63 }
  0xf2   :  { %v207_v13 = vsub.s32 %v203_v9, %v206_v12  ;;  %v230_v43 = vsel %vm145_vm9, %v229_v38, %v205_v11  ;;  %7778 = vmatprep.subr.msk.mxu1 %vm429_vm1, %v423_v0  ;;  %v9093_v9 = vld [vmem:[%s11509_s5 + $0xa0] sm:$0xff]   ;;  %v9095_v11 = vld [vmem:[%s11509_s5 + $0x98] sm:$0xff]  }
  0xf3   :  { %v232_v44 = vsel %vm144_vm10, 0, %v230_v43  ;;  %v9096_v12 = vld [vmem:[%s11509_s5 + $0x58] sm:$0xff]  }
  0xf4   :  { %v209_v14 = vsub.s32 0, %v207_v13  ;;  %v236_v45 = vadd.s32 3, %v232_v44 }
  0xf6   :  { %v7760_v15 = vmin.u32 %v209_v14, %v207_v13  ;;  %v237_v46 = vand.u32 3, %v236_v45  ;;  %v7763_v14 = vld [vmem:[#allocation10] ss:$0 sm:$0xff] }
  0xf8   :  { %v211_v16 = vclz %v7760_v15  ;;  %vm242_vm11 = vcmp.eq.s32.totalorder %v237_v46, 2  ;;  %vm239_vm12 = vcmp.eq.s32.totalorder %v237_v46, 0  ;;  %vm238_vm13 = vcmp.lt.s32.totalorder %v237_v46, 2  ;;  %v9098_v15 = vld [vmem:[%s11509_s5 + $0x50] sm:$0xff]  }
  0xfa   :  { %v7761_v18 = vadd.s32 4294967294, %v211_v16 }
  0xfc   :  { %vm7762_vm8 = vcmp.lt.s32.totalorder %v7761_v18, 0 }
  0xfd   :  { %v214_v19 = vsel %vm7762_vm8, 0, %v7761_v18  ;;  %v9099_v18 = vld [vmem:[%s11509_s5 + $0x88] sm:$0xff]  }
  0xfe   :  { %v215_v21 = vsub.s32 32, %v214_v19  ;;  %v219_v23 = vsub.s32 4294967266, %v214_v19  ;;  %v216_v24 = vshll.u32 %v207_v13, %v214_v19  ;;  %v9097_v13 = vld [vmem:[%s11509_s5 + $0x90] sm:$0xff]  }
 0x100   :  { %v217_v25 = vshrl.u32 %v199_v20, %v215_v21  ;;  %v220_v26 = vadd.s32 127, %v219_v23  ;;  %v9100_v23 = vld [vmem:[%s11509_s5 + $0x48] sm:$0xff]  }
 0x102   :  { %v218_v27 = vor.u32 %v217_v25, %v216_v24  ;;  %v221_v29 = vshll.u32 %v220_v26, 23  ;;  %v9101_v25 = vld [vmem:[%s11509_s5 + $0x80] sm:$0xff]  }
 0x104   :  { %v222_v31 = vor.u32 4788187, %v221_v29  ;;  %v225_v34 = vcvt.s32.f32 %v218_v27  ;;  %v9102_v27 = vld [vmem:[%s11509_s5 + $0x40] sm:$0xff]  }
 0x106   :  { %v223_v32 = vand.u32 2147483647, %v222_v31 }
 0x108   :  { %v226_v35 = vmul.f32 %v225_v34, %v223_v32 }
 0x10a   :  { %v227_v37 = vxor.u32 2147483648, %v226_v35 }
 0x10c   :  { %v228_v40 = vsel %vm145_vm9, %v227_v37, %v226_v35 }
 0x10d   :  { %v231_v41 = vsel %vm144_vm10, %v10455_v17, %v228_v40  ;;  %v10494_v17 = vld [vmem:[%s11504_s0] sm:$0x3] }
 0x10e   :  { %9133 = vcosq.f32 %v231_v41 }
 0x10f   :  { %9135 = vsinq.f32 %v231_v41 }
 0x11b   :  { %v9134_v47 = vpop.eup %9133 }
 0x11c   :  { %v9136_v48 = vpop.eup %9135  ;;  %v243_v49 = vxor.u32 2147483648, %v9134_v47 }
 0x11d   :  { %v240_v50 = vxor.u32 2147483648, %v9136_v48 }
 0x11e   :  { %v244_v51 = vsel %vm242_vm11, %v243_v49, %v9136_v48 }
 0x11f   :  { %v241_v52 = vsel %vm239_vm12, %v9134_v47, %v240_v50 }
 0x120   :  { %v245_v22 = vsel %vm238_vm13, %v241_v52, %v244_v51 }
 0x121   :  { %v246_v53 = vsel %vm235_vm14, nan, %v245_v22 }
 0x122   :  { %v247_v54 = vpack.c.bf16 %v246_v53, %v246_v53 }
 0x124   :  { %8772 = vmatmul.mubr.msk.bf16.vlgmr.msra.gmra.mxu0 %vm285_vm15, %v247_v54 }
 0x125   :  { %7776 = vmatpush1.msk.msra.mxu0 %vm429_vm1, %v420_v55  ;;  %509 = vmatprep.mubr.f32.mxu0 %v10337_v8 }
 0x126   :  { %475 = vmatprep.subr.mxu0 %v416_v56 }
 0x127   :  { %476 = vmatpush1.msra.mxu0 %v415_v57 }
 0x128   :  { %8787 = vmatprep.subr.mxu0 %v10337_v8 }
 0x12c   :  { %7777 = vmatmul.mubr.msk.f32.vlgmr.msra.gmra.mxu0 %vm425_vm2, %v10494_v17 }
 0x12d   :  { %8788 = vmatpush3.msk.msra.mxu0 %vm429_vm1, %v424_v58  ;;  %8791 = vmatprep.mubr.msk.f32.mxu0 %vm10338_vm0, %v10337_v8 }
 0x12e   :  { %8789 = vmatprep.subr.mxu0 %v10337_v8 }
 0x12f   :  { %8790 = vmatpush3.msra.mxu0 %v419_v59 }
 0x130   :  { %8792 = vmatmul.mubr.msk.f32.vlgmr.msra.gmra.mxu0 %vm425_vm2, %v10494_v17  ;;  %8621 = vmatprep.subr.bf16.mxu0 %v9087_v1 }
 0x131   :  { %8622 = vmatpush3.bf16.msra.mxu0 %v9088_v2 }
 0x132   :  { %8623 = vmatprep.subr.bf16.mxu0 %v9089_v3 }
 0x135   :  { %8624 = vmatpush3.bf16.msra.mxu0 %v9090_v4 }
 0x136   :  { %8625 = vmatprep.subr.bf16.mxu0 %v9091_v5 }
 0x139   :  { %8626 = vmatpush3.bf16.msra.mxu0 %v9092_v7  ;;  %v422_v7 = vld [vmem:[#allocation8 + $0x38] sm:$0x7] }
 0x13a   :  { %8627 = vmatprep.subr.bf16.mxu0 %v9093_v9 }
 0x13d   :  { %8628 = vmatpush3.bf16.msra.mxu0 %v9094_v10 }
 0x13e   :  { %8629 = vmatprep.subr.bf16.mxu0 %v9095_v11 }
 0x141   :  { %8630 = vmatpush3.bf16.msra.mxu0 %v9096_v12  ;;  %v418_v12 = vld [vmem:[#allocation8 + $0x18] sm:$0xff] }
 0x142   :  { %8631 = vmatprep.subr.bf16.mxu0 %v9097_v13 }
 0x145   :  { %8632 = vmatpush3.bf16.msra.mxu0 %v9098_v15 }
 0x146   :  { %8633 = vmatprep.subr.bf16.mxu0 %v9099_v18 }
 0x149   :  { %8634 = vmatpush3.bf16.msra.mxu0 %v9100_v23 }
 0x14a   :  { %8635 = vmatprep.subr.bf16.mxu0 %v9101_v25 }
 0x14d   :  { %8636 = vmatpush3.bf16.msra.mxu0 %v9102_v27 }
 0x14e   :  { %8806 = vmatprep.subr.bf16.mxu0 %v10337_v8 }
 0x1e4   :  { %v323_v16 = vpop.f32.mrf.mxu0 }
 0x1e5   :  { %v324_v19 = vadd.f32 %v7763_v14, %v323_v16  ;;  %v417_v16 = vld [vmem:[#allocation8 + $0x10] sm:$0xff] }
 0x1e6   :  { %v8773_v20 = vpop.f32.mrf.mxu0 }
 0x1e7   :  { %v329_v21 = vmul.f32 0.5, %v324_v19 }
 0x1e8   :  { %v326_v24 = vpop.f32.mrf.mxu0 }
 0x1e9   :  { %9137 = vtanh.f32 %v329_v21 }
 0x1ea   :  { %v8774_v26 = vpop.f32.mrf.mxu0 }
 0x1ec   :  { %v10568_v29 = vpop.f32.mrf.mxu0 }
 0x1ed   :  { %v657_v31 = vand.u32 2147483647, %v10568_v29  ;;  %v660_v32 = vand.u32 2139095040, %v10568_v29 }
 0x1ee   :  { %v10572_v34 = vpop.f32.mrf.mxu0 }
 0x1ef   :  { %v661_v35 = vshrl.u32 %v660_v32, 23  ;;  %v664_v37 = vand.u32 8388607, %v657_v31  ;;  %v761_v38 = vand.u32 2147483647, %v10572_v34  ;;  %v764_v40 = vand.u32 2139095040, %v10572_v34 }
 0x1f0   :  { %v10578_v41 = vpop.f32.mrf.mxu0 }
 0x1f1   :  { %v7783_v43 = vadd.s32 4294967169, %v661_v35  ;;  %v765_v44 = vshrl.u32 %v764_v40, 23  ;;  %v768_v45 = vand.u32 8388607, %v761_v38  ;;  %v1076_v46 = vand.u32 2139095040, %v10578_v41 }
 0x1f2   :  { %v8793_v47 = vpop.f32.mrf.mxu0  ;;  %v665_v49 = vor.u32 8388608, %v664_v37  ;;  %v1073_v57 = vand.u32 2147483647, %v10578_v41 }
 0x1f3   :  { %v667_v48 = vadd.s32 1, %v7783_v43  ;;  %v7787_v50 = vadd.s32 4294967169, %v765_v44  ;;  %v769_v51 = vor.u32 8388608, %v768_v45  ;;  %v1077_v52 = vshrl.u32 %v1076_v46, 23 }
 0x1f4   :  { %v10585_v59 = vshll.u32 %v665_v49, 8 }
 0x1f5   :  { %vm668_vm3 = vcmp.gt.s32.totalorder %v667_v48, 0  ;;  %v771_v54 = vadd.s32 1, %v7787_v50  ;;  %v10587_v60 = vshll.u32 %v769_v51, 8  ;;  %v10589_v61 = vadd.s32 4294967169, %v1077_v52  ;;  %v9105_v51 = vld [vmem:[%s11509_s5 + $0x198] sm:$0xff]  }
 0x1f6   :  { %v9138_v22 = vpop.eup %9137  ;;  %v669_v53 = vsel %vm668_vm3, %v667_v48, 0 }
 0x1f7   :  { %v331_v55 = vadd.f32 1.0, %v9138_v22  ;;  %v671_v56 = vand.u32 31, %v669_v53  ;;  %v670_v58 = vshrl.u32 %v669_v53, 5  ;;  %vm772_vm4 = vcmp.gt.s32.totalorder %v771_v54, 0 }
 0x1f8   :  { %v773_v24 = vsel %vm772_vm4, %v771_v54, 0 }
 0x1f9   :  { %v332_v62 = vmul.f32 %v331_v55, %v329_v21  ;;  %v672_v63 = vsub.s32 32, %v671_v56  ;;  %v674_v0 = vshll.u32 %v10339_v28, %v671_v56  ;;  %v677_v1 = vshll.u32 %v10340_v30, %v671_v56 }
 0x1fa   :  { %v680_v2 = vshll.u32 %v10341_v33, %v671_v56  ;;  %v683_v3 = vshll.u32 %v10342_v36, %v671_v56  ;;  %v686_v4 = vshll.u32 %v10343_v39, %v671_v56  ;;  %vm689_vm5 = vcmp.lt.s32.totalorder %v670_v58, 1 }
 0x1fb   :  { %v333_v5 = vpack.c.bf16 %v332_v62, %v332_v62  ;;  %v673_v9 = vshrl.u32 %v10339_v28, %v672_v63  ;;  %v675_v10 = vshrl.u32 %v10340_v30, %v672_v63  ;;  %v678_v11 = vshrl.u32 %v10341_v33, %v672_v63 }
 0x1fc   :  { %v681_v13 = vshrl.u32 %v10342_v36, %v672_v63  ;;  %v684_v14 = vshrl.u32 %v10343_v39, %v672_v63  ;;  %v687_v15 = vshrl.u32 %v10344_v42, %v672_v63  ;;  %vm691_vm6 = vcmp.lt.s32.totalorder %v670_v58, 3 }
 0x1fd   :  { %8784 = vmatmul.mubr.msk.bf16.vlgmr.msra.gmra.mxu1 %vm285_vm15, %v333_v5  ;;  %v676_v18 = vor.u32 %v675_v10, %v674_v0  ;;  %v679_v19 = vor.u32 %v678_v11, %v677_v1  ;;  %vm692_vm7 = vcmp.lt.s32.totalorder %v670_v58, 4  ;;  %vm690_vm8 = vcmp.lt.s32.totalorder %v670_v58, 2 }
 0x1fe   :  { %7779 = vmatpush1.msk.msra.mxu1 %vm429_vm1, %v422_v7  ;;  %580 = vmatprep.mubr.f32.mxu1 %v10337_v8  ;;  %v682_v20 = vor.u32 %v681_v13, %v680_v2  ;;  %v685_v21 = vor.u32 %v684_v14, %v683_v3  ;;  %v688_v23 = vor.u32 %v687_v15, %v686_v4  ;;  %v775_v27 = vand.u32 31, %v773_v24 }
 0x1ff   :  { %546 = vmatprep.subr.mxu1 %v418_v12  ;;  %v693_v25 = vsel %vm689_vm5, %v673_v9, %v676_v18  ;;  %v697_v26 = vsel %vm689_vm5, %v676_v18, %v679_v19  ;;  %v774_v56 = vshrl.u32 %v773_v24, 5  ;;  %v1083_v15 = vadd.s32 1, %v10589_v61 }
 0x200   :  { %547 = vmatpush1.msra.mxu1 %v417_v16  ;;  %v694_v32 = vsel %vm692_vm7, %v682_v20, 2102212464  ;;  %v698_v35 = vsel %vm692_vm7, %v685_v21, 920167782  ;;  %v701_v37 = vsel %vm689_vm5, %v679_v19, %v682_v20  ;;  %v702_v40 = vsel %vm692_vm7, %v688_v23, 1326507024 }
 0x201   :  { %v695_v43 = vsel %vm691_vm6, %v679_v19, %v694_v32  ;;  %v699_v44 = vsel %vm691_vm6, %v682_v20, %v698_v35  ;;  %v703_v45 = vsel %vm691_vm6, %v685_v21, %v702_v40  ;;  %v776_v46 = vsub.s32 32, %v775_v27  ;;  %8794 = vmatprep.subr.bf16.mxu1 %v10337_v8  ;;  %v9109_v20 = vld [vmem:[%s11509_s5 + $0x188] sm:$0xff]  }
 0x202   :  { %v696_v47 = vsel %vm690_vm8, %v693_v25, %v695_v43  ;;  %v700_v48 = vsel %vm690_vm8, %v697_v26, %v699_v44  ;;  %v704_v49 = vsel %vm690_vm8, %v701_v37, %v703_v45  ;;  %v778_v50 = vshll.u32 %v10339_v28, %v775_v27 }
 0x203   :  { %v10624_v52 = vmul.u32.u64.low %v10585_v59, %v704_v49  ;;  %v10625_v22 = vmul.u32.u64.high %v10585_v59, %v704_v49, %v10624_v52  ;;  %v10628_v53 = vmul.u32.u64.low %v10585_v59, %v700_v48  ;;  %v10629_v54 = vmul.u32.u64.high %v10585_v59, %v700_v48, %v10628_v53 }
 0x204   :  { %v712_v55 = vmul.u32 %v10585_v59, %v696_v47  ;;  %v779_v58 = vshrl.u32 %v10340_v30, %v776_v46  ;;  %v781_v62 = vshll.u32 %v10340_v30, %v775_v27  ;;  %v782_v63 = vshrl.u32 %v10341_v33, %v776_v46 }
 0x205   :  { %7780 = vmatmul.mubr.msk.f32.vlgmr.msra.gmra.mxu1 %vm425_vm2, %v10494_v17  ;;  %v784_v0 = vshll.u32 %v10341_v33, %v775_v27  ;;  %v785_v1 = vshrl.u32 %v10342_v36, %v776_v46  ;;  %v787_v2 = vshll.u32 %v10342_v36, %v775_v27  ;;  %v788_v4 = vshrl.u32 %v10343_v39, %v776_v46  ;;  %v9107_v17 = vld [vmem:[%s11509_s5 + $0x190] sm:$0xff]  }
 0x206   :  { %v780_v3 = vor.u32 %v779_v58, %v778_v50  ;;  %v790_v59 = vshll.u32 %v10343_v39, %v775_v27  ;;  %v791_v5 = vshrl.u32 %v10344_v42, %v776_v46  ;;  %8795 = vmatpush3.bf16.msra.mxu1 %v9105_v51  ;;  %vm714_vm1 = vc.u32 %v10625_v22, %v10628_v53 }
 0x207   :  { %v715_v7 = vadd.s32 1, %v10629_v54  ;;  %v777_v9 = vshrl.u32 %v10339_v28, %v776_v46  ;;  %v783_v10 = vor.u32 %v782_v63, %v781_v62  ;;  %8796 = vmatprep.subr.bf16.mxu1 %v10337_v8  ;;  %8802 = vmatprep.mubr.msk.bf16.mxu1 %vm10338_vm0, %v10337_v8  ;;  %v786_v11 = vor.u32 %v785_v1, %v784_v0 }
 0x208   :  { %v789_v12 = vor.u32 %v788_v4, %v787_v2  ;;  %v792_v13 = vor.u32 %v791_v5, %v790_v59  ;;  %vm793_vm9 = vcmp.lt.s32.totalorder %v774_v56, 1  ;;  %vm795_vm10 = vcmp.lt.s32.totalorder %v774_v56, 3 }
 0x209   :  { %v716_v14 = vsel %vm714_vm1, %v715_v7, %v10629_v54  ;;  %vm796_vm11 = vcmp.lt.s32.totalorder %v774_v56, 4  ;;  %vm794_vm12 = vcmp.lt.s32.totalorder %v774_v56, 2  ;;  %v801_v19 = vsel %vm793_vm9, %v780_v3, %v783_v10 }
 0x20a   :  { %v717_v16 = vadd.s32 %v716_v14, %v712_v55  ;;  %v798_v18 = vsel %vm796_vm11, %v786_v11, 2102212464  ;;  %8797 = vmatpush3.bf16.msra.mxu1 %v9107_v17  ;;  %v797_v21 = vsel %vm793_vm9, %v777_v9, %v780_v3  ;;  %v802_v23 = vsel %vm796_vm11, %v789_v12, 920167782 }
 0x20b   :  { %v805_v24 = vsel %vm793_vm9, %v783_v10, %v786_v11  ;;  %v806_v25 = vsel %vm796_vm11, %v792_v13, 1326507024  ;;  %8798 = vmatprep.subr.bf16.mxu1 %v10337_v8  ;;  %v799_v27 = vsel %vm795_vm10, %v783_v10, %v798_v18  ;;  %v803_v61 = vsel %vm795_vm10, %v786_v11, %v802_v23 }
 0x20c   :  { %v718_v26 = vadd.s32 536870912, %v717_v16  ;;  %v807_v32 = vsel %vm795_vm10, %v789_v12, %v806_v25  ;;  %v804_v35 = vsel %vm794_vm12, %v801_v19, %v803_v61  ;;  %v1080_v40 = vand.u32 8388607, %v1073_v57 }
 0x20d   :  { %v808_v37 = vsel %vm794_vm12, %v805_v24, %v807_v32  ;;  %vm1084_vm13 = vcmp.gt.s32.totalorder %v1083_v15, 0  ;;  %v800_v47 = vsel %vm794_vm12, %v797_v21, %v799_v27  ;;  %v713_v21 = vadd.s32 %v10628_v53, %v10625_v22 }
 0x20e   :  { %v10667_v43 = vshrl.u32 %v718_v26, 30  ;;  %v10670_v44 = vmul.u32.u64.low %v10587_v60, %v808_v37  ;;  %v10671_v45 = vmul.u32.u64.high %v10587_v60, %v808_v37, %v10670_v44  ;;  %v1085_v46 = vsel %vm1084_vm13, %v1083_v15, 0  ;;  %8799 = vmatpush3.bf16.msra.mxu1 %v9109_v20 }
 0x20f   :  { %v10675_v48 = vmul.u32.u64.low %v10587_v60, %v804_v35  ;;  %v10676_v49 = vmul.u32.u64.high %v10587_v60, %v804_v35, %v10675_v48  ;;  %v1087_v50 = vand.u32 31, %v1085_v46  ;;  %8800 = vmatprep.subr.bf16.mxu1 %v10337_v8  ;;  %v816_v55 = vmul.u32 %v10587_v60, %v800_v47 }
 0x210   :  { %v720_v51 = vshll.u32 %v10667_v43, 30  ;;  %v1081_v58 = vor.u32 8388608, %v1080_v40  ;;  %v10685_v62 = vshrl.u32 %v1085_v46, 5  ;;  %vm10743_vm1 = vcmp.le.f32.partialorder %v657_v31, 0.7853982 }
 0x211   :  { %v1088_v52 = vsub.s32 32, %v1087_v50  ;;  %vm818_vm14 = vc.u32 %v10671_v45, %v10675_v48  ;;  %v819_v56 = vadd.s32 1, %v10676_v49  ;;  %v1090_v63 = vshll.u32 %v10339_v28, %v1087_v50 }
 0x212   :  { %v721_v54 = vsub.s32 %v717_v16, %v720_v51  ;;  %v1093_v0 = vshll.u32 %v10340_v30, %v1087_v50  ;;  %v1096_v3 = vshll.u32 %v10341_v33, %v1087_v50  ;;  %v1099_v5 = vshll.u32 %v10342_v36, %v1087_v50 }
 0x213   :  { %v1094_v2 = vshrl.u32 %v10341_v33, %v1088_v52  ;;  %v1097_v4 = vshrl.u32 %v10342_v36, %v1088_v52  ;;  %v820_v60 = vsel %vm818_vm14, %v819_v56, %v10676_v49  ;;  %v1091_v59 = vshrl.u32 %v10340_v30, %v1088_v52 }
 0x214   :  { %v723_v1 = vsub.s32 0, %v721_v54  ;;  %v1100_v17 = vshrl.u32 %v10343_v39, %v1088_v52  ;;  %v821_v9 = vadd.s32 %v820_v60, %v816_v55  ;;  %v1102_v11 = vshll.u32 %v10343_v39, %v1087_v50 }
 0x215   :  { %v1103_v12 = vshrl.u32 %v10344_v42, %v1088_v52  ;;  %v10698_v13 = vshll.u32 %v1081_v58, 8  ;;  %v1095_v16 = vor.u32 %v1094_v2, %v1093_v0  ;;  %v1098_v18 = vor.u32 %v1097_v4, %v1096_v3 }
 0x216   :  { %v7784_v7 = vmin.u32 %v723_v1, %v721_v54  ;;  %v1101_v10 = vor.u32 %v1100_v17, %v1099_v5  ;;  %v822_v15 = vadd.s32 536870912, %v821_v9  ;;  %v1092_v19 = vor.u32 %v1091_v59, %v1090_v63 }
 0x217   :  { %v1104_v20 = vor.u32 %v1103_v12, %v1102_v11  ;;  %vm1105_vm2 = vcmp.lt.s32.totalorder %v10685_v62, 1  ;;  %vm1108_vm3 = vcmp.lt.s32.totalorder %v10685_v62, 4  ;;  %vm1107_vm4 = vcmp.lt.s32.totalorder %v10685_v62, 3 }
 0x218   :  { %v725_v14 = vclz %v7784_v7  ;;  %v10704_v24 = vshrl.u32 %v822_v15, 30  ;;  %v1089_v25 = vshrl.u32 %v10339_v28, %v1088_v52  ;;  %vm1106_vm5 = vcmp.lt.s32.totalorder %v10685_v62, 2 }
 0x219   :  { %v1114_v26 = vsel %vm1108_vm3, %v1101_v10, 920167782  ;;  %v1118_v27 = vsel %vm1108_vm3, %v1104_v20, 1326507024  ;;  %v1110_v32 = vsel %vm1108_vm3, %v1098_v18, 2102212464  ;;  %v1117_v35 = vsel %vm1105_vm2, %v1095_v16, %v1098_v18 }
 0x21a   :  { %v7785_v23 = vadd.s32 4294967294, %v725_v14  ;;  %v824_v61 = vshll.u32 %v10704_v24, 30  ;;  %v1113_v22 = vsel %vm1105_vm2, %v1092_v19, %v1095_v16  ;;  %v1115_v53 = vsel %vm1107_vm4, %v1098_v18, %v1114_v26 }
 0x21b   :  { %v1119_v40 = vsel %vm1107_vm4, %v1101_v10, %v1118_v27  ;;  %v1116_v58 = vsel %vm1106_vm5, %v1113_v22, %v1115_v53  ;;  %v1109_v56 = vsel %vm1105_vm2, %v1089_v25, %v1092_v19  ;;  %v1111_v63 = vsel %vm1107_vm4, %v1095_v16, %v1110_v32 }
 0x21c   :  { %vm7786_vm6 = vcmp.lt.s32.totalorder %v7785_v23, 0  ;;  %v825_v49 = vsub.s32 %v821_v9, %v824_v61  ;;  %v1120_v50 = vsel %vm1106_vm5, %v1117_v35, %v1119_v40  ;;  %v1112_v7 = vsel %vm1106_vm5, %v1109_v56, %v1111_v63 }
 0x21d   :  { %v728_v37 = vsel %vm7786_vm6, 0, %v7785_v23  ;;  %v10731_v4 = vmul.u32.u64.low %v10698_v13, %v1116_v58  ;;  %v10732_v60 = vmul.u32.u64.high %v10698_v13, %v1116_v58, %v10731_v4  ;;  %v1128_v11 = vmul.u32 %v10698_v13, %v1112_v7 }
 0x21e   :  { %v729_v44 = vsub.s32 32, %v728_v37  ;;  %v730_v46 = vshll.u32 %v721_v54, %v728_v37  ;;  %v733_v47 = vsub.s32 4294967266, %v728_v37  ;;  %v827_v55 = vsub.s32 0, %v825_v49 }
 0x21f   :  { %v10727_v0 = vmul.u32.u64.low %v10698_v13, %v1120_v50  ;;  %v10728_v54 = vmul.u32.u64.high %v10698_v13, %v1120_v50, %v10727_v0  ;;  %v1131_v12 = vadd.s32 1, %v10732_v60  ;;  %v817_v15 = vadd.s32 %v10675_v48, %v10671_v45 }
 0x220   :  { %v731_v51 = vshrl.u32 %v713_v21, %v729_v44  ;;  %v734_v52 = vadd.s32 127, %v733_v47  ;;  %v7788_v3 = vmin.u32 %v827_v55, %v825_v49  ;;  %vm659_vm9 = vcmp.lt.s32.totalorder %v10568_v29, 0 }
 0x221   :  { %vm1130_vm7 = vc.u32 %v10728_v54, %v10731_v4  ;;  %v743_v32 = vsub.s32 4, %v10667_v43  ;;  %vm763_vm10 = vcmp.lt.s32.totalorder %v10572_v34, 0  ;;  %vm10767_vm11 = vcmp.le.f32.partialorder %v761_v38, 0.7853982 }
 0x222   :  { %v732_v1 = vor.u32 %v731_v51, %v730_v46  ;;  %v735_v2 = vshll.u32 %v734_v52, 23  ;;  %v829_v17 = vclz %v7788_v3  ;;  %v1132_v18 = vsel %vm1130_vm7, %v1131_v12, %v10732_v60  ;;  %v9106_v52 = vld [vmem:[%s11509_s5 + $0x168] sm:$0xff]  }
 0x223   :  { %v1133_v23 = vadd.s32 %v1132_v18, %v1128_v11  ;;  %v744_v44 = vsel %vm659_vm9, %v743_v32, %v10667_v43  ;;  %vm749_vm3 = vweird.f32 %v10568_v29  ;;  %vm1075_vm7 = vcmp.lt.s32.totalorder %v10578_v41, 0 }
 0x224   :  { %v736_v59 = vor.u32 4788187, %v735_v2  ;;  %v739_v5 = vcvt.s32.f32 %v732_v1  ;;  %v7789_v10 = vadd.s32 4294967294, %v829_v17  ;;  %v746_v51 = vsel %vm10743_vm1, 0, %v744_v44 }
 0x225   :  { %v1134_v26 = vadd.s32 536870912, %v1133_v23  ;;  %v750_v43 = vadd.s32 3, %v746_v51 }
 0x226   :  { %v737_v9 = vand.u32 2147483647, %v736_v59  ;;  %vm7790_vm8 = vcmp.lt.s32.totalorder %v7789_v10, 0 }
 0x227   :  { %v832_v62 = vsel %vm7790_vm8, 0, %v7789_v10  ;;  %v10755_v35 = vshrl.u32 %v1134_v26, 30  ;;  %v751_v59 = vand.u32 3, %v750_v43  ;;  %vm853_vm8 = vweird.f32 %v10572_v34 }
 0x228   :  { %v740_v14 = vmul.f32 %v739_v5, %v737_v9  ;;  %v833_v13 = vsub.s32 32, %v832_v62  ;;  %v834_v20 = vshll.u32 %v825_v49, %v832_v62  ;;  %v837_v21 = vsub.s32 4294967266, %v832_v62 }
 0x229   :  { %v1136_v53 = vshll.u32 %v10755_v35, 30  ;;  %v847_v49 = vsub.s32 4, %v10704_v24  ;;  %v1129_v5 = vadd.s32 %v10731_v4, %v10728_v54  ;;  %vm753_vm13 = vcmp.eq.s32.totalorder %v751_v59, 0 }
 0x22a   :  { %v741_v19 = vxor.u32 2147483648, %v740_v14  ;;  %v835_v48 = vshrl.u32 %v817_v15, %v833_v13  ;;  %v838_v25 = vadd.s32 127, %v837_v21  ;;  %vm756_vm14 = vcmp.eq.s32.totalorder %v751_v59, 2 }
 0x22b   :  { %v1137_v46 = vsub.s32 %v1133_v23, %v1136_v53  ;;  %v848_v63 = vsel %vm763_vm10, %v847_v49, %v10704_v24  ;;  %v9111_v24 = vld [vmem:[%s11509_s5 + $0x180] sm:$0xff]   ;;  %vm752_vm2 = vcmp.lt.s32.totalorder %v751_v59, 2  ;;  %v9104_v49 = vld [vmem:[%s11509_s5 + $0x170] sm:$0xff]  }
 0x22c   :  { %v742_v45 = vsel %vm659_vm9, %v741_v19, %v740_v14  ;;  %v836_v27 = vor.u32 %v835_v48, %v834_v20  ;;  %v839_v61 = vshll.u32 %v838_v25, 23  ;;  %v850_v38 = vsel %vm10767_vm11, 0, %v848_v63  ;;  %8801 = vmatpush3.bf16.msra.mxu1 %v9111_v24  ;;  %v9110_v63 = vld [vmem:[%s11509_s5 + $0x158] sm:$0xff]  }
 0x22d   :  { %v745_v31 = vsel %vm10743_vm1, %v10568_v29, %v742_v45  ;;  %v1139_v50 = vsub.s32 0, %v1137_v46  ;;  %v854_v7 = vadd.s32 3, %v850_v38  ;;  %vm10786_vm1 = vcmp.le.f32.partialorder %v1073_v57, 0.7853982  ;;  %v9103_v57 = vld [vmem:[%s11509_s5 + $0x178] sm:$0xff]  }
 0x22e   :  { %9139 = vcosq.f32 %v745_v31  ;;  %v840_v37 = vor.u32 4788187, %v839_v61  ;;  %v843_v22 = vcvt.s32.f32 %v836_v27 }
 0x22f   :  { %9141 = vsinq.f32 %v745_v31  ;;  %v7800_v58 = vmin.u32 %v1139_v50, %v1137_v46  ;;  %v855_v54 = vand.u32 3, %v854_v7  ;;  %v9115_v7 = vld [vmem:[%s11509_s5 + $0x138] sm:$0xff]  }
 0x230   :  { %v841_v40 = vand.u32 2147483647, %v840_v37  ;;  %8643 = vmatprep.subr.bf16.mxu1 %v9115_v7 }
 0x231   :  { %v1141_v1 = vclz %v7800_v58  ;;  %vm860_vm4 = vcmp.eq.s32.totalorder %v855_v54, 2  ;;  %vm857_vm5 = vcmp.eq.s32.totalorder %v855_v54, 0  ;;  %vm856_vm6 = vcmp.lt.s32.totalorder %v855_v54, 2  ;;  %v9108_v58 = vld [vmem:[%s11509_s5 + $0x160] sm:$0xff]   ;;  %v9119_v54 = vld [vmem:[%s11509_s5 + $0x128] sm:$0xff]  }
 0x232   :  { %v844_v47 = vmul.f32 %v843_v22, %v841_v40 }
 0x233   :  { %v7801_v2 = vadd.s32 4294967294, %v1141_v1 }
 0x234   :  { %v845_v55 = vxor.u32 2147483648, %v844_v47 }
 0x235   :  { %vm7802_vm12 = vcmp.lt.s32.totalorder %v7801_v2, 0 }
 0x236   :  { %v846_v56 = vsel %vm763_vm10, %v845_v55, %v844_v47  ;;  %v1144_v17 = vsel %vm7802_vm12, 0, %v7801_v2  ;;  %v1159_v47 = vsub.s32 4, %v10755_v35  ;;  %v9112_v2 = vld [vmem:[%s11509_s5 + $0x150] sm:$0xff]   ;;  %vm1165_vm12 = vweird.f32 %v10578_v41 }
 0x237   :  { %v849_v0 = vsel %vm10767_vm11, %v10572_v34, %v846_v56  ;;  %v1145_v9 = vsub.s32 32, %v1144_v17  ;;  %v1146_v10 = vshll.u32 %v1137_v46, %v1144_v17  ;;  %v1149_v11 = vsub.s32 4294967266, %v1144_v17 }
 0x238   :  { %9143 = vcosq.f32 %v849_v0  ;;  %v1160_v50 = vsel %vm1075_vm7, %v1159_v47, %v10755_v35  ;;  %v9125_v47 = vld [vmem:[%s11509_s5 + $0x110] sm:$0xff]  }
 0x239   :  { %9145 = vsinq.f32 %v849_v0  ;;  %v1147_v15 = vshrl.u32 %v1129_v5, %v1145_v9  ;;  %v1150_v16 = vadd.s32 127, %v1149_v11  ;;  %v1162_v51 = vsel %vm10786_vm1, 0, %v1160_v50  ;;  %v9114_v5 = vld [vmem:[%s11509_s5 + $0x140] sm:$0xff]  }
 0x23a   :  { %v1166_v55 = vadd.s32 3, %v1162_v51 }
 0x23b   :  { %v9140_v3 = vpop.eup %9139  ;;  %v1148_v62 = vor.u32 %v1147_v15, %v1146_v10  ;;  %v1151_v18 = vshll.u32 %v1150_v16, 23  ;;  %v9117_v15 = vld [vmem:[%s11509_s5 + $0x130] sm:$0xff]  }
 0x23c   :  { %v9142_v60 = vpop.eup %9141  ;;  %v757_v14 = vxor.u32 2147483648, %v9140_v3  ;;  %v1167_v43 = vand.u32 3, %v1166_v55 }
 0x23d   :  { %v754_v12 = vxor.u32 2147483648, %v9142_v60  ;;  %v1152_v13 = vor.u32 4788187, %v1151_v18  ;;  %v1155_v20 = vcvt.s32.f32 %v1148_v62  ;;  %v9118_v18 = vld [vmem:[%s11509_s5 + $0xf0] sm:$0xff]  }
 0x23e   :  { %v758_v19 = vsel %vm756_vm14, %v757_v14, %v9142_v60  ;;  %vm1169_vm9 = vcmp.eq.s32.totalorder %v1167_v43, 0  ;;  %vm1172_vm10 = vcmp.eq.s32.totalorder %v1167_v43, 2  ;;  %vm1168_vm11 = vcmp.lt.s32.totalorder %v1167_v43, 2  ;;  %v9113_v60 = vld [vmem:[%s11509_s5 + $0x148] sm:$0xff]   ;;  %v9126_v43 = vld [vmem:[%s11509_s5 + $0xd0] sm:$0xff]  }
 0x23f   :  { %v755_v4 = vsel %vm753_vm13, %v9140_v3, %v754_v12  ;;  %v1153_v23 = vand.u32 2147483647, %v1152_v13  ;;  %v9116_v12 = vld [vmem:[%s11509_s5 + $0xf8] sm:$0xff]  }
 0x240   :  { %v759_v45 = vsel %vm752_vm2, %v755_v4, %v758_v19 }
 0x241   :  { %v1156_v31 = vmul.f32 %v1155_v20, %v1153_v23  ;;  %v760_v61 = vsel %vm749_vm3, nan, %v759_v45  ;;  %v9121_v45 = vld [vmem:[%s11509_s5 + $0x120] sm:$0xff]  }
 0x242   :  { %v1177_v44 = vpack.c.bf16 %v760_v61, %v760_v61  ;;  %v9122_v61 = vld [vmem:[%s11509_s5 + $0xe0] sm:$0xff]  }
 0x243   :  { %v1157_v29 = vxor.u32 2147483648, %v1156_v31 }
 0x245   :  { %v9144_v21 = vpop.eup %9143  ;;  %v1158_v53 = vsel %vm1075_vm7, %v1157_v29, %v1156_v31  ;;  %v9123_v29 = vld [vmem:[%s11509_s5 + $0x118] sm:$0xff]  }
 0x246   :  { %v9146_v48 = vpop.eup %9145  ;;  %v861_v25 = vxor.u32 2147483648, %v9144_v21  ;;  %v1161_v34 = vsel %vm10786_vm1, %v10578_v41, %v1158_v53  ;;  %v7769_v41 = vld [vmem:[#allocation10 + $0x1] ss:$0 sm:$0xff] }
 0x247   :  { %v858_v26 = vxor.u32 2147483648, %v9146_v48  ;;  %9147 = vcosq.f32 %v1161_v34 }
 0x248   :  { %v862_v27 = vsel %vm860_vm4, %v861_v25, %v9146_v48  ;;  %9149 = vsinq.f32 %v1161_v34  ;;  %v9124_v34 = vld [vmem:[%s11509_s5 + $0xd8] sm:$0xff]  }
 0x249   :  { %v859_v37 = vsel %vm857_vm5, %v9144_v21, %v858_v26  ;;  %v9120_v21 = vld [vmem:[%s11509_s5 + $0xe8] sm:$0xff]  }
 0x24a   :  { %v863_v22 = vsel %vm856_vm6, %v859_v37, %v862_v27 }
 0x24b   :  { %v864_v40 = vsel %vm853_vm8, nan, %v863_v22 }
 0x24c   :  { %v1178_v46 = vpack.c.bf16 %v864_v40, %v864_v40 }
 0x24e   :  { %1610 = vmatprep.mubr.bf16.mxu0 %v1178_v46 }
 0x24f   :  { %1611 = vmatmul.mubr.bf16.vlgmr.msra.gmra.mxu0 %v1177_v44 }
 0x250   :  { %8807 = vmatpush3.bf16.msra.mxu0 %v9103_v57  ;;  %8822 = vmatprep.mubr.msk.bf16.mxu0 %vm10338_vm0, %v10337_v8 }
 0x251   :  { %8808 = vmatprep.subr.bf16.mxu0 %v10337_v8 }
 0x254   :  { %8809 = vmatpush3.bf16.msra.mxu0 %v9104_v49  ;;  %v9148_v35 = vpop.eup %9147 }
 0x255   :  { %8810 = vmatprep.subr.bf16.mxu0 %v10337_v8  ;;  %v9150_v56 = vpop.eup %9149  ;;  %v1173_v1 = vxor.u32 2147483648, %v9148_v35 }
 0x256   :  { %v1170_v0 = vxor.u32 2147483648, %v9150_v56 }
 0x257   :  { %v1174_v38 = vsel %vm1172_vm10, %v1173_v1, %v9150_v56 }
 0x258   :  { %8811 = vmatpush3.bf16.msra.mxu0 %v9106_v52  ;;  %v1171_v3 = vsel %vm1169_vm9, %v9148_v35, %v1170_v0 }
 0x259   :  { %8812 = vmatprep.subr.bf16.mxu0 %v10337_v8  ;;  %v1175_v59 = vsel %vm1168_vm11, %v1171_v3, %v1174_v38 }
 0x25a   :  { %v1176_v17 = vsel %vm1165_vm12, nan, %v1175_v59 }
 0x25b   :  { %v1181_v24 = vpack.c.bf16 %v1176_v17, %v1176_v17 }
 0x25c   :  { %8813 = vmatpush3.bf16.msra.mxu0 %v9108_v58 }
 0x25d   :  { %8814 = vmatprep.subr.bf16.mxu0 %v10337_v8 }
 0x260   :  { %8815 = vmatpush3.bf16.msra.mxu0 %v9110_v63 }
 0x261   :  { %8816 = vmatprep.subr.bf16.mxu0 %v10337_v8 }
 0x264   :  { %8817 = vmatpush3.bf16.msra.mxu0 %v9112_v2  ;;  %v9127_v2 = vld [vmem:[%s11509_s5 + $0x108] sm:$0xff]  }
 0x265   :  { %8818 = vmatprep.subr.bf16.mxu0 %v10337_v8 }
 0x268   :  { %8819 = vmatpush3.bf16.msra.mxu0 %v9113_v60 }
 0x269   :  { %8820 = vmatprep.subr.bf16.mxu0 %v10337_v8 }
 0x26c   :  { %8821 = vmatpush3.bf16.msra.mxu0 %v9114_v5 }
 0x26f   :  { %8823 = vmatmul.mubr.bf16.vlgmr.msra.gmra.mxu0 %v1181_v24 }
 0x2bd   :  { %v408_v9 = vpop.f32.mrf.mxu1 }
 0x2be   :  { %v409_v10 = vadd.f32 %v7769_v41, %v408_v9 }
 0x2bf   :  { %v8785_v11 = vpop.f32.mrf.mxu1 }
 0x2c0   :  { %v1262_v14 = vpack.c.bf16 %v409_v10, %v409_v10  ;;  %v9128_v10 = vld [vmem:[%s11509_s5 + $0xc8] sm:$0xff]  }
 0x2c1   :  { %v411_v16 = vpop.f32.mrf.mxu1 }
 0x2c2   :  { %8803 = vmatmul.mubr.msk.bf16.vlgmr.msra.gmra.mxu1 %vm285_vm15, %v1262_v14  ;;  %v9129_v16 = vld [vmem:[%s11509_s5 + $0x100] sm:$0xff]  }
 0x2c3   :  { %v8786_v62 = vpop.f32.mrf.mxu1  ;;  %8644 = vmatpush3.bf16.msra.mxu1 %v9116_v12 }
 0x2c4   :  { %8645 = vmatprep.subr.bf16.mxu1 %v9117_v15 }
 0x2c5   :  { %v10851_v4 = vpop.f32.mrf.mxu1 }
 0x2c6   :  { %v865_v19 = vand.u32 2147483647, %v10851_v4  ;;  %v868_v13 = vand.u32 2139095040, %v10851_v4 }
 0x2c7   :  { %v10855_v20 = vpop.f32.mrf.mxu1  ;;  %8646 = vmatpush3.bf16.msra.mxu1 %v9118_v18 }
 0x2c8   :  { %v869_v23 = vshrl.u32 %v868_v13, 23  ;;  %8647 = vmatprep.subr.bf16.mxu1 %v9119_v54  ;;  %v872_v48 = vand.u32 8388607, %v865_v19  ;;  %v972_v25 = vand.u32 2139095040, %v10855_v20  ;;  %v969_v26 = vand.u32 2147483647, %v10855_v20 }
 0x2ca   :  { %v7791_v31 = vadd.s32 4294967169, %v869_v23  ;;  %v973_v27 = vshrl.u32 %v972_v25, 23  ;;  %v873_v37 = vor.u32 8388608, %v872_v48  ;;  %v976_v53 = vand.u32 8388607, %v969_v26 }
 0x2cb   :  { %8648 = vmatpush3.bf16.msra.mxu1 %v9120_v21 }
 0x2cc   :  { %v875_v32 = vadd.s32 1, %v7791_v31  ;;  %8649 = vmatprep.subr.bf16.mxu1 %v9121_v45  ;;  %v7795_v22 = vadd.s32 4294967169, %v973_v27  ;;  %v10881_v49 = vshll.u32 %v873_v37, 8  ;;  %v977_v52 = vor.u32 8388608, %v976_v53 }
 0x2ce   :  { %vm876_vm13 = vcmp.gt.s32.totalorder %v875_v32, 0  ;;  %v979_v44 = vadd.s32 1, %v7795_v22  ;;  %v10913_v45 = vshll.u32 %v977_v52, 8 }
 0x2cf   :  { %v877_v40 = vsel %vm876_vm13, %v875_v32, 0  ;;  %8650 = vmatpush3.bf16.msra.mxu1 %v9122_v61  ;;  %v9130_v61 = vld [vmem:[%s11509_s5 + $0xc0] sm:$0xff]   ;;  %vm867_vm13 = vcmp.lt.s32.totalorder %v10851_v4, 0 }
 0x2d0   :  { %v878_v46 = vshrl.u32 %v877_v40, 5  ;;  %v879_v57 = vand.u32 31, %v877_v40  ;;  %8651 = vmatprep.subr.bf16.mxu1 %v9123_v29  ;;  %vm980_vm14 = vcmp.gt.s32.totalorder %v979_v44, 0 }
 0x2d1   :  { %v981_v24 = vsel %vm980_vm14, %v979_v44, 0  ;;  %vm10961_vm14 = vcmp.le.f32.partialorder %v865_v19, 0.7853982 }
 0x2d2   :  { %v880_v50 = vsub.s32 32, %v879_v57  ;;  %v882_v51 = vshll.u32 %v10339_v28, %v879_v57  ;;  %v885_v55 = vshll.u32 %v10340_v30, %v879_v57  ;;  %v888_v58 = vshll.u32 %v10341_v33, %v879_v57 }
 0x2d3   :  { %v891_v35 = vshll.u32 %v10342_v36, %v879_v57  ;;  %v894_v56 = vshll.u32 %v10343_v39, %v879_v57  ;;  %8652 = vmatpush3.bf16.msra.mxu1 %v9124_v34  ;;  %vm897_vm2 = vcmp.lt.s32.totalorder %v878_v46, 1  ;;  %vm899_vm3 = vcmp.lt.s32.totalorder %v878_v46, 3 }
 0x2d4   :  { %v883_v63 = vshrl.u32 %v10340_v30, %v880_v50  ;;  %v886_v0 = vshrl.u32 %v10341_v33, %v880_v50  ;;  %v889_v1 = vshrl.u32 %v10342_v36, %v880_v50  ;;  %8653 = vmatprep.subr.bf16.mxu1 %v9125_v47  ;;  %v881_v3 = vshrl.u32 %v10339_v28, %v880_v50 }
 0x2d5   :  { %v892_v38 = vshrl.u32 %v10343_v39, %v880_v50  ;;  %v895_v60 = vshrl.u32 %v10344_v42, %v880_v50  ;;  %vm900_vm4 = vcmp.lt.s32.totalorder %v878_v46, 4  ;;  %v983_v9 = vand.u32 31, %v981_v24 }
 0x2d6   :  { %v884_v59 = vor.u32 %v883_v63, %v882_v51  ;;  %v887_v5 = vor.u32 %v886_v0, %v885_v55  ;;  %v890_v17 = vor.u32 %v889_v1, %v888_v58  ;;  %vm898_vm5 = vcmp.lt.s32.totalorder %v878_v46, 2 }
 0x2d7   :  { %v893_v7 = vor.u32 %v892_v38, %v891_v35  ;;  %v896_v41 = vor.u32 %v895_v60, %v894_v56  ;;  %8654 = vmatpush3.bf16.msra.mxu1 %v9126_v43  ;;  %v984_v13 = vsub.s32 32, %v983_v9  ;;  %v982_v27 = vshrl.u32 %v981_v24, 5 }
 0x2d8   :  { %v901_v11 = vsel %vm897_vm2, %v881_v3, %v884_v59  ;;  %v902_v12 = vsel %vm900_vm4, %v890_v17, 2102212464  ;;  %v905_v14 = vsel %vm897_vm2, %v884_v59, %v887_v5  ;;  %v909_v15 = vsel %vm897_vm2, %v887_v5, %v890_v17  ;;  %8655 = vmatprep.subr.bf16.mxu1 %v9127_v2 }
 0x2d9   :  { %v903_v62 = vsel %vm899_vm3, %v887_v5, %v902_v12  ;;  %v906_v18 = vsel %vm900_vm4, %v893_v7, 920167782  ;;  %v910_v54 = vsel %vm900_vm4, %v896_v41, 1326507024  ;;  %v986_v53 = vshll.u32 %v10339_v28, %v983_v9 }
 0x2da   :  { %v907_v21 = vsel %vm899_vm3, %v890_v17, %v906_v18  ;;  %v911_v23 = vsel %vm899_vm3, %v893_v7, %v910_v54  ;;  %v904_v48 = vsel %vm898_vm5, %v901_v11, %v903_v62  ;;  %v987_v40 = vshrl.u32 %v10340_v30, %v984_v13 }
 0x2db   :  { %v908_v25 = vsel %vm898_vm5, %v905_v14, %v907_v21  ;;  %v912_v31 = vsel %vm898_vm5, %v909_v15, %v911_v23  ;;  %8656 = vmatpush3.bf16.msra.mxu1 %v9128_v10  ;;  %v989_v44 = vshll.u32 %v10340_v30, %v983_v9  ;;  %v990_v34 = vshrl.u32 %v10341_v33, %v984_v13 }
 0x2dc   :  { %v10919_v32 = vmul.u32.u64.low %v10881_v49, %v912_v31  ;;  %v10920_v29 = vmul.u32.u64.high %v10881_v49, %v912_v31, %v10919_v32  ;;  %v10923_v37 = vmul.u32.u64.low %v10881_v49, %v908_v25  ;;  %v10924_v22 = vmul.u32.u64.high %v10881_v49, %v908_v25, %v10923_v37  ;;  %8657 = vmatprep.subr.bf16.mxu1 %v9129_v16 }
 0x2dd   :  { %v992_v46 = vshll.u32 %v10341_v33, %v983_v9  ;;  %v993_v57 = vshrl.u32 %v10342_v36, %v984_v13  ;;  %v995_v47 = vshll.u32 %v10342_v36, %v983_v9  ;;  %v996_v50 = vshrl.u32 %v10343_v39, %v984_v13 }
 0x2de   :  { %v988_v51 = vor.u32 %v987_v40, %v986_v53  ;;  %v991_v52 = vor.u32 %v990_v34, %v989_v44  ;;  %v998_v55 = vshll.u32 %v10343_v39, %v983_v9  ;;  %v999_v58 = vshrl.u32 %v10344_v42, %v984_v13 }
 0x2df   :  { %8658 = vmatpush3.bf16.msra.mxu1 %v9130_v61  ;;  %v920_v35 = vmul.u32 %v10881_v49, %v904_v48  ;;  %vm922_vm6 = vc.u32 %v10920_v29, %v10923_v37  ;;  %v923_v30 = vadd.s32 1, %v10924_v22  ;;  %v994_v33 = vor.u32 %v993_v57, %v992_v46 }
 0x2e0   :  { %v985_v56 = vshrl.u32 %v10339_v28, %v984_v13  ;;  %v997_v36 = vor.u32 %v996_v50, %v995_v47  ;;  %v1000_v43 = vor.u32 %v999_v58, %v998_v55  ;;  %vm1001_vm7 = vcmp.lt.s32.totalorder %v982_v27, 1 }
 0x2e1   :  { %v924_v63 = vsel %vm922_vm6, %v923_v30, %v10924_v22  ;;  %vm1003_vm8 = vcmp.lt.s32.totalorder %v982_v27, 3  ;;  %vm1004_vm1 = vcmp.lt.s32.totalorder %v982_v27, 4  ;;  %v1009_v39 = vsel %vm1001_vm7, %v988_v51, %v991_v52 }
 0x2e2   :  { %v925_v42 = vadd.s32 %v924_v63, %v920_v35  ;;  %v1006_v0 = vsel %vm1004_vm1, %v994_v33, 2102212464  ;;  %v1010_v1 = vsel %vm1004_vm1, %v997_v36, 920167782  ;;  %v1013_v49 = vsel %vm1001_vm7, %v991_v52, %v994_v33 }
 0x2e3   :  { %vm1002_vm9 = vcmp.lt.s32.totalorder %v982_v27, 2  ;;  %v1005_v2 = vsel %vm1001_vm7, %v985_v56, %v988_v51  ;;  %v1011_v3 = vsel %vm1003_vm8, %v994_v33, %v1010_v1  ;;  %v1014_v38 = vsel %vm1004_vm1, %v1000_v43, 1326507024 }
 0x2e4   :  { %v926_v60 = vadd.s32 536870912, %v925_v42  ;;  %v1007_v59 = vsel %vm1003_vm8, %v991_v52, %v1006_v0  ;;  %v1012_v5 = vsel %vm1002_vm9, %v1009_v39, %v1011_v3  ;;  %v1015_v28 = vsel %vm1003_vm8, %v997_v36, %v1014_v38 }
 0x2e5   :  { %v1016_v17 = vsel %vm1002_vm9, %v1013_v49, %v1015_v28  ;;  %v10944_v24 = vmul.u32.u64.low %v10913_v45, %v1012_v5  ;;  %v10945_v7 = vmul.u32.u64.high %v10913_v45, %v1012_v5, %v10944_v24  ;;  %v1008_v11 = vsel %vm1002_vm9, %v1005_v2, %v1007_v59 }
 0x2e6   :  { %v927_v41 = vshrl.u32 %v926_v60, 30  ;;  %v10948_v9 = vmul.u32.u64.low %v10913_v45, %v1016_v17  ;;  %v10949_v10 = vmul.u32.u64.high %v10913_v45, %v1016_v17, %v10948_v9  ;;  %v1024_v16 = vmul.u32 %v10913_v45, %v1008_v11 }
 0x2e7   :  { %v1027_v14 = vadd.s32 1, %v10945_v7  ;;  %v921_v32 = vadd.s32 %v10923_v37, %v10920_v29  ;;  %vm971_vm2 = vcmp.lt.s32.totalorder %v10855_v20, 0  ;;  %vm10971_vm3 = vcmp.le.f32.partialorder %v969_v26, 0.7853982 }
 0x2e8   :  { %v928_v12 = vshll.u32 %v927_v41, 30  ;;  %vm1026_vm10 = vc.u32 %v10949_v10, %v10944_v24  ;;  %v1025_v33 = vadd.s32 %v10944_v24, %v10949_v10  ;;  %v951_v60 = vsub.s32 4, %v927_v41 }
 0x2e9   :  { %v1028_v62 = vsel %vm1026_vm10, %v1027_v14, %v10945_v7  ;;  %vm957_vm1 = vweird.f32 %v10851_v4  ;;  %vm1061_vm10 = vweird.f32 %v10855_v20 }
 0x2ea   :  { %v929_v15 = vsub.s32 %v925_v42, %v928_v12  ;;  %v1029_v54 = vadd.s32 %v1028_v62, %v1024_v16  ;;  %v952_v28 = vsel %vm867_vm13, %v951_v60, %v927_v41 }
 0x2eb   :  { %v954_v9 = vsel %vm10961_vm14, 0, %v952_v28 }
 0x2ec   :  { %v931_v18 = vsub.s32 0, %v929_v15  ;;  %v1030_v21 = vadd.s32 536870912, %v1029_v54  ;;  %v958_v12 = vadd.s32 3, %v954_v9 }
 0x2ee   :  { %v7792_v13 = vmin.u32 %v931_v18, %v929_v15  ;;  %v1031_v48 = vshrl.u32 %v1030_v21, 30 }
 0x2f0   :  { %v933_v23 = vclz %v7792_v13  ;;  %v1032_v31 = vshll.u32 %v1031_v48, 30  ;;  %v1055_v19 = vsub.s32 4, %v1031_v48 }
 0x2f2   :  { %v7793_v25 = vadd.s32 4294967294, %v933_v23  ;;  %v1033_v27 = vsub.s32 %v1029_v54, %v1032_v31  ;;  %v1056_v41 = vsel %vm971_vm2, %v1055_v19, %v1031_v48  ;;  %v959_v54 = vand.u32 3, %v958_v12 }
 0x2f3   :  { %v1058_v26 = vsel %vm10971_vm3, 0, %v1056_v41 }
 0x2f4   :  { %vm7794_vm11 = vcmp.lt.s32.totalorder %v7793_v25, 0  ;;  %v1035_v53 = vsub.s32 0, %v1033_v27  ;;  %v1062_v13 = vadd.s32 3, %v1058_v26  ;;  %vm961_vm4 = vcmp.eq.s32.totalorder %v959_v54, 0 }
 0x2f5   :  { %v936_v61 = vsel %vm7794_vm11, 0, %v7793_v25  ;;  %vm964_vm5 = vcmp.eq.s32.totalorder %v959_v54, 2  ;;  %vm960_vm6 = vcmp.lt.s32.totalorder %v959_v54, 2 }
 0x2f6   :  { %v937_v22 = vsub.s32 32, %v936_v61  ;;  %v941_v45 = vsub.s32 4294967266, %v936_v61  ;;  %v938_v40 = vshll.u32 %v929_v15, %v936_v61  ;;  %v7796_v46 = vmin.u32 %v1035_v53, %v1033_v27 }
 0x2f7   :  { %v1063_v25 = vand.u32 3, %v1062_v13 }
 0x2f8   :  { %v939_v44 = vshrl.u32 %v921_v32, %v937_v22  ;;  %v942_v34 = vadd.s32 127, %v941_v45  ;;  %v1037_v50 = vclz %v7796_v46 }
 0x2f9   :  { %vm1068_vm7 = vcmp.eq.s32.totalorder %v1063_v25, 2  ;;  %vm1065_vm8 = vcmp.eq.s32.totalorder %v1063_v25, 0  ;;  %vm1064_vm9 = vcmp.lt.s32.totalorder %v1063_v25, 2 }
 0x2fa   :  { %v940_v57 = vor.u32 %v939_v44, %v938_v40  ;;  %v943_v47 = vshll.u32 %v942_v34, 23  ;;  %v7797_v52 = vadd.s32 4294967294, %v1037_v50 }
 0x2fc   :  { %v944_v51 = vor.u32 4788187, %v943_v47  ;;  %v947_v58 = vcvt.s32.f32 %v940_v57  ;;  %vm7798_vm12 = vcmp.lt.s32.totalorder %v7797_v52, 0 }
 0x2fd   :  { %v1040_v35 = vsel %vm7798_vm12, 0, %v7797_v52 }
 0x2fe   :  { %v945_v55 = vand.u32 2147483647, %v944_v51  ;;  %v1041_v29 = vsub.s32 32, %v1040_v35  ;;  %v1045_v37 = vsub.s32 4294967266, %v1040_v35  ;;  %v1042_v36 = vshll.u32 %v1033_v27, %v1040_v35 }
 0x300   :  { %v948_v30 = vmul.f32 %v947_v58, %v945_v55  ;;  %v1043_v43 = vshrl.u32 %v1025_v33, %v1041_v29  ;;  %v1046_v63 = vadd.s32 127, %v1045_v37 }
 0x302   :  { %v949_v56 = vxor.u32 2147483648, %v948_v30  ;;  %v1044_v0 = vor.u32 %v1043_v43, %v1042_v36  ;;  %v1047_v1 = vshll.u32 %v1046_v63, 23 }
 0x304   :  { %v950_v42 = vsel %vm867_vm13, %v949_v56, %v948_v30  ;;  %v1048_v2 = vor.u32 4788187, %v1047_v1  ;;  %v1051_v38 = vcvt.s32.f32 %v1044_v0 }
 0x305   :  { %v953_v49 = vsel %vm10961_vm14, %v10851_v4, %v950_v42 }
 0x306   :  { %9151 = vcosq.f32 %v953_v49  ;;  %v1049_v3 = vand.u32 2147483647, %v1048_v2 }
 0x307   :  { %9153 = vsinq.f32 %v953_v49 }
 0x308   :  { %v1052_v59 = vmul.f32 %v1051_v38, %v1049_v3 }
 0x30a   :  { %v1053_v5 = vxor.u32 2147483648, %v1052_v59 }
 0x30c   :  { %v1054_v24 = vsel %vm971_vm2, %v1053_v5, %v1052_v59 }
 0x30d   :  { %v1057_v7 = vsel %vm10971_vm3, %v10855_v20, %v1054_v24 }
 0x30e   :  { %9155 = vcosq.f32 %v1057_v7 }
 0x30f   :  { %v8637_v10 = vpop.f32.mrf.mxu0  ;;  %9157 = vsinq.f32 %v1057_v7 }
 0x311   :  { %v8638_v11 = vpop.f32.mrf.mxu0 }
 0x312   :  { %v8639_v14 = vadd.f32 %v8638_v11, %v8637_v10 }
 0x313   :  { %v9152_v15 = vpop.eup %9151  ;;  %v8640_v16 = vpop.f32.mrf.mxu0 }
 0x314   :  { %v9154_v62 = vpop.eup %9153  ;;  %v965_v23 = vxor.u32 2147483648, %v9152_v15 }
 0x315   :  { %v8641_v18 = vpop.f32.mrf.mxu0  ;;  %v962_v21 = vxor.u32 2147483648, %v9154_v62 }
 0x316   :  { %v966_v48 = vsel %vm964_vm5, %v965_v23, %v9154_v62 }
 0x317   :  { %v963_v31 = vsel %vm961_vm4, %v9152_v15, %v962_v21 }
 0x318   :  { %v967_v45 = vsel %vm960_vm6, %v963_v31, %v966_v48 }
 0x319   :  { %v968_v34 = vsel %vm957_vm1, nan, %v967_v45 }
 0x31a   :  { %v1179_v47 = vpack.c.bf16 %v968_v34, %v968_v34 }
 0x31b   :  { %v9156_v27 = vpop.eup %9155 }
 0x31c   :  { %v9158_v61 = vpop.eup %9157  ;;  %v1069_v32 = vxor.u32 2147483648, %v9156_v27 }
 0x31d   :  { %v1066_v22 = vxor.u32 2147483648, %v9158_v61 }
 0x31e   :  { %v1070_v53 = vsel %vm1068_vm7, %v1069_v32, %v9158_v61 }
 0x31f   :  { %v1067_v40 = vsel %vm1065_vm8, %v9156_v27, %v1066_v22 }
 0x320   :  { %v1071_v44 = vsel %vm1064_vm9, %v1067_v40, %v1070_v53 }
 0x321   :  { %v1072_v46 = vsel %vm1061_vm10, nan, %v1071_v44 }
 0x322   :  { %v1180_v57 = vpack.c.bf16 %v1072_v46, %v1072_v46 }
 0x324   :  { %1650 = vmatprep.mubr.bf16.mxu1 %v1180_v57 }
 0x325   :  { %1651 = vmatmul.mubr.bf16.vlgmr.msra.gmra.mxu1 %v1179_v47 }
 0x32f   :  { %v1692_v50 = vpop.f32.mrf.mxu0 }
 0x331   :  { %v8824_v51 = vpop.f32.mrf.mxu0 }
 0x333   :  { %v1695_v52 = vpop.f32.mrf.mxu0 }
 0x335   :  { %v8825_v55 = vpop.f32.mrf.mxu0 }
 0x336   :  { %10291 = shalt.err (!%p10288_p6)  }
 0x337   :  { %124 = dma.hbm_to_vmem [thread:$0]  %s11513_s9, 73728, %s122_s13, [#allocation4]  ;;  %v7848_v43 = vld [vmem:[#allocation10 + $0x2] ss:$0 sm:$0xff] }
 0x382   :  { %v1332_v4 = vpop.f32.mrf.mxu1 }
 0x383   :  { %v1613_v20 = vadd.f32 %v8639_v14, %v1332_v4 }
 0x384   :  { %v8804_v58 = vpop.f32.mrf.mxu1 }
 0x386   :  { %v1335_v35 = vpop.f32.mrf.mxu1 }
 0x388   :  { %v8805_v30 = vpop.f32.mrf.mxu1 }
 0x3e5   :  { %v8659_v33 = vpop.f32.mrf.mxu1 }
 0x3e7   :  { %v8660_v29 = vpop.f32.mrf.mxu1 }
 0x3e8   :  { %v8661_v37 = vadd.f32 %v8660_v29, %v8659_v33 }
 0x3e9   :  { %v8662_v56 = vpop.f32.mrf.mxu1 }
 0x3ea   :  { %v1653_v36 = vadd.f32 %v8661_v37, %v1613_v20 }
 0x3eb   :  { %v8663_v63 = vpop.f32.mrf.mxu1 }
 0x3ec   :  { %v1693_v39 = vadd.f32 %v1692_v50, %v1653_v36 }
 0x3ee   :  { %v10987_v42 = vadd.f32 %v7848_v43, %v1693_v39 }
 0x3ef   :  { %10320 = dma.done.wait [#allocation4], 73728 }
 0x3f0   :  { %10321 = vsyncadd [#allocation4], 4294893568  ;;  %v1718_v0 = vlaneseq  ;;  %v10346_v1 = vmov 1983009808   ;;  %v1714_v38 = vcombine.high %v10431_v6, %v10431_v6  ;;  %v9159_v59 = vld [vmem:[#allocation2 + $0x3f4] ss:$72 sps:$4 sm:$0xff]  }
 0x3f1   :  { %v1716_v49 = vunpack.c.l.s4 %v10346_v1  ;;  %v9161_v19 = vld [vmem:[#allocation2 + $0x3f0] ss:$72 sps:$4 sm:$0xff]   ;;  %5291 = vmatprep.subr.bf16.mxu1 %v9159_v59  ;;  %v9162_v17 = vld [vmem:[#allocation2 + $0xcf4] ss:$72 sps:$4 sm:$0xff]   ;;  %v9165_v10 = vld [vmem:[#allocation2 + $0x364] ss:$72 sps:$4 sm:$0xff]  }
 0x3f2   :  { %v10989_v2 = vshrl.u32 %v1718_v0, 7  ;;  %v9164_v24 = vld [vmem:[#allocation2 + $0xcf0] ss:$72 sps:$4 sm:$0xff]   ;;  %5292 = vmatpush1.bf16.msra.mxu1 %v9161_v19  ;;  %v9167_v41 = vld [vmem:[#allocation2 + $0x360] ss:$72 sps:$4 sm:$0xff]   ;;  %5332 = vmatprep.subr.bf16.mxu0 %v9162_v17  ;;  %vm6136_vm11 = vcmask 517120  }
 0x3f3   :  { %v1717_v3 = vunpack.c.0.s8 %v1716_v49  ;;  %v9168_v11 = vld [vmem:[#allocation2 + $0xc64] ss:$72 sps:$4 sm:$0xff]   ;;  %5333 = vmatpush1.bf16.msra.mxu0 %v9164_v24  ;;  %5293 = vmatprep.subr.bf16.mxu1 %v9165_v10  ;;  %v9170_v14 = vld [vmem:[#allocation2 + $0xc60] ss:$72 sps:$4 sm:$0xff]   ;;  %v9171_v15 = vld [vmem:[#allocation2 + $0x2d4] ss:$72 sps:$4 sm:$0xff]   ;;  %v6142_v24 = vmul.f32 %v10987_v42, %v10987_v42 }
 0x3f4   :  { %5334 = vmatprep.subr.bf16.mxu0 %v9168_v11  ;;  %v9173_v26 = vld [vmem:[#allocation2 + $0x2d0] ss:$72 sps:$4 sm:$0xff]   ;;  %v9174_v16 = vld [vmem:[#allocation2 + $0xbd4] ss:$72 sps:$4 sm:$0xff]   ;;  %v9177_v62 = vld [vmem:[#allocation2 + $0x244] ss:$72 sps:$4 sm:$0xff]  }
 0x3f5   :  { %v10994_v60 = vsub.s32 %v1717_v3, %v10989_v2  ;;  %v9176_v18 = vld [vmem:[#allocation2 + $0xbd0] ss:$72 sps:$4 sm:$0xff]   ;;  %v9180_v54 = vld [vmem:[#allocation2 + $0xb44] ss:$72 sps:$4 sm:$0xff]   ;;  %v9179_v13 = vld [vmem:[#allocation2 + $0x240] ss:$72 sps:$4 sm:$0xff]  }
 0x3f6   :  { %5294 = vmatpush1.bf16.msra.mxu1 %v9167_v41  ;;  %v9183_v21 = vld [vmem:[#allocation2 + $0x1b4] ss:$72 sps:$4 sm:$0xff]   ;;  %v9182_v23 = vld [vmem:[#allocation2 + $0xb40] ss:$72 sps:$4 sm:$0xff]   ;;  %v9185_v31 = vld [vmem:[#allocation2 + $0x1b0] ss:$72 sps:$4 sm:$0xff]  }
 0x3f7   :  { %v10998_v5 = vrot.slane %v10431_v6, %v10994_v60  ;;  %v11001_v28 = vrot.slane %v1714_v38, %v10994_v60  ;;  %5295 = vmatprep.subr.bf16.mxu1 %v9171_v15  ;;  %5335 = vmatpush1.bf16.msra.mxu0 %v9170_v14  ;;  %v9186_v25 = vld [vmem:[#allocation2 + $0xab4] ss:$72 sps:$4 sm:$0xff]   ;;  %v9189_v48 = vld [vmem:[#allocation2 + $0x124] ss:$72 sps:$4 sm:$0xff]   ;;  %v9188_v27 = vld [vmem:[#allocation2 + $0xab0] ss:$72 sps:$4 sm:$0xff]  }
 0x3f8   :  { %5336 = vmatprep.subr.bf16.mxu0 %v9174_v16  ;;  %v9192_v61 = vld [vmem:[#allocation2 + $0xa24] ss:$72 sps:$4 sm:$0xff]   ;;  %v9191_v32 = vld [vmem:[#allocation2 + $0x120] ss:$72 sps:$4 sm:$0xff]   ;;  %v9195_v22 = vld [vmem:[#allocation2 + $0x94] ss:$72 sps:$4 sm:$0xff]  }
 0x3f9   :  { %v1729_v7 = vcombine.high %v10998_v5, %v10998_v5  ;;  %v1730_v9 = vcombine.high %v11001_v28, %v11001_v28  ;;  %v9194_v45 = vld [vmem:[#allocation2 + $0xa20] ss:$72 sps:$4 sm:$0xff]   ;;  %v9198_v53 = vld [vmem:[#allocation2 + $0x994] ss:$72 sps:$4 sm:$0xff]   ;;  %v9197_v40 = vld [vmem:[#allocation2 + $0x90] ss:$72 sps:$4 sm:$0xff]  }
 0x3fa   :  { %5296 = vmatpush1.bf16.msra.mxu1 %v9173_v26  ;;  %v9201_v44 = vld [vmem:[#allocation2 + $0x4] ss:$72 sps:$4 sm:$0xff]   ;;  %v9200_v34 = vld [vmem:[#allocation2 + $0x990] ss:$72 sps:$4 sm:$0xff]   ;;  %v9203_v57 = vld [vmem:[#allocation2] ss:$72 sps:$4 sm:$0xff]  }
 0x3fb   :  { %v11007_v6 = vpack.c.bf16 %v1729_v7, %v1729_v7  ;;  %v11009_v12 = vpack.c.bf16 %v1730_v9, %v1730_v9  ;;  %5297 = vmatprep.subr.bf16.mxu1 %v9177_v62  ;;  %5337 = vmatpush1.bf16.msra.mxu0 %v9176_v18  ;;  %v9204_v46 = vld [vmem:[#allocation2 + $0x904] ss:$72 sps:$4 sm:$0xff]   ;;  %v9207_v47 = vld [vmem:[#allocation2 + $0x874] ss:$72 sps:$4 sm:$0xff]   ;;  %v9206_v50 = vld [vmem:[#allocation2 + $0x900] ss:$72 sps:$4 sm:$0xff]   ;;  %v11020_v18 = vpack.c.bf16 %v10998_v5, %v10998_v5 }
 0x3fc   :  { %5338 = vmatprep.subr.bf16.mxu0 %v9180_v54  ;;  %v9210_v51 = vld [vmem:[#allocation2 + $0x1174] ss:$72 sps:$4 sm:$0xff]   ;;  %v9209_v52 = vld [vmem:[#allocation2 + $0x870] ss:$72 sps:$4 sm:$0xff]   ;;  %v9213_v55 = vld [vmem:[#allocation2 + $0x7e4] ss:$72 sps:$4 sm:$0xff]  }
 0x3fd   :  { %5323 = vmatprep.mubr.bf16.mxu1 %v11007_v6  ;;  %5364 = vmatprep.mubr.bf16.mxu0 %v11009_v12  ;;  %v9212_v4 = vld [vmem:[#allocation2 + $0x1170] ss:$72 sps:$4 sm:$0xff]   ;;  %v9216_v20 = vld [vmem:[#allocation2 + $0x10e4] ss:$72 sps:$4 sm:$0xff]   ;;  %v9215_v58 = vld [vmem:[#allocation2 + $0x7e0] ss:$72 sps:$4 sm:$0xff]  }
 0x3fe   :  { %5298 = vmatpush1.bf16.msra.mxu1 %v9179_v13  ;;  %v9219_v35 = vld [vmem:[#allocation2 + $0x754] ss:$72 sps:$4 sm:$0xff]   ;;  %v9218_v30 = vld [vmem:[#allocation2 + $0x10e0] ss:$72 sps:$4 sm:$0xff]   ;;  %v9221_v29 = vld [vmem:[#allocation2 + $0x750] ss:$72 sps:$4 sm:$0xff]  }
 0x3ff   :  { %5299 = vmatprep.subr.bf16.mxu1 %v9183_v21  ;;  %5339 = vmatpush1.bf16.msra.mxu0 %v9182_v23  ;;  %v9222_v33 = vld [vmem:[#allocation2 + $0x1054] ss:$72 sps:$4 sm:$0xff]   ;;  %v9225_v37 = vld [vmem:[#allocation2 + $0x6c4] ss:$72 sps:$4 sm:$0xff]   ;;  %v9224_v56 = vld [vmem:[#allocation2 + $0x1050] ss:$72 sps:$4 sm:$0xff]   ;;  %v11024_v21 = vpack.c.bf16 %v11001_v28, %v11001_v28 }
 0x400   :  { %5340 = vmatprep.subr.bf16.mxu0 %v9186_v25  ;;  %v9228_v36 = vld [vmem:[#allocation2 + $0xfc4] ss:$72 sps:$4 sm:$0xff]   ;;  %v9227_v43 = vld [vmem:[#allocation2 + $0x6c0] ss:$72 sps:$4 sm:$0xff]   ;;  %v9231_v63 = vld [vmem:[#allocation2 + $0x634] ss:$72 sps:$4 sm:$0xff]  }
 0x401   :  { %v9230_v39 = vld [vmem:[#allocation2 + $0xfc0] ss:$72 sps:$4 sm:$0xff]   ;;  %v9234_v0 = vld [vmem:[#allocation2 + $0xf34] ss:$72 sps:$4 sm:$0xff]   ;;  %v9233_v1 = vld [vmem:[#allocation2 + $0x630] ss:$72 sps:$4 sm:$0xff]  }
 0x402   :  { %5300 = vmatpush1.bf16.msra.mxu1 %v9185_v31  ;;  %v9237_v49 = vld [vmem:[#allocation2 + $0x5a4] ss:$72 sps:$4 sm:$0xff]   ;;  %v9236_v3 = vld [vmem:[#allocation2 + $0xf30] ss:$72 sps:$4 sm:$0xff]   ;;  %v6137_v59 = vsel %vm6136_vm11, %v10987_v42, 0.0  ;;  %v6143_v10 = vsel %vm6136_vm11, %v6142_v24, 0.0 }
 0x403   :  { %5301 = vmatprep.subr.bf16.mxu1 %v9189_v48  ;;  %5341 = vmatpush1.bf16.msra.mxu0 %v9188_v27  ;;  %v9240_v38 = vld [vmem:[#allocation2 + $0xea4] ss:$72 sps:$4 sm:$0xff]   ;;  %v9239_v19 = vld [vmem:[#allocation2 + $0x5a0] ss:$72 sps:$4 sm:$0xff]   ;;  %v9243_v17 = vld [vmem:[#allocation2 + $0x514] ss:$72 sps:$4 sm:$0xff]  }
 0x404   :  { %5342 = vmatprep.subr.bf16.mxu0 %v9192_v61  ;;  %6138 = vadd.xlane.f32.xlu0 %v6137_v59  ;;  %v9242_v7 = vld [vmem:[#allocation2 + $0xea0] ss:$72 sps:$4 sm:$0xff]   ;;  %v9246_v9 = vld [vmem:[#allocation2 + $0xe14] ss:$72 sps:$4 sm:$0xff]   ;;  %v9245_v41 = vld [vmem:[#allocation2 + $0x510] ss:$72 sps:$4 sm:$0xff]  }
 0x405   :  { %v9249_v11 = vld [vmem:[#allocation2 + $0x484] ss:$72 sps:$4 sm:$0xff]   ;;  %v9248_v14 = vld [vmem:[#allocation2 + $0xe10] ss:$72 sps:$4 sm:$0xff]   ;;  %v9251_v26 = vld [vmem:[#allocation2 + $0x480] ss:$72 sps:$4 sm:$0xff]  }
 0x406   :  { %5302 = vmatpush1.bf16.msra.mxu1 %v9191_v32  ;;  %v9252_v15 = vld [vmem:[#allocation2 + $0xd84] ss:$72 sps:$4 sm:$0xff]   ;;  %v9254_v62 = vld [vmem:[#allocation2 + $0xd80] ss:$72 sps:$4 sm:$0xff]   ;;  %vm6251_vm12 = vcmask 1041408   ;;  %s10347_s3 = smov [#allocation16]  }
 0x407   :  { %5303 = vmatprep.subr.bf16.mxu1 %v9195_v22  ;;  %5343 = vmatpush1.bf16.msra.mxu0 %v9194_v45  ;;  %v9257_v16 = vld [vmem:[#allocation2 + $0x3fc] ss:$72 sps:$4 sm:$0xff]   ;;  %v9255_v13 = vld [vmem:[#allocation2 + $0x3f8] ss:$72 sps:$4 sm:$0xff]   ;;  %v9263_v23 = vld [vmem:[#allocation2 + $0x36c] ss:$72 sps:$4 sm:$0xff]  }
 0x408   :  { %5344 = vmatprep.subr.bf16.mxu0 %v9198_v53  ;;  %6144 = vadd.xlane.f32.xlu0 %v6143_v10  ;;  %v9260_v54 = vld [vmem:[#allocation2 + $0xcfc] ss:$72 sps:$4 sm:$0xff]   ;;  %v9258_v25 = vld [vmem:[#allocation2 + $0xcf8] ss:$72 sps:$4 sm:$0xff]   ;;  %v9266_v31 = vld [vmem:[#allocation2 + $0xc6c] ss:$72 sps:$4 sm:$0xff]  }
 0x409   :  { %v9261_v48 = vld [vmem:[#allocation2 + $0x368] ss:$72 sps:$4 sm:$0xff]   ;;  %v9269_v5 = vld [vmem:[#allocation2 + $0x2dc] ss:$72 sps:$4 sm:$0xff]   ;;  %v9267_v61 = vld [vmem:[#allocation2 + $0x2d8] ss:$72 sps:$4 sm:$0xff]  }
 0x40a   :  { %5304 = vmatpush1.bf16.msra.mxu1 %v9197_v40  ;;  %v9264_v27 = vld [vmem:[#allocation2 + $0xc68] ss:$72 sps:$4 sm:$0xff]   ;;  %v9272_v28 = vld [vmem:[#allocation2 + $0xbdc] ss:$72 sps:$4 sm:$0xff]   ;;  %v9275_v32 = vld [vmem:[#allocation2 + $0x24c] ss:$72 sps:$4 sm:$0xff]  }
 0x40b   :  { %5305 = vmatprep.subr.bf16.mxu1 %v9201_v44  ;;  %5345 = vmatpush1.bf16.msra.mxu0 %v9200_v34  ;;  %v9270_v22 = vld [vmem:[#allocation2 + $0xbd8] ss:$72 sps:$4 sm:$0xff]   ;;  %v9278_v45 = vld [vmem:[#allocation2 + $0xb4c] ss:$72 sps:$4 sm:$0xff]   ;;  %v9273_v53 = vld [vmem:[#allocation2 + $0x248] ss:$72 sps:$4 sm:$0xff]  }
 0x40c   :  { %5346 = vmatprep.subr.bf16.mxu0 %v9204_v46  ;;  %v9281_v40 = vld [vmem:[#allocation2 + $0x1bc] ss:$72 sps:$4 sm:$0xff]   ;;  %v9276_v44 = vld [vmem:[#allocation2 + $0xb48] ss:$72 sps:$4 sm:$0xff]   ;;  %v9279_v46 = vld [vmem:[#allocation2 + $0x1b8] ss:$72 sps:$4 sm:$0xff]  }
 0x40d   :  { %v9284_v34 = vld [vmem:[#allocation2 + $0xabc] ss:$72 sps:$4 sm:$0xff]   ;;  %v9323_v59 = vld [vmem:[#allocation2 + $0x6cc] ss:$72 sps:$4 sm:$0xff]   ;;  %v9321_v24 = vld [vmem:[#allocation2 + $0x6c8] ss:$72 sps:$4 sm:$0xff]  }
 0x40e   :  { %5306 = vmatpush1.bf16.msra.mxu1 %v9203_v57  ;;  %v9287_v57 = vld [vmem:[#allocation2 + $0x12c] ss:$72 sps:$4 sm:$0xff]   ;;  %v9332_v10 = vld [vmem:[#allocation2 + $0xf3c] ss:$72 sps:$4 sm:$0xff]  }
 0x40f   :  { %5307 = vmatprep.subr.bf16.mxu1 %v9207_v47  ;;  %5347 = vmatpush1.bf16.msra.mxu0 %v9206_v50  ;;  %v9282_v47 = vld [vmem:[#allocation2 + $0xab8] ss:$72 sps:$4 sm:$0xff]   ;;  %v9290_v50 = vld [vmem:[#allocation2 + $0xa2c] ss:$72 sps:$4 sm:$0xff]  }
 0x410   :  { %5348 = vmatprep.subr.bf16.mxu0 %v9210_v51  ;;  %v9285_v51 = vld [vmem:[#allocation2 + $0x128] ss:$72 sps:$4 sm:$0xff]  }
 0x412   :  { %5308 = vmatpush2.bf16.msra.mxu1 %v9209_v52  ;;  %v9293_v52 = vld [vmem:[#allocation2 + $0x9c] ss:$72 sps:$4 sm:$0xff]  }
 0x413   :  { %5309 = vmatprep.subr.bf16.mxu1 %v9213_v55  ;;  %5349 = vmatpush2.bf16.msra.mxu0 %v9212_v4  ;;  %v9288_v55 = vld [vmem:[#allocation2 + $0xa28] ss:$72 sps:$4 sm:$0xff]   ;;  %v9296_v4 = vld [vmem:[#allocation2 + $0x99c] ss:$72 sps:$4 sm:$0xff]  }
 0x414   :  { %5350 = vmatprep.subr.bf16.mxu0 %v9216_v20  ;;  %v9291_v20 = vld [vmem:[#allocation2 + $0x98] ss:$72 sps:$4 sm:$0xff]  }
 0x416   :  { %5310 = vmatpush2.bf16.msra.mxu1 %v9215_v58  ;;  %v9299_v58 = vld [vmem:[#allocation2 + $0xc] ss:$72 sps:$4 sm:$0xff]  }
 0x417   :  { %5311 = vmatprep.subr.bf16.mxu1 %v9219_v35  ;;  %5351 = vmatpush2.bf16.msra.mxu0 %v9218_v30  ;;  %v9294_v35 = vld [vmem:[#allocation2 + $0x998] ss:$72 sps:$4 sm:$0xff]   ;;  %v9302_v30 = vld [vmem:[#allocation2 + $0x90c] ss:$72 sps:$4 sm:$0xff]  }
 0x418   :  { %5352 = vmatprep.subr.bf16.mxu0 %v9222_v33  ;;  %v9297_v33 = vld [vmem:[#allocation2 + $0x8] ss:$72 sps:$4 sm:$0xff]  }
 0x41a   :  { %5312 = vmatpush2.bf16.msra.mxu1 %v9221_v29  ;;  %v9305_v29 = vld [vmem:[#allocation2 + $0x87c] ss:$72 sps:$4 sm:$0xff]  }
 0x41b   :  { %5313 = vmatprep.subr.bf16.mxu1 %v9225_v37  ;;  %5353 = vmatpush2.bf16.msra.mxu0 %v9224_v56  ;;  %v9300_v37 = vld [vmem:[#allocation2 + $0x908] ss:$72 sps:$4 sm:$0xff]   ;;  %v9308_v56 = vld [vmem:[#allocation2 + $0x117c] ss:$72 sps:$4 sm:$0xff]  }
 0x41c   :  { %5354 = vmatprep.subr.bf16.mxu0 %v9228_v36  ;;  %v9303_v36 = vld [vmem:[#allocation2 + $0x878] ss:$72 sps:$4 sm:$0xff]  }
 0x41e   :  { %5314 = vmatpush2.bf16.msra.mxu1 %v9227_v43  ;;  %v9311_v43 = vld [vmem:[#allocation2 + $0x7ec] ss:$72 sps:$4 sm:$0xff]  }
 0x41f   :  { %5315 = vmatprep.subr.bf16.mxu1 %v9231_v63  ;;  %5355 = vmatpush2.bf16.msra.mxu0 %v9230_v39  ;;  %v9306_v63 = vld [vmem:[#allocation2 + $0x1178] ss:$72 sps:$4 sm:$0xff]   ;;  %v9314_v39 = vld [vmem:[#allocation2 + $0x10ec] ss:$72 sps:$4 sm:$0xff]  }
 0x420   :  { %5356 = vmatprep.subr.bf16.mxu0 %v9234_v0  ;;  %v9309_v0 = vld [vmem:[#allocation2 + $0x7e8] ss:$72 sps:$4 sm:$0xff]  }
 0x422   :  { %5316 = vmatpush2.bf16.msra.mxu1 %v9233_v1  ;;  %v9317_v1 = vld [vmem:[#allocation2 + $0x75c] ss:$72 sps:$4 sm:$0xff]  }
 0x423   :  { %5317 = vmatprep.subr.bf16.mxu1 %v9237_v49  ;;  %5357 = vmatpush2.bf16.msra.mxu0 %v9236_v3  ;;  %v9312_v49 = vld [vmem:[#allocation2 + $0x10e8] ss:$72 sps:$4 sm:$0xff]   ;;  %v9320_v3 = vld [vmem:[#allocation2 + $0x105c] ss:$72 sps:$4 sm:$0xff]  }
 0x424   :  { %5358 = vmatprep.subr.bf16.mxu0 %v9240_v38  ;;  %v9315_v38 = vld [vmem:[#allocation2 + $0x758] ss:$72 sps:$4 sm:$0xff]  }
 0x426   :  { %5318 = vmatpush2.bf16.msra.mxu1 %v9239_v19  ;;  %v9318_v19 = vld [vmem:[#allocation2 + $0x1058] ss:$72 sps:$4 sm:$0xff]  }
 0x427   :  { %5319 = vmatprep.subr.bf16.mxu1 %v9243_v17  ;;  %5359 = vmatpush2.bf16.msra.mxu0 %v9242_v7  ;;  %v9326_v17 = vld [vmem:[#allocation2 + $0xfcc] ss:$72 sps:$4 sm:$0xff]   ;;  %v9329_v7 = vld [vmem:[#allocation2 + $0x63c] ss:$72 sps:$4 sm:$0xff]  }
 0x428   :  { %5360 = vmatprep.subr.bf16.mxu0 %v9246_v9  ;;  %v9324_v9 = vld [vmem:[#allocation2 + $0xfc8] ss:$72 sps:$4 sm:$0xff]  }
 0x42a   :  { %5320 = vmatpush2.bf16.msra.mxu1 %v9245_v41  ;;  %v9327_v41 = vld [vmem:[#allocation2 + $0x638] ss:$72 sps:$4 sm:$0xff]  }
 0x42b   :  { %5321 = vmatprep.subr.bf16.mxu1 %v9249_v11  ;;  %5361 = vmatpush2.bf16.msra.mxu0 %v9248_v14  ;;  %v9335_v11 = vld [vmem:[#allocation2 + $0x5ac] ss:$72 sps:$4 sm:$0xff]   ;;  %v9330_v14 = vld [vmem:[#allocation2 + $0xf38] ss:$72 sps:$4 sm:$0xff]  }
 0x42c   :  { %5362 = vmatprep.subr.bf16.mxu0 %v9252_v15  ;;  %v9338_v15 = vld [vmem:[#allocation2 + $0xeac] ss:$72 sps:$4 sm:$0xff]  }
 0x42e   :  { %5322 = vmatpush2.bf16.msra.mxu1 %v9251_v26  ;;  %v9333_v26 = vld [vmem:[#allocation2 + $0x5a8] ss:$72 sps:$4 sm:$0xff]  }
 0x42f   :  { %5373 = vmatprep.subr.bf16.mxu1 %v9257_v16  ;;  %5363 = vmatpush2.bf16.msra.mxu0 %v9254_v62  ;;  %v9341_v16 = vld [vmem:[#allocation2 + $0x51c] ss:$72 sps:$4 sm:$0xff]   ;;  %v9336_v62 = vld [vmem:[#allocation2 + $0xea8] ss:$72 sps:$4 sm:$0xff]  }
 0x430   :  { %5414 = vmatprep.subr.bf16.mxu0 %v9260_v54  ;;  %v9344_v54 = vld [vmem:[#allocation2 + $0xe1c] ss:$72 sps:$4 sm:$0xff]  }
 0x431   :  { %5324 = vmatmul.mubr.bf16.vlgmr.msra.gmra.mxu1 %v11020_v18 }
 0x432   :  { %5374 = vmatpush1.bf16.msra.mxu1 %v9255_v13  ;;  %5405 = vmatprep.mubr.bf16.mxu1 %v11007_v6  ;;  %v9339_v13 = vld [vmem:[#allocation2 + $0x518] ss:$72 sps:$4 sm:$0xff]  }
 0x433   :  { %5365 = vmatmul.mubr.bf16.vlgmr.msra.gmra.mxu0 %v11024_v21  ;;  %5375 = vmatprep.subr.bf16.mxu1 %v9263_v23  ;;  %v9347_v23 = vld [vmem:[#allocation2 + $0x48c] ss:$72 sps:$4 sm:$0xff]  }
 0x434   :  { %5415 = vmatpush1.bf16.msra.mxu0 %v9258_v25  ;;  %5446 = vmatprep.mubr.bf16.mxu0 %v11009_v12  ;;  %v9342_v25 = vld [vmem:[#allocation2 + $0xe18] ss:$72 sps:$4 sm:$0xff]  }
 0x435   :  { %5416 = vmatprep.subr.bf16.mxu0 %v9266_v31  ;;  %v9350_v31 = vld [vmem:[#allocation2 + $0xd8c] ss:$72 sps:$4 sm:$0xff]  }
 0x436   :  { %5376 = vmatpush1.bf16.msra.mxu1 %v9261_v48  ;;  %v9345_v48 = vld [vmem:[#allocation2 + $0x488] ss:$72 sps:$4 sm:$0xff]  }
 0x437   :  { %5377 = vmatprep.subr.bf16.mxu1 %v9269_v5  ;;  %v9353_v5 = vld [vmem:[#allocation2 + $0x404] ss:$72 sps:$4 sm:$0xff]  }
 0x438   :  { %5417 = vmatpush1.bf16.msra.mxu0 %v9264_v27  ;;  %v9348_v27 = vld [vmem:[#allocation2 + $0xd88] ss:$72 sps:$4 sm:$0xff]  }
 0x439   :  { %5418 = vmatprep.subr.bf16.mxu0 %v9272_v28  ;;  %v9356_v28 = vld [vmem:[#allocation2 + $0xd04] ss:$72 sps:$4 sm:$0xff]  }
 0x43a   :  { %5378 = vmatpush1.bf16.msra.mxu1 %v9267_v61  ;;  %v9351_v61 = vld [vmem:[#allocation2 + $0x400] ss:$72 sps:$4 sm:$0xff]  }
 0x43b   :  { %5379 = vmatprep.subr.bf16.mxu1 %v9275_v32  ;;  %v9359_v32 = vld [vmem:[#allocation2 + $0x374] ss:$72 sps:$4 sm:$0xff]  }
 0x43c   :  { %5419 = vmatpush1.bf16.msra.mxu0 %v9270_v22  ;;  %v9354_v22 = vld [vmem:[#allocation2 + $0xd00] ss:$72 sps:$4 sm:$0xff]  }
 0x43d   :  { %5420 = vmatprep.subr.bf16.mxu0 %v9278_v45  ;;  %v9362_v45 = vld [vmem:[#allocation2 + $0xc74] ss:$72 sps:$4 sm:$0xff]  }
 0x43e   :  { %5380 = vmatpush1.bf16.msra.mxu1 %v9273_v53  ;;  %v9357_v53 = vld [vmem:[#allocation2 + $0x370] ss:$72 sps:$4 sm:$0xff]  }
 0x43f   :  { %5381 = vmatprep.subr.bf16.mxu1 %v9281_v40  ;;  %v9365_v40 = vld [vmem:[#allocation2 + $0x2e4] ss:$72 sps:$4 sm:$0xff]  }
 0x440   :  { %5421 = vmatpush1.bf16.msra.mxu0 %v9276_v44  ;;  %v9360_v44 = vld [vmem:[#allocation2 + $0xc70] ss:$72 sps:$4 sm:$0xff]  }
 0x441   :  { %5422 = vmatprep.subr.bf16.mxu0 %v9284_v34  ;;  %v9368_v34 = vld [vmem:[#allocation2 + $0xbe4] ss:$72 sps:$4 sm:$0xff]  }
 0x442   :  { %5382 = vmatpush1.bf16.msra.mxu1 %v9279_v46  ;;  %v9363_v46 = vld [vmem:[#allocation2 + $0x2e0] ss:$72 sps:$4 sm:$0xff]  }
 0x443   :  { %5383 = vmatprep.subr.bf16.mxu1 %v9287_v57  ;;  %v9371_v57 = vld [vmem:[#allocation2 + $0x254] ss:$72 sps:$4 sm:$0xff]  }
 0x444   :  { %5423 = vmatpush1.bf16.msra.mxu0 %v9282_v47  ;;  %v9366_v47 = vld [vmem:[#allocation2 + $0xbe0] ss:$72 sps:$4 sm:$0xff]  }
 0x445   :  { %5424 = vmatprep.subr.bf16.mxu0 %v9290_v50  ;;  %v9374_v50 = vld [vmem:[#allocation2 + $0xb54] ss:$72 sps:$4 sm:$0xff]  }
 0x446   :  { %5384 = vmatpush1.bf16.msra.mxu1 %v9285_v51  ;;  %v9369_v51 = vld [vmem:[#allocation2 + $0x250] ss:$72 sps:$4 sm:$0xff]  }
 0x447   :  { %5385 = vmatprep.subr.bf16.mxu1 %v9293_v52  ;;  %v9377_v52 = vld [vmem:[#allocation2 + $0x1c4] ss:$72 sps:$4 sm:$0xff]  }
 0x448   :  { %5425 = vmatpush1.bf16.msra.mxu0 %v9288_v55  ;;  %v9372_v55 = vld [vmem:[#allocation2 + $0xb50] ss:$72 sps:$4 sm:$0xff]  }
 0x449   :  { %5426 = vmatprep.subr.bf16.mxu0 %v9296_v4  ;;  %v9380_v4 = vld [vmem:[#allocation2 + $0xac4] ss:$72 sps:$4 sm:$0xff]  }
 0x44a   :  { %5386 = vmatpush1.bf16.msra.mxu1 %v9291_v20  ;;  %v9375_v20 = vld [vmem:[#allocation2 + $0x1c0] ss:$72 sps:$4 sm:$0xff]  }
 0x44b   :  { %5387 = vmatprep.subr.bf16.mxu1 %v9299_v58  ;;  %v9383_v58 = vld [vmem:[#allocation2 + $0x134] ss:$72 sps:$4 sm:$0xff]  }
 0x44c   :  { %5427 = vmatpush1.bf16.msra.mxu0 %v9294_v35  ;;  %v9378_v35 = vld [vmem:[#allocation2 + $0xac0] ss:$72 sps:$4 sm:$0xff]  }
 0x44d   :  { %5428 = vmatprep.subr.bf16.mxu0 %v9302_v30  ;;  %v9386_v30 = vld [vmem:[#allocation2 + $0xa34] ss:$72 sps:$4 sm:$0xff]  }
 0x44e   :  { %5388 = vmatpush1.bf16.msra.mxu1 %v9297_v33  ;;  %v9381_v33 = vld [vmem:[#allocation2 + $0x130] ss:$72 sps:$4 sm:$0xff]  }
 0x44f   :  { %5389 = vmatprep.subr.bf16.mxu1 %v9305_v29  ;;  %v9389_v29 = vld [vmem:[#allocation2 + $0xa4] ss:$72 sps:$4 sm:$0xff]  }
 0x450   :  { %5429 = vmatpush1.bf16.msra.mxu0 %v9300_v37  ;;  %v9384_v37 = vld [vmem:[#allocation2 + $0xa30] ss:$72 sps:$4 sm:$0xff]  }
 0x451   :  { %5430 = vmatprep.subr.bf16.mxu0 %v9308_v56  ;;  %v9392_v56 = vld [vmem:[#allocation2 + $0x9a4] ss:$72 sps:$4 sm:$0xff]  }
 0x452   :  { %5390 = vmatpush2.bf16.msra.mxu1 %v9303_v36  ;;  %v9387_v36 = vld [vmem:[#allocation2 + $0xa0] ss:$72 sps:$4 sm:$0xff]  }
 0x453   :  { %5391 = vmatprep.subr.bf16.mxu1 %v9311_v43  ;;  %v9395_v43 = vld [vmem:[#allocation2 + $0x14] ss:$72 sps:$4 sm:$0xff]  }
 0x454   :  { %5431 = vmatpush2.bf16.msra.mxu0 %v9306_v63  ;;  %v9390_v63 = vld [vmem:[#allocation2 + $0x9a0] ss:$72 sps:$4 sm:$0xff]  }
 0x455   :  { %5432 = vmatprep.subr.bf16.mxu0 %v9314_v39  ;;  %v9398_v39 = vld [vmem:[#allocation2 + $0x914] ss:$72 sps:$4 sm:$0xff]  }
 0x456   :  { %5392 = vmatpush2.bf16.msra.mxu1 %v9309_v0  ;;  %v9393_v0 = vld [vmem:[#allocation2 + $0x10] ss:$72 sps:$4 sm:$0xff]  }
 0x457   :  { %5393 = vmatprep.subr.bf16.mxu1 %v9317_v1  ;;  %v9401_v1 = vld [vmem:[#allocation2 + $0x884] ss:$72 sps:$4 sm:$0xff]  }
 0x458   :  { %5433 = vmatpush2.bf16.msra.mxu0 %v9312_v49  ;;  %v9396_v49 = vld [vmem:[#allocation2 + $0x910] ss:$72 sps:$4 sm:$0xff]  }
 0x459   :  { %5434 = vmatprep.subr.bf16.mxu0 %v9320_v3  ;;  %v9404_v3 = vld [vmem:[#allocation2 + $0x1184] ss:$72 sps:$4 sm:$0xff]  }
 0x45a   :  { %5394 = vmatpush2.bf16.msra.mxu1 %v9315_v38  ;;  %v9399_v38 = vld [vmem:[#allocation2 + $0x880] ss:$72 sps:$4 sm:$0xff]  }
 0x45b   :  { %5395 = vmatprep.subr.bf16.mxu1 %v9323_v59  ;;  %v9407_v59 = vld [vmem:[#allocation2 + $0x7f4] ss:$72 sps:$4 sm:$0xff]  }
 0x45c   :  { %5435 = vmatpush2.bf16.msra.mxu0 %v9318_v19  ;;  %v9402_v19 = vld [vmem:[#allocation2 + $0x1180] ss:$72 sps:$4 sm:$0xff]  }
 0x45d   :  { %5436 = vmatprep.subr.bf16.mxu0 %v9326_v17  ;;  %v9410_v17 = vld [vmem:[#allocation2 + $0x10f4] ss:$72 sps:$4 sm:$0xff]  }
 0x45e   :  { %5396 = vmatpush2.bf16.msra.mxu1 %v9321_v24  ;;  %v9405_v24 = vld [vmem:[#allocation2 + $0x7f0] ss:$72 sps:$4 sm:$0xff]  }
 0x45f   :  { %5397 = vmatprep.subr.bf16.mxu1 %v9329_v7  ;;  %v9413_v7 = vld [vmem:[#allocation2 + $0x764] ss:$72 sps:$4 sm:$0xff]  }
 0x460   :  { %5437 = vmatpush2.bf16.msra.mxu0 %v9324_v9  ;;  %v9408_v9 = vld [vmem:[#allocation2 + $0x10f0] ss:$72 sps:$4 sm:$0xff]  }
 0x461   :  { %5438 = vmatprep.subr.bf16.mxu0 %v9332_v10  ;;  %v9416_v10 = vld [vmem:[#allocation2 + $0x1064] ss:$72 sps:$4 sm:$0xff]  }
 0x462   :  { %5398 = vmatpush2.bf16.msra.mxu1 %v9327_v41  ;;  %v9411_v41 = vld [vmem:[#allocation2 + $0x760] ss:$72 sps:$4 sm:$0xff]  }
 0x463   :  { %5399 = vmatprep.subr.bf16.mxu1 %v9335_v11  ;;  %v9419_v11 = vld [vmem:[#allocation2 + $0x6d4] ss:$72 sps:$4 sm:$0xff]  }
 0x464   :  { %5439 = vmatpush2.bf16.msra.mxu0 %v9330_v14  ;;  %v9414_v14 = vld [vmem:[#allocation2 + $0x1060] ss:$72 sps:$4 sm:$0xff]  }
 0x465   :  { %5440 = vmatprep.subr.bf16.mxu0 %v9338_v15  ;;  %v9422_v15 = vld [vmem:[#allocation2 + $0xfd4] ss:$72 sps:$4 sm:$0xff]  }
 0x466   :  { %5400 = vmatpush2.bf16.msra.mxu1 %v9333_v26  ;;  %v9417_v26 = vld [vmem:[#allocation2 + $0x6d0] ss:$72 sps:$4 sm:$0xff]  }
 0x467   :  { %5401 = vmatprep.subr.bf16.mxu1 %v9341_v16  ;;  %v9425_v16 = vld [vmem:[#allocation2 + $0x644] ss:$72 sps:$4 sm:$0xff]  }
 0x468   :  { %5441 = vmatpush2.bf16.msra.mxu0 %v9336_v62  ;;  %v9420_v62 = vld [vmem:[#allocation2 + $0xfd0] ss:$72 sps:$4 sm:$0xff]  }
 0x469   :  { %5442 = vmatprep.subr.bf16.mxu0 %v9344_v54  ;;  %v9428_v54 = vld [vmem:[#allocation2 + $0xf44] ss:$72 sps:$4 sm:$0xff]  }
 0x46a   :  { %5402 = vmatpush2.bf16.msra.mxu1 %v9339_v13  ;;  %v9423_v13 = vld [vmem:[#allocation2 + $0x640] ss:$72 sps:$4 sm:$0xff]  }
 0x46b   :  { %5403 = vmatprep.subr.bf16.mxu1 %v9347_v23  ;;  %v9431_v23 = vld [vmem:[#allocation2 + $0x5b4] ss:$72 sps:$4 sm:$0xff]  }
 0x46c   :  { %5443 = vmatpush2.bf16.msra.mxu0 %v9342_v25  ;;  %v9426_v25 = vld [vmem:[#allocation2 + $0xf40] ss:$72 sps:$4 sm:$0xff]  }
 0x46d   :  { %5444 = vmatprep.subr.bf16.mxu0 %v9350_v31  ;;  %v9434_v31 = vld [vmem:[#allocation2 + $0xeb4] ss:$72 sps:$4 sm:$0xff]  }
 0x46e   :  { %5404 = vmatpush2.bf16.msra.mxu1 %v9345_v48  ;;  %v9429_v48 = vld [vmem:[#allocation2 + $0x5b0] ss:$72 sps:$4 sm:$0xff]  }
 0x46f   :  { %5455 = vmatprep.subr.bf16.mxu1 %v9353_v5  ;;  %v9437_v5 = vld [vmem:[#allocation2 + $0x524] ss:$72 sps:$4 sm:$0xff]  }
 0x470   :  { %5445 = vmatpush2.bf16.msra.mxu0 %v9348_v27  ;;  %v9432_v27 = vld [vmem:[#allocation2 + $0xeb0] ss:$72 sps:$4 sm:$0xff]  }
 0x471   :  { %5406 = vmatmul.mubr.bf16.vlgmr.msra.gmra.mxu1 %v11020_v18  ;;  %5496 = vmatprep.subr.bf16.mxu0 %v9356_v28  ;;  %v9440_v28 = vld [vmem:[#allocation2 + $0xe24] ss:$72 sps:$4 sm:$0xff]  }
 0x472   :  { %5456 = vmatpush1.bf16.msra.mxu1 %v9351_v61  ;;  %5487 = vmatprep.mubr.bf16.mxu1 %v11007_v6  ;;  %v9435_v61 = vld [vmem:[#allocation2 + $0x520] ss:$72 sps:$4 sm:$0xff]  }
 0x473   :  { %5447 = vmatmul.mubr.bf16.vlgmr.msra.gmra.mxu0 %v11024_v21  ;;  %5457 = vmatprep.subr.bf16.mxu1 %v9359_v32  ;;  %v9443_v32 = vld [vmem:[#allocation2 + $0x494] ss:$72 sps:$4 sm:$0xff]  }
 0x474   :  { %5497 = vmatpush1.bf16.msra.mxu0 %v9354_v22  ;;  %5528 = vmatprep.mubr.bf16.mxu0 %v11009_v12  ;;  %v9438_v22 = vld [vmem:[#allocation2 + $0xe20] ss:$72 sps:$4 sm:$0xff]  }
 0x475   :  { %5498 = vmatprep.subr.bf16.mxu0 %v9362_v45  ;;  %v9446_v45 = vld [vmem:[#allocation2 + $0xd94] ss:$72 sps:$4 sm:$0xff]  }
 0x476   :  { %5458 = vmatpush1.bf16.msra.mxu1 %v9357_v53  ;;  %v9441_v53 = vld [vmem:[#allocation2 + $0x490] ss:$72 sps:$4 sm:$0xff]  }
 0x477   :  { %5459 = vmatprep.subr.bf16.mxu1 %v9365_v40  ;;  %v9449_v40 = vld [vmem:[#allocation2 + $0x40c] ss:$72 sps:$4 sm:$0xff]  }
 0x478   :  { %5499 = vmatpush1.bf16.msra.mxu0 %v9360_v44  ;;  %v9444_v44 = vld [vmem:[#allocation2 + $0xd90] ss:$72 sps:$4 sm:$0xff]  }
 0x479   :  { %5500 = vmatprep.subr.bf16.mxu0 %v9368_v34  ;;  %v9452_v34 = vld [vmem:[#allocation2 + $0xd0c] ss:$72 sps:$4 sm:$0xff]  }
 0x47a   :  { %5460 = vmatpush1.bf16.msra.mxu1 %v9363_v46  ;;  %v9447_v46 = vld [vmem:[#allocation2 + $0x408] ss:$72 sps:$4 sm:$0xff]  }
 0x47b   :  { %5461 = vmatprep.subr.bf16.mxu1 %v9371_v57  ;;  %v9455_v57 = vld [vmem:[#allocation2 + $0x37c] ss:$72 sps:$4 sm:$0xff]  }
 0x47c   :  { %5501 = vmatpush1.bf16.msra.mxu0 %v9366_v47  ;;  %v9450_v47 = vld [vmem:[#allocation2 + $0xd08] ss:$72 sps:$4 sm:$0xff]  }
 0x47d   :  { %5502 = vmatprep.subr.bf16.mxu0 %v9374_v50  ;;  %v9458_v50 = vld [vmem:[#allocation2 + $0xc7c] ss:$72 sps:$4 sm:$0xff]  }
 0x47e   :  { %5462 = vmatpush1.bf16.msra.mxu1 %v9369_v51  ;;  %v9453_v51 = vld [vmem:[#allocation2 + $0x378] ss:$72 sps:$4 sm:$0xff]  }
 0x47f   :  { %5463 = vmatprep.subr.bf16.mxu1 %v9377_v52  ;;  %v9461_v52 = vld [vmem:[#allocation2 + $0x2ec] ss:$72 sps:$4 sm:$0xff]  }
 0x480   :  { %5503 = vmatpush1.bf16.msra.mxu0 %v9372_v55  ;;  %v9456_v55 = vld [vmem:[#allocation2 + $0xc78] ss:$72 sps:$4 sm:$0xff]  }
 0x481   :  { %5504 = vmatprep.subr.bf16.mxu0 %v9380_v4  ;;  %v9464_v4 = vld [vmem:[#allocation2 + $0xbec] ss:$72 sps:$4 sm:$0xff]  }
 0x482   :  { %5464 = vmatpush1.bf16.msra.mxu1 %v9375_v20  ;;  %v9459_v20 = vld [vmem:[#allocation2 + $0x2e8] ss:$72 sps:$4 sm:$0xff]  }
 0x483   :  { %5465 = vmatprep.subr.bf16.mxu1 %v9383_v58  ;;  %v9467_v58 = vld [vmem:[#allocation2 + $0x25c] ss:$72 sps:$4 sm:$0xff]  }
 0x484   :  { %5505 = vmatpush1.bf16.msra.mxu0 %v9378_v35  ;;  %v9462_v35 = vld [vmem:[#allocation2 + $0xbe8] ss:$72 sps:$4 sm:$0xff]  }
 0x485   :  { %5506 = vmatprep.subr.bf16.mxu0 %v9386_v30  ;;  %v9470_v30 = vld [vmem:[#allocation2 + $0xb5c] ss:$72 sps:$4 sm:$0xff]  }
 0x486   :  { %5466 = vmatpush1.bf16.msra.mxu1 %v9381_v33  ;;  %v9465_v33 = vld [vmem:[#allocation2 + $0x258] ss:$72 sps:$4 sm:$0xff]  }
 0x487   :  { %5467 = vmatprep.subr.bf16.mxu1 %v9389_v29  ;;  %v9473_v29 = vld [vmem:[#allocation2 + $0x1cc] ss:$72 sps:$4 sm:$0xff]  }
 0x488   :  { %5507 = vmatpush1.bf16.msra.mxu0 %v9384_v37  ;;  %v9468_v37 = vld [vmem:[#allocation2 + $0xb58] ss:$72 sps:$4 sm:$0xff]  }
 0x489   :  { %5508 = vmatprep.subr.bf16.mxu0 %v9392_v56  ;;  %v9476_v56 = vld [vmem:[#allocation2 + $0xacc] ss:$72 sps:$4 sm:$0xff]  }
 0x48a   :  { %5468 = vmatpush1.bf16.msra.mxu1 %v9387_v36  ;;  %v9471_v36 = vld [vmem:[#allocation2 + $0x1c8] ss:$72 sps:$4 sm:$0xff]  }
 0x48b   :  { %5469 = vmatprep.subr.bf16.mxu1 %v9395_v43  ;;  %v9479_v43 = vld [vmem:[#allocation2 + $0x13c] ss:$72 sps:$4 sm:$0xff]  }
 0x48c   :  { %5509 = vmatpush1.bf16.msra.mxu0 %v9390_v63  ;;  %v9474_v63 = vld [vmem:[#allocation2 + $0xac8] ss:$72 sps:$4 sm:$0xff]  }
 0x48d   :  { %5510 = vmatprep.subr.bf16.mxu0 %v9398_v39  ;;  %v9482_v39 = vld [vmem:[#allocation2 + $0xa3c] ss:$72 sps:$4 sm:$0xff]  }
 0x48e   :  { %5470 = vmatpush1.bf16.msra.mxu1 %v9393_v0  ;;  %v9477_v0 = vld [vmem:[#allocation2 + $0x138] ss:$72 sps:$4 sm:$0xff]  }
 0x48f   :  { %5471 = vmatprep.subr.bf16.mxu1 %v9401_v1  ;;  %v9485_v1 = vld [vmem:[#allocation2 + $0xac] ss:$72 sps:$4 sm:$0xff]  }
 0x490   :  { %5511 = vmatpush1.bf16.msra.mxu0 %v9396_v49  ;;  %v9480_v49 = vld [vmem:[#allocation2 + $0xa38] ss:$72 sps:$4 sm:$0xff]  }
 0x491   :  { %5512 = vmatprep.subr.bf16.mxu0 %v9404_v3  ;;  %v9488_v3 = vld [vmem:[#allocation2 + $0x9ac] ss:$72 sps:$4 sm:$0xff]  }
 0x492   :  { %5472 = vmatpush2.bf16.msra.mxu1 %v9399_v38  ;;  %v9483_v38 = vld [vmem:[#allocation2 + $0xa8] ss:$72 sps:$4 sm:$0xff]  }
 0x493   :  { %5473 = vmatprep.subr.bf16.mxu1 %v9407_v59  ;;  %v9491_v59 = vld [vmem:[#allocation2 + $0x1c] ss:$72 sps:$4 sm:$0xff]  }
 0x494   :  { %5513 = vmatpush2.bf16.msra.mxu0 %v9402_v19  ;;  %v9486_v19 = vld [vmem:[#allocation2 + $0x9a8] ss:$72 sps:$4 sm:$0xff]  }
 0x495   :  { %5514 = vmatprep.subr.bf16.mxu0 %v9410_v17  ;;  %v9494_v17 = vld [vmem:[#allocation2 + $0x91c] ss:$72 sps:$4 sm:$0xff]  }
 0x496   :  { %5474 = vmatpush2.bf16.msra.mxu1 %v9405_v24  ;;  %v9489_v24 = vld [vmem:[#allocation2 + $0x18] ss:$72 sps:$4 sm:$0xff]  }
 0x497   :  { %5475 = vmatprep.subr.bf16.mxu1 %v9413_v7  ;;  %v9497_v7 = vld [vmem:[#allocation2 + $0x88c] ss:$72 sps:$4 sm:$0xff]  }
 0x498   :  { %5515 = vmatpush2.bf16.msra.mxu0 %v9408_v9  ;;  %v9492_v9 = vld [vmem:[#allocation2 + $0x918] ss:$72 sps:$4 sm:$0xff]  }
 0x499   :  { %5516 = vmatprep.subr.bf16.mxu0 %v9416_v10  ;;  %v9500_v10 = vld [vmem:[#allocation2 + $0x118c] ss:$72 sps:$4 sm:$0xff]  }
 0x49a   :  { %5476 = vmatpush2.bf16.msra.mxu1 %v9411_v41  ;;  %v9495_v41 = vld [vmem:[#allocation2 + $0x888] ss:$72 sps:$4 sm:$0xff]  }
 0x49b   :  { %5477 = vmatprep.subr.bf16.mxu1 %v9419_v11  ;;  %v9503_v11 = vld [vmem:[#allocation2 + $0x7fc] ss:$72 sps:$4 sm:$0xff]  }
 0x49c   :  { %5517 = vmatpush2.bf16.msra.mxu0 %v9414_v14  ;;  %v9498_v14 = vld [vmem:[#allocation2 + $0x1188] ss:$72 sps:$4 sm:$0xff]  }
 0x49d   :  { %5518 = vmatprep.subr.bf16.mxu0 %v9422_v15  ;;  %v9506_v15 = vld [vmem:[#allocation2 + $0x10fc] ss:$72 sps:$4 sm:$0xff]  }
 0x49e   :  { %5478 = vmatpush2.bf16.msra.mxu1 %v9417_v26  ;;  %v9501_v26 = vld [vmem:[#allocation2 + $0x7f8] ss:$72 sps:$4 sm:$0xff]  }
 0x49f   :  { %5479 = vmatprep.subr.bf16.mxu1 %v9425_v16  ;;  %v9509_v16 = vld [vmem:[#allocation2 + $0x76c] ss:$72 sps:$4 sm:$0xff]  }
 0x4a0   :  { %5519 = vmatpush2.bf16.msra.mxu0 %v9420_v62  ;;  %v9504_v62 = vld [vmem:[#allocation2 + $0x10f8] ss:$72 sps:$4 sm:$0xff]  }
 0x4a1   :  { %5520 = vmatprep.subr.bf16.mxu0 %v9428_v54  ;;  %v9512_v54 = vld [vmem:[#allocation2 + $0x106c] ss:$72 sps:$4 sm:$0xff]  }
 0x4a2   :  { %5480 = vmatpush2.bf16.msra.mxu1 %v9423_v13  ;;  %v9507_v13 = vld [vmem:[#allocation2 + $0x768] ss:$72 sps:$4 sm:$0xff]  }
 0x4a3   :  { %5481 = vmatprep.subr.bf16.mxu1 %v9431_v23  ;;  %v9515_v23 = vld [vmem:[#allocation2 + $0x6dc] ss:$72 sps:$4 sm:$0xff]  }
 0x4a4   :  { %5521 = vmatpush2.bf16.msra.mxu0 %v9426_v25  ;;  %v9510_v25 = vld [vmem:[#allocation2 + $0x1068] ss:$72 sps:$4 sm:$0xff]  }
 0x4a5   :  { %5522 = vmatprep.subr.bf16.mxu0 %v9434_v31  ;;  %v9518_v31 = vld [vmem:[#allocation2 + $0xfdc] ss:$72 sps:$4 sm:$0xff]  }
 0x4a6   :  { %5482 = vmatpush2.bf16.msra.mxu1 %v9429_v48  ;;  %v9513_v48 = vld [vmem:[#allocation2 + $0x6d8] ss:$72 sps:$4 sm:$0xff]  }
 0x4a7   :  { %5483 = vmatprep.subr.bf16.mxu1 %v9437_v5  ;;  %v9521_v5 = vld [vmem:[#allocation2 + $0x64c] ss:$72 sps:$4 sm:$0xff]  }
 0x4a8   :  { %5523 = vmatpush2.bf16.msra.mxu0 %v9432_v27  ;;  %v9516_v27 = vld [vmem:[#allocation2 + $0xfd8] ss:$72 sps:$4 sm:$0xff]  }
 0x4a9   :  { %5524 = vmatprep.subr.bf16.mxu0 %v9440_v28  ;;  %v9524_v28 = vld [vmem:[#allocation2 + $0xf4c] ss:$72 sps:$4 sm:$0xff]  }
 0x4aa   :  { %5484 = vmatpush2.bf16.msra.mxu1 %v9435_v61  ;;  %v9519_v61 = vld [vmem:[#allocation2 + $0x648] ss:$72 sps:$4 sm:$0xff]  }
 0x4ab   :  { %5485 = vmatprep.subr.bf16.mxu1 %v9443_v32  ;;  %v9527_v32 = vld [vmem:[#allocation2 + $0x5bc] ss:$72 sps:$4 sm:$0xff]  }
 0x4ac   :  { %5525 = vmatpush2.bf16.msra.mxu0 %v9438_v22  ;;  %v9522_v22 = vld [vmem:[#allocation2 + $0xf48] ss:$72 sps:$4 sm:$0xff]  }
 0x4ad   :  { %5526 = vmatprep.subr.bf16.mxu0 %v9446_v45  ;;  %v9530_v45 = vld [vmem:[#allocation2 + $0xebc] ss:$72 sps:$4 sm:$0xff]  }
 0x4ae   :  { %5486 = vmatpush2.bf16.msra.mxu1 %v9441_v53  ;;  %v9525_v53 = vld [vmem:[#allocation2 + $0x5b8] ss:$72 sps:$4 sm:$0xff]  }
 0x4af   :  { %5537 = vmatprep.subr.bf16.mxu1 %v9449_v40  ;;  %v9533_v40 = vld [vmem:[#allocation2 + $0x52c] ss:$72 sps:$4 sm:$0xff]  }
 0x4b0   :  { %5527 = vmatpush2.bf16.msra.mxu0 %v9444_v44  ;;  %v9528_v44 = vld [vmem:[#allocation2 + $0xeb8] ss:$72 sps:$4 sm:$0xff]  }
 0x4b1   :  { %5488 = vmatmul.mubr.bf16.vlgmr.msra.gmra.mxu1 %v11020_v18  ;;  %5578 = vmatprep.subr.bf16.mxu0 %v9452_v34  ;;  %v9536_v34 = vld [vmem:[#allocation2 + $0xe2c] ss:$72 sps:$4 sm:$0xff]  }
 0x4b2   :  { %5538 = vmatpush1.bf16.msra.mxu1 %v9447_v46  ;;  %5569 = vmatprep.mubr.bf16.mxu1 %v11007_v6  ;;  %v9531_v46 = vld [vmem:[#allocation2 + $0x528] ss:$72 sps:$4 sm:$0xff]  }
 0x4b3   :  { %5529 = vmatmul.mubr.bf16.vlgmr.msra.gmra.mxu0 %v11024_v21  ;;  %5539 = vmatprep.subr.bf16.mxu1 %v9455_v57  ;;  %v9539_v57 = vld [vmem:[#allocation2 + $0x49c] ss:$72 sps:$4 sm:$0xff]  }
 0x4b4   :  { %5579 = vmatpush1.bf16.msra.mxu0 %v9450_v47  ;;  %5610 = vmatprep.mubr.bf16.mxu0 %v11009_v12  ;;  %v9534_v47 = vld [vmem:[#allocation2 + $0xe28] ss:$72 sps:$4 sm:$0xff]  }
 0x4b5   :  { %5580 = vmatprep.subr.bf16.mxu0 %v9458_v50  ;;  %v9537_v50 = vld [vmem:[#allocation2 + $0x498] ss:$72 sps:$4 sm:$0xff]  }
 0x4b6   :  { %5540 = vmatpush1.bf16.msra.mxu1 %v9453_v51  ;;  %v9542_v51 = vld [vmem:[#allocation2 + $0xd9c] ss:$72 sps:$4 sm:$0xff]  }
 0x4b7   :  { %5541 = vmatprep.subr.bf16.mxu1 %v9461_v52  ;;  %v11038_v52 = vld [vmem:[#allocation14] sm:$0xff] }
 0x4b8   :  { %5581 = vmatpush1.bf16.msra.mxu0 %v9456_v55  ;;  %v11041_v55 = vsub.s32 0, %v10989_v2 }
 0x4b9   :  { %5582 = vmatprep.subr.bf16.mxu0 %v9464_v4  ;;  %v9545_v4 = vld [vmem:[#allocation2 + $0x414] ss:$72 sps:$4 sm:$0xff]  }
 0x4ba   :  { %5542 = vmatpush1.bf16.msra.mxu1 %v9459_v20  ;;  %v9540_v20 = vld [vmem:[#allocation2 + $0xd98] ss:$72 sps:$4 sm:$0xff]  }
 0x4bb   :  { %5543 = vmatprep.subr.bf16.mxu1 %v9467_v58  ;;  %v11044_v58 = vsub.s32 1, %v10989_v2 }
 0x4bc   :  { %5583 = vmatpush1.bf16.msra.mxu0 %v9462_v35  ;;  %v9548_v35 = vld [vmem:[#allocation2 + $0xd14] ss:$72 sps:$4 sm:$0xff]  }
 0x4bd   :  { %5584 = vmatprep.subr.bf16.mxu0 %v9470_v30  ;;  %v2324_v30 = vrot.slane %v11038_v52, %v11041_v55 }
 0x4be   :  { %5544 = vmatpush1.bf16.msra.mxu1 %v9465_v33  ;;  %v9543_v33 = vld [vmem:[#allocation2 + $0x410] ss:$72 sps:$4 sm:$0xff]  }
 0x4bf   :  { %5545 = vmatprep.subr.bf16.mxu1 %v9473_v29  ;;  %v9551_v29 = vld [vmem:[#allocation2 + $0x384] ss:$72 sps:$4 sm:$0xff]  }
 0x4c0   :  { %5585 = vmatpush1.bf16.msra.mxu0 %v9468_v37  ;;  %v2328_v37 = vrot.slane %v11038_v52, %v11044_v58 }
 0x4c1   :  { %5586 = vmatprep.subr.bf16.mxu0 %v9476_v56  ;;  %v9546_v56 = vld [vmem:[#allocation2 + $0xd10] ss:$72 sps:$4 sm:$0xff]  }
 0x4c2   :  { %5546 = vmatpush1.bf16.msra.mxu1 %v9471_v36 }
 0x4c3   :  { %5547 = vmatprep.subr.bf16.mxu1 %v9479_v43  ;;  %v9554_v43 = vld [vmem:[#allocation2 + $0xc84] ss:$72 sps:$4 sm:$0xff]  }
 0x4c4   :  { %5587 = vmatpush1.bf16.msra.mxu0 %v9474_v63 }
 0x4c5   :  { %5588 = vmatprep.subr.bf16.mxu0 %v9482_v39  ;;  %v9549_v39 = vld [vmem:[#allocation2 + $0x380] ss:$72 sps:$4 sm:$0xff]  }
 0x4c6   :  { %5548 = vmatpush1.bf16.msra.mxu1 %v9477_v0 }
 0x4c7   :  { %5549 = vmatprep.subr.bf16.mxu1 %v9485_v1 }
 0x4c8   :  { %5589 = vmatpush1.bf16.msra.mxu0 %v9480_v49  ;;  %v9557_v49 = vld [vmem:[#allocation2 + $0x2f4] ss:$72 sps:$4 sm:$0xff]  }
 0x4c9   :  { %5590 = vmatprep.subr.bf16.mxu0 %v9488_v3 }
 0x4ca   :  { %5550 = vmatpush1.bf16.msra.mxu1 %v9483_v38 }
 0x4cb   :  { %5551 = vmatprep.subr.bf16.mxu1 %v9491_v59  ;;  %v9552_v59 = vld [vmem:[#allocation2 + $0xc80] ss:$72 sps:$4 sm:$0xff]  }
 0x4cc   :  { %5591 = vmatpush1.bf16.msra.mxu0 %v9486_v19 }
 0x4cd   :  { %5592 = vmatprep.subr.bf16.mxu0 %v9494_v17 }
 0x4ce   :  { %5552 = vmatpush1.bf16.msra.mxu1 %v9489_v24  ;;  %v9560_v24 = vld [vmem:[#allocation2 + $0xbf4] ss:$72 sps:$4 sm:$0xff]  }
 0x4cf   :  { %5553 = vmatprep.subr.bf16.mxu1 %v9497_v7 }
 0x4d0   :  { %5593 = vmatpush1.bf16.msra.mxu0 %v9492_v9  ;;  %v9555_v9 = vld [vmem:[#allocation2 + $0x2f0] ss:$72 sps:$4 sm:$0xff]  }
 0x4d1   :  { %5594 = vmatprep.subr.bf16.mxu0 %v9500_v10 }
 0x4d2   :  { %5554 = vmatpush2.bf16.msra.mxu1 %v9495_v41  ;;  %v9563_v41 = vld [vmem:[#allocation2 + $0x264] ss:$72 sps:$4 sm:$0xff]  }
 0x4d3   :  { %5555 = vmatprep.subr.bf16.mxu1 %v9503_v11 }
 0x4d4   :  { %5595 = vmatpush2.bf16.msra.mxu0 %v9498_v14 }
 0x4d5   :  { %5596 = vmatprep.subr.bf16.mxu0 %v9506_v15  ;;  %v9558_v15 = vld [vmem:[#allocation2 + $0xbf0] ss:$72 sps:$4 sm:$0xff]  }
 0x4d6   :  { %5556 = vmatpush2.bf16.msra.mxu1 %v9501_v26  ;;  %v9566_v26 = vld [vmem:[#allocation2 + $0xb64] ss:$72 sps:$4 sm:$0xff]  }
 0x4d7   :  { %5557 = vmatprep.subr.bf16.mxu1 %v9509_v16 }
 0x4d8   :  { %5597 = vmatpush2.bf16.msra.mxu0 %v9504_v62  ;;  %v9561_v62 = vld [vmem:[#allocation2 + $0x260] ss:$72 sps:$4 sm:$0xff]  }
 0x4d9   :  { %5598 = vmatprep.subr.bf16.mxu0 %v9512_v54  ;;  %v9569_v54 = vld [vmem:[#allocation2 + $0x1d4] ss:$72 sps:$4 sm:$0xff]  }
 0x4da   :  { %5558 = vmatpush2.bf16.msra.mxu1 %v9507_v13  ;;  %v9564_v13 = vld [vmem:[#allocation2 + $0xb60] ss:$72 sps:$4 sm:$0xff]  }
 0x4db   :  { %5559 = vmatprep.subr.bf16.mxu1 %v9515_v23  ;;  %v9572_v23 = vld [vmem:[#allocation2 + $0xad4] ss:$72 sps:$4 sm:$0xff]  }
 0x4dc   :  { %5599 = vmatpush2.bf16.msra.mxu0 %v9510_v25  ;;  %v9567_v25 = vld [vmem:[#allocation2 + $0x1d0] ss:$72 sps:$4 sm:$0xff]  }
 0x4dd   :  { %5600 = vmatprep.subr.bf16.mxu0 %v9518_v31  ;;  %v9575_v31 = vld [vmem:[#allocation2 + $0x144] ss:$72 sps:$4 sm:$0xff]  }
 0x4de   :  { %5560 = vmatpush2.bf16.msra.mxu1 %v9513_v48  ;;  %v9570_v48 = vld [vmem:[#allocation2 + $0xad0] ss:$72 sps:$4 sm:$0xff]  }
 0x4df   :  { %5561 = vmatprep.subr.bf16.mxu1 %v9521_v5  ;;  %v9578_v5 = vld [vmem:[#allocation2 + $0xa44] ss:$72 sps:$4 sm:$0xff]  }
 0x4e0   :  { %5601 = vmatpush2.bf16.msra.mxu0 %v9516_v27  ;;  %v9573_v27 = vld [vmem:[#allocation2 + $0x140] ss:$72 sps:$4 sm:$0xff]  }
 0x4e1   :  { %5602 = vmatprep.subr.bf16.mxu0 %v9524_v28  ;;  %v9581_v28 = vld [vmem:[#allocation2 + $0xb4] ss:$72 sps:$4 sm:$0xff]  }
 0x4e2   :  { %5562 = vmatpush2.bf16.msra.mxu1 %v9519_v61  ;;  %v9576_v61 = vld [vmem:[#allocation2 + $0xa40] ss:$72 sps:$4 sm:$0xff]  }
 0x4e3   :  { %5563 = vmatprep.subr.bf16.mxu1 %v9527_v32  ;;  %v9584_v32 = vld [vmem:[#allocation2 + $0x9b4] ss:$72 sps:$4 sm:$0xff]  }
 0x4e4   :  { %5603 = vmatpush2.bf16.msra.mxu0 %v9522_v22  ;;  %v9579_v22 = vld [vmem:[#allocation2 + $0xb0] ss:$72 sps:$4 sm:$0xff]  }
 0x4e5   :  { %5604 = vmatprep.subr.bf16.mxu0 %v9530_v45  ;;  %v9587_v45 = vld [vmem:[#allocation2 + $0x24] ss:$72 sps:$4 sm:$0xff]  }
 0x4e6   :  { %5564 = vmatpush2.bf16.msra.mxu1 %v9525_v53  ;;  %v9582_v53 = vld [vmem:[#allocation2 + $0x9b0] ss:$72 sps:$4 sm:$0xff]  }
 0x4e7   :  { %5565 = vmatprep.subr.bf16.mxu1 %v9533_v40  ;;  %v9590_v40 = vld [vmem:[#allocation2 + $0x924] ss:$72 sps:$4 sm:$0xff]  }
 0x4e8   :  { %5605 = vmatpush2.bf16.msra.mxu0 %v9528_v44  ;;  %v9585_v44 = vld [vmem:[#allocation2 + $0x20] ss:$72 sps:$4 sm:$0xff]  }
 0x4e9   :  { %5606 = vmatprep.subr.bf16.mxu0 %v9536_v34  ;;  %v9593_v34 = vld [vmem:[#allocation2 + $0x894] ss:$72 sps:$4 sm:$0xff]  }
 0x4ea   :  { %5566 = vmatpush2.bf16.msra.mxu1 %v9531_v46  ;;  %v9588_v46 = vld [vmem:[#allocation2 + $0x920] ss:$72 sps:$4 sm:$0xff]  }
 0x4eb   :  { %5567 = vmatprep.subr.bf16.mxu1 %v9539_v57  ;;  %v9596_v57 = vld [vmem:[#allocation2 + $0x1194] ss:$72 sps:$4 sm:$0xff]  }
 0x4ec   :  { %5607 = vmatpush2.bf16.msra.mxu0 %v9534_v47  ;;  %v9591_v47 = vld [vmem:[#allocation2 + $0x890] ss:$72 sps:$4 sm:$0xff]  }
 0x4ed   :  { %5608 = vmatprep.subr.bf16.mxu0 %v9542_v51  ;;  %v9594_v51 = vld [vmem:[#allocation2 + $0x1190] ss:$72 sps:$4 sm:$0xff]  }
 0x4ee   :  { %5568 = vmatpush2.bf16.msra.mxu1 %v9537_v50  ;;  %v9599_v50 = vld [vmem:[#allocation2 + $0x804] ss:$72 sps:$4 sm:$0xff]  }
 0x4ef   :  { %5619 = vmatprep.subr.bf16.mxu1 %v9545_v4  ;;  %v9602_v4 = vld [vmem:[#allocation2 + $0x1104] ss:$72 sps:$4 sm:$0xff]  }
 0x4f0   :  { %5609 = vmatpush2.bf16.msra.mxu0 %v9540_v20  ;;  %v9597_v20 = vld [vmem:[#allocation2 + $0x800] ss:$72 sps:$4 sm:$0xff]  }
 0x4f1   :  { %v5325_v36 = vpop.f32.mrf.mxu1  ;;  %5570 = vmatmul.mubr.bf16.vlgmr.msra.gmra.mxu1 %v11020_v18  ;;  %5660 = vmatprep.subr.bf16.mxu0 %v9548_v35  ;;  %v9605_v35 = vld [vmem:[#allocation2 + $0x774] ss:$72 sps:$4 sm:$0xff]  }
 0x4f2   :  { %v5326_v63 = vadd.f32 %v5325_v36, %v2324_v30  ;;  %5620 = vmatpush1.bf16.msra.mxu1 %v9543_v33  ;;  %5651 = vmatprep.mubr.bf16.mxu1 %v11007_v6  ;;  %v9600_v30 = vld [vmem:[#allocation2 + $0x1100] ss:$72 sps:$4 sm:$0xff]   ;;  %v9608_v33 = vld [vmem:[#allocation2 + $0x1074] ss:$72 sps:$4 sm:$0xff]   ;;  %v9614_v36 = vld [vmem:[#allocation2 + $0xfe4] ss:$72 sps:$4 sm:$0xff]  }
 0x4f3   :  { %v5327_v0 = vpop.f32.mrf.mxu1  ;;  %v5366_v1 = vpop.f32.mrf.mxu0  ;;  %5611 = vmatmul.mubr.bf16.vlgmr.msra.gmra.mxu0 %v11024_v21  ;;  %5621 = vmatprep.subr.bf16.mxu1 %v9551_v29  ;;  %v9603_v29 = vld [vmem:[#allocation2 + $0x770] ss:$72 sps:$4 sm:$0xff]  }
 0x4f4   :  { %v5328_v3 = vadd.f32 %v5327_v0, %v2328_v37  ;;  %v11053_v38 = vadd.f32 %v5366_v1, %v5326_v63  ;;  %5661 = vmatpush1.bf16.msra.mxu0 %v9546_v56  ;;  %5692 = vmatprep.mubr.bf16.mxu0 %v11009_v12  ;;  %v9611_v37 = vld [vmem:[#allocation2 + $0x6e4] ss:$72 sps:$4 sm:$0xff]   ;;  %v9606_v56 = vld [vmem:[#allocation2 + $0x1070] ss:$72 sps:$4 sm:$0xff]   ;;  %v9617_v63 = vld [vmem:[#allocation2 + $0x654] ss:$72 sps:$4 sm:$0xff]  }
 0x4f5   :  { %v5329_v19 = vpop.f32.mrf.mxu1  ;;  %v5368_v17 = vpop.f32.mrf.mxu0  ;;  %5662 = vmatprep.subr.bf16.mxu0 %v9554_v43  ;;  %v9609_v43 = vld [vmem:[#allocation2 + $0x6e0] ss:$72 sps:$4 sm:$0xff]   ;;  %v9620_v0 = vld [vmem:[#allocation2 + $0xf54] ss:$72 sps:$4 sm:$0xff]   ;;  %v9615_v1 = vld [vmem:[#allocation2 + $0x650] ss:$72 sps:$4 sm:$0xff]  }
 0x4f6   :  { %v11056_v7 = vadd.f32 %v5368_v17, %v5328_v3  ;;  %5622 = vmatpush1.bf16.msra.mxu1 %v9549_v39  ;;  %v9612_v39 = vld [vmem:[#allocation2 + $0xfe0] ss:$72 sps:$4 sm:$0xff]   ;;  %v9618_v3 = vld [vmem:[#allocation2 + $0xf50] ss:$72 sps:$4 sm:$0xff]   ;;  %v9629_v17 = vld [vmem:[#allocation2 + $0x534] ss:$72 sps:$4 sm:$0xff]  }
 0x4f7   :  { %v5330_v10 = vpop.f32.mrf.mxu1  ;;  %5623 = vmatprep.subr.bf16.mxu1 %v9557_v49  ;;  %v5370_v11 = vpop.f32.mrf.mxu0  ;;  %v9623_v49 = vld [vmem:[#allocation2 + $0x5c4] ss:$72 sps:$4 sm:$0xff]   ;;  %v9621_v19 = vld [vmem:[#allocation2 + $0x5c0] ss:$72 sps:$4 sm:$0xff]  }
 0x4f8   :  { %v6047_v14 = vcombine.low %v11053_v38, %v11056_v7  ;;  %5663 = vmatpush1.bf16.msra.mxu0 %v9552_v59  ;;  %v9626_v59 = vld [vmem:[#allocation2 + $0xec4] ss:$72 sps:$4 sm:$0xff]   ;;  %v9627_v10 = vld [vmem:[#allocation2 + $0x530] ss:$72 sps:$4 sm:$0xff]  }
 0x4f9   :  { %5664 = vmatprep.subr.bf16.mxu0 %v9560_v24  ;;  %v5371_v16 = vpop.f32.mrf.mxu0  ;;  %v9624_v24 = vld [vmem:[#allocation2 + $0xec0] ss:$72 sps:$4 sm:$0xff]   ;;  %v9630_v11 = vld [vmem:[#allocation2 + $0xe30] ss:$72 sps:$4 sm:$0xff]   ;;  %v9674_v38 = vld [vmem:[#allocation2 + $0xa4c] ss:$72 sps:$4 sm:$0xff]  }
 0x4fa   :  { %5624 = vmatpush1.bf16.msra.mxu1 %v9555_v9  ;;  %v9632_v9 = vld [vmem:[#allocation2 + $0xe34] ss:$72 sps:$4 sm:$0xff]   ;;  %v2331_v16 = vsub.s32 2, %v10989_v2  ;;  %v9669_v7 = vld [vmem:[#allocation2 + $0x148] ss:$72 sps:$4 sm:$0xff]  }
 0x4fb   :  { %5625 = vmatprep.subr.bf16.mxu1 %v9563_v41  ;;  %v9635_v41 = vld [vmem:[#allocation2 + $0x4a4] ss:$72 sps:$4 sm:$0xff]  }
 0x4fc   :  { %5665 = vmatpush1.bf16.msra.mxu0 %v9558_v15  ;;  %v9638_v15 = vld [vmem:[#allocation2 + $0xda4] ss:$72 sps:$4 sm:$0xff]  }
 0x4fd   :  { %5666 = vmatprep.subr.bf16.mxu0 %v9566_v26  ;;  %v9633_v26 = vld [vmem:[#allocation2 + $0x4a0] ss:$72 sps:$4 sm:$0xff]  }
 0x4fe   :  { %5626 = vmatpush1.bf16.msra.mxu1 %v9561_v62  ;;  %v9641_v62 = vld [vmem:[#allocation2 + $0x41c] ss:$72 sps:$4 sm:$0xff]  }
 0x4ff   :  { %5627 = vmatprep.subr.bf16.mxu1 %v9569_v54  ;;  %v9636_v54 = vld [vmem:[#allocation2 + $0xda0] ss:$72 sps:$4 sm:$0xff]  }
 0x500   :  { %5667 = vmatpush1.bf16.msra.mxu0 %v9564_v13  ;;  %v2335_v13 = vsub.s32 3, %v10989_v2 }
 0x501   :  { %5668 = vmatprep.subr.bf16.mxu0 %v9572_v23  ;;  %v9644_v23 = vld [vmem:[#allocation2 + $0xd1c] ss:$72 sps:$4 sm:$0xff]  }
 0x502   :  { %5628 = vmatpush1.bf16.msra.mxu1 %v9567_v25  ;;  %v2332_v25 = vrot.slane %v11038_v52, %v2331_v16 }
 0x503   :  { %5629 = vmatprep.subr.bf16.mxu1 %v9575_v31  ;;  %v9639_v31 = vld [vmem:[#allocation2 + $0x418] ss:$72 sps:$4 sm:$0xff]  }
 0x504   :  { %5669 = vmatpush1.bf16.msra.mxu0 %v9570_v48  ;;  %v9647_v48 = vld [vmem:[#allocation2 + $0x38c] ss:$72 sps:$4 sm:$0xff]  }
 0x505   :  { %5670 = vmatprep.subr.bf16.mxu0 %v9578_v5  ;;  %v2336_v5 = vrot.slane %v11038_v52, %v2335_v13  ;;  %v9648_v52 = vld [vmem:[#allocation2 + $0xc88] ss:$72 sps:$4 sm:$0xff]  }
 0x506   :  { %5630 = vmatpush1.bf16.msra.mxu1 %v9573_v27  ;;  %v9642_v27 = vld [vmem:[#allocation2 + $0xd18] ss:$72 sps:$4 sm:$0xff]  }
 0x507   :  { %5631 = vmatprep.subr.bf16.mxu1 %v9581_v28 }
 0x508   :  { %5671 = vmatpush1.bf16.msra.mxu0 %v9576_v61  ;;  %v9650_v61 = vld [vmem:[#allocation2 + $0xc8c] ss:$72 sps:$4 sm:$0xff]  }
 0x509   :  { %5672 = vmatprep.subr.bf16.mxu0 %v9584_v32 }
 0x50a   :  { %5632 = vmatpush1.bf16.msra.mxu1 %v9579_v22  ;;  %v9645_v22 = vld [vmem:[#allocation2 + $0x388] ss:$72 sps:$4 sm:$0xff]  }
 0x50b   :  { %5633 = vmatprep.subr.bf16.mxu1 %v9587_v45 }
 0x50c   :  { %5673 = vmatpush1.bf16.msra.mxu0 %v9582_v53 }
 0x50d   :  { %5674 = vmatprep.subr.bf16.mxu0 %v9590_v40  ;;  %v9653_v40 = vld [vmem:[#allocation2 + $0x2fc] ss:$72 sps:$4 sm:$0xff]  }
 0x50e   :  { %5634 = vmatpush1.bf16.msra.mxu1 %v9585_v44 }
 0x50f   :  { %5635 = vmatprep.subr.bf16.mxu1 %v9593_v34 }
 0x510   :  { %5675 = vmatpush1.bf16.msra.mxu0 %v9588_v46 }
 0x511   :  { %5676 = vmatprep.subr.bf16.mxu0 %v9596_v57 }
 0x512   :  { %5636 = vmatpush2.bf16.msra.mxu1 %v9591_v47  ;;  %v9656_v47 = vld [vmem:[#allocation2 + $0xbfc] ss:$72 sps:$4 sm:$0xff]  }
 0x513   :  { %5637 = vmatprep.subr.bf16.mxu1 %v9599_v50 }
 0x514   :  { %5677 = vmatpush2.bf16.msra.mxu0 %v9594_v51  ;;  %v9651_v51 = vld [vmem:[#allocation2 + $0x2f8] ss:$72 sps:$4 sm:$0xff]  }
 0x515   :  { %5678 = vmatprep.subr.bf16.mxu0 %v9602_v4 }
 0x516   :  { %5638 = vmatpush2.bf16.msra.mxu1 %v9597_v20  ;;  %v9659_v20 = vld [vmem:[#allocation2 + $0x26c] ss:$72 sps:$4 sm:$0xff]  }
 0x517   :  { %5639 = vmatprep.subr.bf16.mxu1 %v9605_v35 }
 0x518   :  { %5679 = vmatpush2.bf16.msra.mxu0 %v9600_v30 }
 0x519   :  { %5680 = vmatprep.subr.bf16.mxu0 %v9608_v33  ;;  %v9654_v33 = vld [vmem:[#allocation2 + $0xbf8] ss:$72 sps:$4 sm:$0xff]  }
 0x51a   :  { %5640 = vmatpush2.bf16.msra.mxu1 %v9603_v29  ;;  %v9662_v29 = vld [vmem:[#allocation2 + $0xb6c] ss:$72 sps:$4 sm:$0xff]  }
 0x51b   :  { %5641 = vmatprep.subr.bf16.mxu1 %v9611_v37 }
 0x51c   :  { %5681 = vmatpush2.bf16.msra.mxu0 %v9606_v56  ;;  %v6055_v56 = vrot.slane %v6047_v14, %v10994_v60  ;;  %v9677_v14 = vld [vmem:[#allocation2 + $0xbc] ss:$72 sps:$4 sm:$0xff]  }
 0x51d   :  { %5682 = vmatprep.subr.bf16.mxu0 %v9614_v36 }
 0x51e   :  { %5642 = vmatpush2.bf16.msra.mxu1 %v9609_v43  ;;  %v9657_v43 = vld [vmem:[#allocation2 + $0x268] ss:$72 sps:$4 sm:$0xff]  }
 0x51f   :  { %5643 = vmatprep.subr.bf16.mxu1 %v9617_v63  ;;  %v9665_v63 = vld [vmem:[#allocation2 + $0x1dc] ss:$72 sps:$4 sm:$0xff]  }
 0x520   :  { %5683 = vmatpush2.bf16.msra.mxu0 %v9612_v39 }
 0x521   :  { %5684 = vmatprep.subr.bf16.mxu0 %v9620_v0  ;;  %v9660_v0 = vld [vmem:[#allocation2 + $0xb68] ss:$72 sps:$4 sm:$0xff]  }
 0x522   :  { %5644 = vmatpush2.bf16.msra.mxu1 %v9615_v1  ;;  %v9668_v1 = vld [vmem:[#allocation2 + $0xadc] ss:$72 sps:$4 sm:$0xff]  }
 0x523   :  { %5645 = vmatprep.subr.bf16.mxu1 %v9623_v49  ;;  %v9663_v49 = vld [vmem:[#allocation2 + $0x1d8] ss:$72 sps:$4 sm:$0xff]  }
 0x524   :  { %5685 = vmatpush2.bf16.msra.mxu0 %v9618_v3  ;;  %v9671_v3 = vld [vmem:[#allocation2 + $0x14c] ss:$72 sps:$4 sm:$0xff]  }
 0x525   :  { %5686 = vmatprep.subr.bf16.mxu0 %v9626_v59  ;;  %v9666_v59 = vld [vmem:[#allocation2 + $0xad8] ss:$72 sps:$4 sm:$0xff]  }
 0x526   :  { %5646 = vmatpush2.bf16.msra.mxu1 %v9621_v19  ;;  %v9672_v19 = vld [vmem:[#allocation2 + $0xa48] ss:$72 sps:$4 sm:$0xff]  }
 0x527   :  { %5647 = vmatprep.subr.bf16.mxu1 %v9629_v17 }
 0x528   :  { %5687 = vmatpush2.bf16.msra.mxu0 %v9624_v24  ;;  %v9680_v24 = vld [vmem:[#allocation2 + $0x9bc] ss:$72 sps:$4 sm:$0xff]  }
 0x529   :  { %5688 = vmatprep.subr.bf16.mxu0 %v9632_v9  ;;  %v9675_v9 = vld [vmem:[#allocation2 + $0xb8] ss:$72 sps:$4 sm:$0xff]  }
 0x52a   :  { %5648 = vmatpush2.bf16.msra.mxu1 %v9627_v10  ;;  %v9683_v10 = vld [vmem:[#allocation2 + $0x2c] ss:$72 sps:$4 sm:$0xff]  }
 0x52b   :  { %5649 = vmatprep.subr.bf16.mxu1 %v9635_v41  ;;  %v9678_v41 = vld [vmem:[#allocation2 + $0x9b8] ss:$72 sps:$4 sm:$0xff]  }
 0x52c   :  { %5689 = vmatpush2.bf16.msra.mxu0 %v9630_v11  ;;  %v9686_v11 = vld [vmem:[#allocation2 + $0x92c] ss:$72 sps:$4 sm:$0xff]  }
 0x52d   :  { %5690 = vmatprep.subr.bf16.mxu0 %v9638_v15  ;;  %v9681_v15 = vld [vmem:[#allocation2 + $0x28] ss:$72 sps:$4 sm:$0xff]  }
 0x52e   :  { %5650 = vmatpush2.bf16.msra.mxu1 %v9633_v26  ;;  %v9689_v26 = vld [vmem:[#allocation2 + $0x89c] ss:$72 sps:$4 sm:$0xff]  }
 0x52f   :  { %5701 = vmatprep.subr.bf16.mxu1 %v9641_v62  ;;  %v9684_v62 = vld [vmem:[#allocation2 + $0x928] ss:$72 sps:$4 sm:$0xff]  }
 0x530   :  { %5691 = vmatpush2.bf16.msra.mxu0 %v9636_v54  ;;  %v9692_v54 = vld [vmem:[#allocation2 + $0x119c] ss:$72 sps:$4 sm:$0xff]  }
 0x531   :  { %v5407_v28 = vpop.f32.mrf.mxu1  ;;  %5652 = vmatmul.mubr.bf16.vlgmr.msra.gmra.mxu1 %v11020_v18  ;;  %5742 = vmatprep.subr.bf16.mxu0 %v9644_v23  ;;  %v9687_v23 = vld [vmem:[#allocation2 + $0x898] ss:$72 sps:$4 sm:$0xff]  }
 0x532   :  { %v5408_v32 = vadd.f32 %v5407_v28, %v2332_v25  ;;  %5702 = vmatpush1.bf16.msra.mxu1 %v9639_v31  ;;  %5733 = vmatprep.mubr.bf16.mxu1 %v11007_v6  ;;  %v9695_v25 = vld [vmem:[#allocation2 + $0x80c] ss:$72 sps:$4 sm:$0xff]   ;;  %v9690_v31 = vld [vmem:[#allocation2 + $0x1198] ss:$72 sps:$4 sm:$0xff]   ;;  %v9696_v28 = vld [vmem:[#allocation2 + $0x1108] ss:$72 sps:$4 sm:$0xff]  }
 0x533   :  { %v5409_v45 = vpop.f32.mrf.mxu1  ;;  %v5448_v53 = vpop.f32.mrf.mxu0  ;;  %5693 = vmatmul.mubr.bf16.vlgmr.msra.gmra.mxu0 %v11024_v21  ;;  %5703 = vmatprep.subr.bf16.mxu1 %v9647_v48  ;;  %v9698_v48 = vld [vmem:[#allocation2 + $0x110c] ss:$72 sps:$4 sm:$0xff]  }
 0x534   :  { %v5410_v44 = vadd.f32 %v5409_v45, %v2336_v5  ;;  %v5449_v34 = vadd.f32 %v5448_v53, %v5408_v32  ;;  %5743 = vmatpush1.bf16.msra.mxu0 %v9642_v27  ;;  %5774 = vmatprep.mubr.bf16.mxu0 %v11009_v12  ;;  %v9693_v5 = vld [vmem:[#allocation2 + $0x808] ss:$72 sps:$4 sm:$0xff]   ;;  %v9701_v27 = vld [vmem:[#allocation2 + $0x77c] ss:$72 sps:$4 sm:$0xff]   ;;  %v9699_v32 = vld [vmem:[#allocation2 + $0x778] ss:$72 sps:$4 sm:$0xff]  }
 0x535   :  { %v5411_v46 = vpop.f32.mrf.mxu1  ;;  %v5450_v57 = vpop.f32.mrf.mxu0  ;;  %5744 = vmatprep.subr.bf16.mxu0 %v9650_v61  ;;  %v9704_v61 = vld [vmem:[#allocation2 + $0x107c] ss:$72 sps:$4 sm:$0xff]   ;;  %v9702_v45 = vld [vmem:[#allocation2 + $0x1078] ss:$72 sps:$4 sm:$0xff]   ;;  %v9710_v53 = vld [vmem:[#allocation2 + $0xfec] ss:$72 sps:$4 sm:$0xff]  }
 0x536   :  { %v5451_v50 = vadd.f32 %v5450_v57, %v5410_v44  ;;  %5704 = vmatpush1.bf16.msra.mxu1 %v9645_v22  ;;  %v9707_v22 = vld [vmem:[#allocation2 + $0x6ec] ss:$72 sps:$4 sm:$0xff]   ;;  %v9713_v44 = vld [vmem:[#allocation2 + $0x65c] ss:$72 sps:$4 sm:$0xff]   ;;  %v9714_v57 = vld [vmem:[#allocation2 + $0xf58] ss:$72 sps:$4 sm:$0xff]  }
 0x537   :  { %v5412_v4 = vpop.f32.mrf.mxu1  ;;  %5705 = vmatprep.subr.bf16.mxu1 %v9653_v40  ;;  %v5452_v35 = vpop.f32.mrf.mxu0  ;;  %v9705_v40 = vld [vmem:[#allocation2 + $0x6e8] ss:$72 sps:$4 sm:$0xff]   ;;  %v9716_v46 = vld [vmem:[#allocation2 + $0xf5c] ss:$72 sps:$4 sm:$0xff]  }
 0x538   :  { %v6048_v30 = vcombine.low %v5449_v34, %v5451_v50  ;;  %5745 = vmatpush1.bf16.msra.mxu0 %v9648_v52  ;;  %v9708_v34 = vld [vmem:[#allocation2 + $0xfe8] ss:$72 sps:$4 sm:$0xff]   ;;  %v9711_v52 = vld [vmem:[#allocation2 + $0x658] ss:$72 sps:$4 sm:$0xff]  }
 0x539   :  { %5746 = vmatprep.subr.bf16.mxu0 %v9656_v47  ;;  %v5453_v37 = vpop.f32.mrf.mxu0  ;;  %v9719_v47 = vld [vmem:[#allocation2 + $0x5cc] ss:$72 sps:$4 sm:$0xff]   ;;  %v9717_v50 = vld [vmem:[#allocation2 + $0x5c8] ss:$72 sps:$4 sm:$0xff]   ;;  %v9723_v35 = vld [vmem:[#allocation2 + $0x538] ss:$72 sps:$4 sm:$0xff]  }
 0x53a   :  { %v6062_v36 = vrot.slane %v6048_v30, %v10994_v60  ;;  %5706 = vmatpush1.bf16.msra.mxu1 %v9651_v51  ;;  %v9722_v51 = vld [vmem:[#allocation2 + $0xecc] ss:$72 sps:$4 sm:$0xff]   ;;  %v9720_v4 = vld [vmem:[#allocation2 + $0xec8] ss:$72 sps:$4 sm:$0xff]   ;;  %v9728_v30 = vld [vmem:[#allocation2 + $0xe3c] ss:$72 sps:$4 sm:$0xff]  }
 0x53b   :  { %5707 = vmatprep.subr.bf16.mxu1 %v9659_v20  ;;  %v9725_v20 = vld [vmem:[#allocation2 + $0x53c] ss:$72 sps:$4 sm:$0xff]   ;;  %v9729_v37 = vld [vmem:[#allocation2 + $0x4a8] ss:$72 sps:$4 sm:$0xff]  }
 0x53c   :  { %v6063_v39 = vcombine.low %v6055_v56, %v6062_v36  ;;  %5747 = vmatpush1.bf16.msra.mxu0 %v9654_v33  ;;  %v9726_v33 = vld [vmem:[#allocation2 + $0xe38] ss:$72 sps:$4 sm:$0xff]   ;;  %v9734_v56 = vld [vmem:[#allocation2 + $0xdac] ss:$72 sps:$4 sm:$0xff]   ;;  %v9732_v36 = vld [vmem:[#allocation2 + $0xda8] ss:$72 sps:$4 sm:$0xff]  }
 0x53d   :  { %5748 = vmatprep.subr.bf16.mxu0 %v9662_v29  ;;  %v9731_v29 = vld [vmem:[#allocation2 + $0x4ac] ss:$72 sps:$4 sm:$0xff]  }
 0x53e   :  { %6128 = vst [vmem:[#allocation3] sm:$0xff] %v6063_v39  ;;  %5708 = vmatpush1.bf16.msra.mxu1 %v9657_v43  ;;  %v2339_v43 = vsub.s32 4, %v10989_v2  ;;  %v2343_v39 = vsub.s32 5, %v10989_v2 }
 0x53f   :  { %5709 = vmatprep.subr.bf16.mxu1 %v9665_v63  ;;  %v9737_v63 = vld [vmem:[#allocation2 + $0x424] ss:$72 sps:$4 sm:$0xff]  }
 0x540   :  { %5749 = vmatpush1.bf16.msra.mxu0 %v9660_v0  ;;  %v9740_v0 = vld [vmem:[#allocation2 + $0xd24] ss:$72 sps:$4 sm:$0xff]  }
 0x541   :  { %5750 = vmatprep.subr.bf16.mxu0 %v9668_v1  ;;  %v11080_v1 = vld [vmem:[#allocation14] sm:$0xff] }
 0x542   :  { %5710 = vmatpush1.bf16.msra.mxu1 %v9663_v49  ;;  %v2340_v49 = vrot.slane %v11080_v1, %v2339_v43 }
 0x543   :  { %5711 = vmatprep.subr.bf16.mxu1 %v9671_v3  ;;  %v9735_v3 = vld [vmem:[#allocation2 + $0x420] ss:$72 sps:$4 sm:$0xff]  }
 0x544   :  { %5751 = vmatpush1.bf16.msra.mxu0 %v9666_v59  ;;  %v9743_v59 = vld [vmem:[#allocation2 + $0x394] ss:$72 sps:$4 sm:$0xff]  }
 0x545   :  { %5752 = vmatprep.subr.bf16.mxu0 %v9674_v38  ;;  %v10151_v17 = vld.sshfl [vmem:[#allocation3] sm:$0x3 pattern:$0x76325410]  ;;  %v2344_v38 = vrot.slane %v11080_v1, %v2343_v39 }
 0x546   :  { %5712 = vmatpush1.bf16.msra.mxu1 %v9669_v7  ;;  %6162 = vrot.lane.b32.xlu1 %v10151_v17, %s10328_s27  ;;  %v9738_v7 = vld [vmem:[#allocation2 + $0xd20] ss:$72 sps:$4 sm:$0xff]  }
 0x547   :  { %5713 = vmatprep.subr.bf16.mxu1 %v9677_v14 }
 0x548   :  { %5753 = vmatpush1.bf16.msra.mxu0 %v9672_v19  ;;  %v9746_v19 = vld [vmem:[#allocation2 + $0xc94] ss:$72 sps:$4 sm:$0xff]  }
 0x549   :  { %5754 = vmatprep.subr.bf16.mxu0 %v9680_v24  ;;  %v9741_v24 = vld [vmem:[#allocation2 + $0x390] ss:$72 sps:$4 sm:$0xff]  }
 0x54a   :  { %5714 = vmatpush1.bf16.msra.mxu1 %v9675_v9 }
 0x54b   :  { %5715 = vmatprep.subr.bf16.mxu1 %v9683_v10 }
 0x54c   :  { %5755 = vmatpush1.bf16.msra.mxu0 %v9678_v41  ;;  %v9749_v41 = vld [vmem:[#allocation2 + $0x304] ss:$72 sps:$4 sm:$0xff]  }
 0x54d   :  { %5756 = vmatprep.subr.bf16.mxu0 %v9686_v11 }
 0x54e   :  { %5716 = vmatpush1.bf16.msra.mxu1 %v9681_v15 }
 0x54f   :  { %5717 = vmatprep.subr.bf16.mxu1 %v9689_v26  ;;  %v9744_v26 = vld [vmem:[#allocation2 + $0xc90] ss:$72 sps:$4 sm:$0xff]  }
 0x550   :  { %5757 = vmatpush1.bf16.msra.mxu0 %v9684_v62 }
 0x551   :  { %5758 = vmatprep.subr.bf16.mxu0 %v9692_v54 }
 0x552   :  { %5718 = vmatpush2.bf16.msra.mxu1 %v9687_v23  ;;  %v9752_v23 = vld [vmem:[#allocation2 + $0xc04] ss:$72 sps:$4 sm:$0xff]  }
 0x553   :  { %5719 = vmatprep.subr.bf16.mxu1 %v9695_v25 }
 0x554   :  { %5759 = vmatpush2.bf16.msra.mxu0 %v9690_v31  ;;  %v9747_v31 = vld [vmem:[#allocation2 + $0x300] ss:$72 sps:$4 sm:$0xff]  }
 0x555   :  { %5760 = vmatprep.subr.bf16.mxu0 %v9698_v48 }
 0x556   :  { %5720 = vmatpush2.bf16.msra.mxu1 %v9693_v5  ;;  %v9755_v5 = vld [vmem:[#allocation2 + $0x274] ss:$72 sps:$4 sm:$0xff]  }
 0x557   :  { %5721 = vmatprep.subr.bf16.mxu1 %v9701_v27 }
 0x558   :  { %5761 = vmatpush2.bf16.msra.mxu0 %v9696_v28 }
 0x559   :  { %5762 = vmatprep.subr.bf16.mxu0 %v9704_v61  ;;  %v9750_v61 = vld [vmem:[#allocation2 + $0xc00] ss:$72 sps:$4 sm:$0xff]  }
 0x55a   :  { %5722 = vmatpush2.bf16.msra.mxu1 %v9699_v32  ;;  %v9758_v32 = vld [vmem:[#allocation2 + $0xb74] ss:$72 sps:$4 sm:$0xff]  }
 0x55b   :  { %5723 = vmatprep.subr.bf16.mxu1 %v9707_v22 }
 0x55c   :  { %5763 = vmatpush2.bf16.msra.mxu0 %v9702_v45  ;;  %v9753_v45 = vld [vmem:[#allocation2 + $0x270] ss:$72 sps:$4 sm:$0xff]  }
 0x55d   :  { %5764 = vmatprep.subr.bf16.mxu0 %v9710_v53  ;;  %v9761_v53 = vld [vmem:[#allocation2 + $0x1e4] ss:$72 sps:$4 sm:$0xff]  }
 0x55e   :  { %5724 = vmatpush2.bf16.msra.mxu1 %v9705_v40  ;;  %v9756_v40 = vld [vmem:[#allocation2 + $0xb70] ss:$72 sps:$4 sm:$0xff]  }
 0x55f   :  { %5725 = vmatprep.subr.bf16.mxu1 %v9713_v44  ;;  %v9764_v44 = vld [vmem:[#allocation2 + $0xae4] ss:$72 sps:$4 sm:$0xff]  }
 0x560   :  { %5765 = vmatpush2.bf16.msra.mxu0 %v9708_v34  ;;  %v9759_v34 = vld [vmem:[#allocation2 + $0x1e0] ss:$72 sps:$4 sm:$0xff]  }
 0x561   :  { %5766 = vmatprep.subr.bf16.mxu0 %v9716_v46  ;;  %v9762_v46 = vld [vmem:[#allocation2 + $0xae0] ss:$72 sps:$4 sm:$0xff]  }
 0x562   :  { %5726 = vmatpush2.bf16.msra.mxu1 %v9711_v52  ;;  %v9767_v52 = vld [vmem:[#allocation2 + $0x154] ss:$72 sps:$4 sm:$0xff]  }
 0x563   :  { %5727 = vmatprep.subr.bf16.mxu1 %v9719_v47  ;;  %v9765_v47 = vld [vmem:[#allocation2 + $0x150] ss:$72 sps:$4 sm:$0xff]  }
 0x564   :  { %5767 = vmatpush2.bf16.msra.mxu0 %v9714_v57  ;;  %v9770_v57 = vld [vmem:[#allocation2 + $0xa54] ss:$72 sps:$4 sm:$0xff]  }
 0x565   :  { %5768 = vmatprep.subr.bf16.mxu0 %v9722_v51  ;;  %v9768_v51 = vld [vmem:[#allocation2 + $0xa50] ss:$72 sps:$4 sm:$0xff]  }
 0x566   :  { %5728 = vmatpush2.bf16.msra.mxu1 %v9717_v50  ;;  %v9773_v50 = vld [vmem:[#allocation2 + $0xc4] ss:$72 sps:$4 sm:$0xff]  }
 0x567   :  { %5729 = vmatprep.subr.bf16.mxu1 %v9725_v20  ;;  %v9771_v20 = vld [vmem:[#allocation2 + $0xc0] ss:$72 sps:$4 sm:$0xff]  }
 0x568   :  { %5769 = vmatpush2.bf16.msra.mxu0 %v9720_v4  ;;  %v9776_v4 = vld [vmem:[#allocation2 + $0x9c4] ss:$72 sps:$4 sm:$0xff]  }
 0x569   :  { %5770 = vmatprep.subr.bf16.mxu0 %v9728_v30  ;;  %v9774_v30 = vld [vmem:[#allocation2 + $0x9c0] ss:$72 sps:$4 sm:$0xff]  }
 0x56a   :  { %5730 = vmatpush2.bf16.msra.mxu1 %v9723_v35  ;;  %v9779_v35 = vld [vmem:[#allocation2 + $0x34] ss:$72 sps:$4 sm:$0xff]  }
 0x56b   :  { %5731 = vmatprep.subr.bf16.mxu1 %v9731_v29  ;;  %v9777_v29 = vld [vmem:[#allocation2 + $0x30] ss:$72 sps:$4 sm:$0xff]  }
 0x56c   :  { %5771 = vmatpush2.bf16.msra.mxu0 %v9726_v33  ;;  %v9782_v33 = vld [vmem:[#allocation2 + $0x934] ss:$72 sps:$4 sm:$0xff]  }
 0x56d   :  { %5772 = vmatprep.subr.bf16.mxu0 %v9734_v56  ;;  %v9780_v56 = vld [vmem:[#allocation2 + $0x930] ss:$72 sps:$4 sm:$0xff]  }
 0x56e   :  { %5732 = vmatpush2.bf16.msra.mxu1 %v9729_v37  ;;  %v9785_v37 = vld [vmem:[#allocation2 + $0x8a4] ss:$72 sps:$4 sm:$0xff]  }
 0x56f   :  { %5783 = vmatprep.subr.bf16.mxu1 %v9737_v63  ;;  %v9783_v63 = vld [vmem:[#allocation2 + $0x8a0] ss:$72 sps:$4 sm:$0xff]  }
 0x570   :  { %5773 = vmatpush2.bf16.msra.mxu0 %v9732_v36  ;;  %v9788_v36 = vld [vmem:[#allocation2 + $0x11a4] ss:$72 sps:$4 sm:$0xff]  }
 0x571   :  { %v5489_v14 = vpop.f32.mrf.mxu1  ;;  %5734 = vmatmul.mubr.bf16.vlgmr.msra.gmra.mxu1 %v11020_v18  ;;  %5824 = vmatprep.subr.bf16.mxu0 %v9740_v0  ;;  %v9791_v0 = vld [vmem:[#allocation2 + $0x814] ss:$72 sps:$4 sm:$0xff]  }
 0x572   :  { %v5490_v17 = vadd.f32 %v5489_v14, %v2340_v49  ;;  %5784 = vmatpush1.bf16.msra.mxu1 %v9735_v3  ;;  %5815 = vmatprep.mubr.bf16.mxu1 %v11007_v6  ;;  %v9786_v49 = vld [vmem:[#allocation2 + $0x11a0] ss:$72 sps:$4 sm:$0xff]   ;;  %v9794_v3 = vld [vmem:[#allocation2 + $0x1114] ss:$72 sps:$4 sm:$0xff]   ;;  %v9800_v14 = vld [vmem:[#allocation2 + $0x1084] ss:$72 sps:$4 sm:$0xff]  }
 0x573   :  { %v5491_v9 = vpop.f32.mrf.mxu1  ;;  %v5530_v10 = vpop.f32.mrf.mxu0  ;;  %5775 = vmatmul.mubr.bf16.vlgmr.msra.gmra.mxu0 %v11024_v21  ;;  %5785 = vmatprep.subr.bf16.mxu1 %v9743_v59  ;;  %v9789_v59 = vld [vmem:[#allocation2 + $0x810] ss:$72 sps:$4 sm:$0xff]  }
 0x574   :  { %v5492_v11 = vadd.f32 %v5491_v9, %v2344_v38  ;;  %v11091_v15 = vadd.f32 %v5530_v10, %v5490_v17  ;;  %5825 = vmatpush1.bf16.msra.mxu0 %v9738_v7  ;;  %5856 = vmatprep.mubr.bf16.mxu0 %v11009_v12  ;;  %v9797_v38 = vld [vmem:[#allocation2 + $0x784] ss:$72 sps:$4 sm:$0xff]   ;;  %v9792_v7 = vld [vmem:[#allocation2 + $0x1110] ss:$72 sps:$4 sm:$0xff]   ;;  %v9803_v17 = vld [vmem:[#allocation2 + $0x6f4] ss:$72 sps:$4 sm:$0xff]  }
 0x575   :  { %v5493_v62 = vpop.f32.mrf.mxu1  ;;  %v5532_v54 = vpop.f32.mrf.mxu0  ;;  %5826 = vmatprep.subr.bf16.mxu0 %v9746_v19  ;;  %v9795_v19 = vld [vmem:[#allocation2 + $0x780] ss:$72 sps:$4 sm:$0xff]   ;;  %v9806_v9 = vld [vmem:[#allocation2 + $0xff4] ss:$72 sps:$4 sm:$0xff]   ;;  %v9801_v10 = vld [vmem:[#allocation2 + $0x6f0] ss:$72 sps:$4 sm:$0xff]  }
 0x576   :  { %v11094_v25 = vadd.f32 %v5532_v54, %v5492_v11  ;;  %5786 = vmatpush1.bf16.msra.mxu1 %v9741_v24  ;;  %v9798_v24 = vld [vmem:[#allocation2 + $0x1080] ss:$72 sps:$4 sm:$0xff]   ;;  %v9804_v11 = vld [vmem:[#allocation2 + $0xff0] ss:$72 sps:$4 sm:$0xff]   ;;  %v9815_v54 = vld [vmem:[#allocation2 + $0x5d4] ss:$72 sps:$4 sm:$0xff]  }
 0x577   :  { %v5494_v48 = vpop.f32.mrf.mxu1  ;;  %5787 = vmatprep.subr.bf16.mxu1 %v9749_v41  ;;  %v5534_v27 = vpop.f32.mrf.mxu0  ;;  %v9809_v41 = vld [vmem:[#allocation2 + $0x664] ss:$72 sps:$4 sm:$0xff]   ;;  %v9807_v62 = vld [vmem:[#allocation2 + $0x660] ss:$72 sps:$4 sm:$0xff]  }
 0x578   :  { %v6064_v28 = vcombine.low %v11091_v15, %v11094_v25  ;;  %5827 = vmatpush1.bf16.msra.mxu0 %v9744_v26  ;;  %v9812_v26 = vld [vmem:[#allocation2 + $0xf64] ss:$72 sps:$4 sm:$0xff]   ;;  %v9813_v48 = vld [vmem:[#allocation2 + $0x5d0] ss:$72 sps:$4 sm:$0xff]  }
 0x579   :  { %5828 = vmatprep.subr.bf16.mxu0 %v9752_v23  ;;  %v5535_v22 = vpop.f32.mrf.mxu0  ;;  %v9810_v23 = vld [vmem:[#allocation2 + $0xf60] ss:$72 sps:$4 sm:$0xff]   ;;  %v9816_v27 = vld [vmem:[#allocation2 + $0xed0] ss:$72 sps:$4 sm:$0xff]   ;;  %v9866_v15 = vld [vmem:[#allocation2 + $0xa5c] ss:$72 sps:$4 sm:$0xff]  }
 0x57a   :  { %5788 = vmatpush1.bf16.msra.mxu1 %v9747_v31  ;;  %v9818_v31 = vld [vmem:[#allocation2 + $0xed4] ss:$72 sps:$4 sm:$0xff]   ;;  %v9861_v25 = vld [vmem:[#allocation2 + $0x158] ss:$72 sps:$4 sm:$0xff]  }
 0x57b   :  { %5789 = vmatprep.subr.bf16.mxu1 %v9755_v5  ;;  %v9821_v5 = vld [vmem:[#allocation2 + $0x544] ss:$72 sps:$4 sm:$0xff]   ;;  %v9827_v22 = vld [vmem:[#allocation2 + $0x4b4] ss:$72 sps:$4 sm:$0xff]  }
 0x57c   :  { %5829 = vmatpush1.bf16.msra.mxu0 %v9750_v61  ;;  %v9824_v61 = vld [vmem:[#allocation2 + $0xe44] ss:$72 sps:$4 sm:$0xff]  }
 0x57d   :  { %5830 = vmatprep.subr.bf16.mxu0 %v9758_v32  ;;  %v9819_v32 = vld [vmem:[#allocation2 + $0x540] ss:$72 sps:$4 sm:$0xff]  }
 0x57e   :  { %5790 = vmatpush1.bf16.msra.mxu1 %v9753_v45  ;;  %v9822_v45 = vld [vmem:[#allocation2 + $0xe40] ss:$72 sps:$4 sm:$0xff]  }
 0x57f   :  { %5791 = vmatprep.subr.bf16.mxu1 %v9761_v53  ;;  %v9830_v53 = vld [vmem:[#allocation2 + $0xdb4] ss:$72 sps:$4 sm:$0xff]  }
 0x580   :  { %5831 = vmatpush1.bf16.msra.mxu0 %v9756_v40  ;;  %v9825_v40 = vld [vmem:[#allocation2 + $0x4b0] ss:$72 sps:$4 sm:$0xff]  }
 0x581   :  { %5832 = vmatprep.subr.bf16.mxu0 %v9764_v44  ;;  %v2347_v44 = vsub.s32 6, %v10989_v2 }
 0x582   :  { %5792 = vmatpush1.bf16.msra.mxu1 %v9759_v34  ;;  %v9833_v34 = vld [vmem:[#allocation2 + $0x42c] ss:$72 sps:$4 sm:$0xff]  }
 0x583   :  { %5793 = vmatprep.subr.bf16.mxu1 %v9767_v52  ;;  %v9828_v52 = vld [vmem:[#allocation2 + $0xdb0] ss:$72 sps:$4 sm:$0xff]  }
 0x584   :  { %5833 = vmatpush1.bf16.msra.mxu0 %v9762_v46  ;;  %v2351_v46 = vsub.s32 7, %v10989_v2 }
 0x585   :  { %5834 = vmatprep.subr.bf16.mxu0 %v9770_v57  ;;  %v9836_v57 = vld [vmem:[#allocation2 + $0xd2c] ss:$72 sps:$4 sm:$0xff]  }
 0x586   :  { %5794 = vmatpush1.bf16.msra.mxu1 %v9765_v47  ;;  %v2348_v47 = vrot.slane %v11080_v1, %v2347_v44 }
 0x587   :  { %5795 = vmatprep.subr.bf16.mxu1 %v9773_v50  ;;  %v9831_v50 = vld [vmem:[#allocation2 + $0x428] ss:$72 sps:$4 sm:$0xff]  }
 0x588   :  { %5835 = vmatpush1.bf16.msra.mxu0 %v9768_v51  ;;  %v9839_v51 = vld [vmem:[#allocation2 + $0x39c] ss:$72 sps:$4 sm:$0xff]  }
 0x589   :  { %5836 = vmatprep.subr.bf16.mxu0 %v9776_v4  ;;  %v2352_v4 = vrot.slane %v11080_v1, %v2351_v46  ;;  %v9840_v1 = vld [vmem:[#allocation2 + $0xc98] ss:$72 sps:$4 sm:$0xff]  }
 0x58a   :  { %5796 = vmatpush1.bf16.msra.mxu1 %v9771_v20  ;;  %v9834_v20 = vld [vmem:[#allocation2 + $0xd28] ss:$72 sps:$4 sm:$0xff]  }
 0x58b   :  { %5797 = vmatprep.subr.bf16.mxu1 %v9779_v35 }
 0x58c   :  { %5837 = vmatpush1.bf16.msra.mxu0 %v9774_v30  ;;  %v9842_v30 = vld [vmem:[#allocation2 + $0xc9c] ss:$72 sps:$4 sm:$0xff]  }
 0x58d   :  { %5838 = vmatprep.subr.bf16.mxu0 %v9782_v33 }
 0x58e   :  { %5798 = vmatpush1.bf16.msra.mxu1 %v9777_v29  ;;  %v9837_v29 = vld [vmem:[#allocation2 + $0x398] ss:$72 sps:$4 sm:$0xff]  }
 0x58f   :  { %5799 = vmatprep.subr.bf16.mxu1 %v9785_v37 }
 0x590   :  { %5839 = vmatpush1.bf16.msra.mxu0 %v9780_v56 }
 0x591   :  { %5840 = vmatprep.subr.bf16.mxu0 %v9788_v36  ;;  %v9845_v36 = vld [vmem:[#allocation2 + $0x30c] ss:$72 sps:$4 sm:$0xff]  }
 0x592   :  { %5800 = vmatpush2.bf16.msra.mxu1 %v9783_v63 }
 0x593   :  { %5801 = vmatprep.subr.bf16.mxu1 %v9791_v0 }
 0x594   :  { %5841 = vmatpush2.bf16.msra.mxu0 %v9786_v49 }
 0x595   :  { %5842 = vmatprep.subr.bf16.mxu0 %v9794_v3 }
 0x596   :  { %5802 = vmatpush2.bf16.msra.mxu1 %v9789_v59  ;;  %v9848_v59 = vld [vmem:[#allocation2 + $0xc0c] ss:$72 sps:$4 sm:$0xff]  }
 0x597   :  { %5803 = vmatprep.subr.bf16.mxu1 %v9797_v38 }
 0x598   :  { %5843 = vmatpush2.bf16.msra.mxu0 %v9792_v7  ;;  %v9843_v7 = vld [vmem:[#allocation2 + $0x308] ss:$72 sps:$4 sm:$0xff]  }
 0x599   :  { %5844 = vmatprep.subr.bf16.mxu0 %v9800_v14 }
 0x59a   :  { %5804 = vmatpush2.bf16.msra.mxu1 %v9795_v19  ;;  %v9851_v19 = vld [vmem:[#allocation2 + $0x27c] ss:$72 sps:$4 sm:$0xff]  }
 0x59b   :  { %5805 = vmatprep.subr.bf16.mxu1 %v9803_v17 }
 0x59c   :  { %5845 = vmatpush2.bf16.msra.mxu0 %v9798_v24 }
 0x59d   :  { %5846 = vmatprep.subr.bf16.mxu0 %v9806_v9  ;;  %v9846_v9 = vld [vmem:[#allocation2 + $0xc08] ss:$72 sps:$4 sm:$0xff]  }
 0x59e   :  { %5806 = vmatpush2.bf16.msra.mxu1 %v9801_v10  ;;  %v9854_v10 = vld [vmem:[#allocation2 + $0xb7c] ss:$72 sps:$4 sm:$0xff]  }
 0x59f   :  { %5807 = vmatprep.subr.bf16.mxu1 %v9809_v41 }
 0x5a0   :  { %5847 = vmatpush2.bf16.msra.mxu0 %v9804_v11  ;;  %v6072_v11 = vrot.slane %v6064_v28, %v10994_v60  ;;  %v9869_v28 = vld [vmem:[#allocation2 + $0xcc] ss:$72 sps:$4 sm:$0xff]  }
 0x5a1   :  { %5848 = vmatprep.subr.bf16.mxu0 %v9812_v26 }
 0x5a2   :  { %5808 = vmatpush2.bf16.msra.mxu1 %v9807_v62  ;;  %v9849_v62 = vld [vmem:[#allocation2 + $0x278] ss:$72 sps:$4 sm:$0xff]  }
 0x5a3   :  { %5809 = vmatprep.subr.bf16.mxu1 %v9815_v54  ;;  %v9857_v54 = vld [vmem:[#allocation2 + $0x1ec] ss:$72 sps:$4 sm:$0xff]  }
 0x5a4   :  { %5849 = vmatpush2.bf16.msra.mxu0 %v9810_v23 }
 0x5a5   :  { %5850 = vmatprep.subr.bf16.mxu0 %v9818_v31  ;;  %v9852_v31 = vld [vmem:[#allocation2 + $0xb78] ss:$72 sps:$4 sm:$0xff]  }
 0x5a6   :  { %5810 = vmatpush2.bf16.msra.mxu1 %v9813_v48  ;;  %v9860_v48 = vld [vmem:[#allocation2 + $0xaec] ss:$72 sps:$4 sm:$0xff]  }
 0x5a7   :  { %5811 = vmatprep.subr.bf16.mxu1 %v9821_v5  ;;  %v9855_v5 = vld [vmem:[#allocation2 + $0x1e8] ss:$72 sps:$4 sm:$0xff]  }
 0x5a8   :  { %5851 = vmatpush2.bf16.msra.mxu0 %v9816_v27  ;;  %v9863_v27 = vld [vmem:[#allocation2 + $0x15c] ss:$72 sps:$4 sm:$0xff]  }
 0x5a9   :  { %5852 = vmatprep.subr.bf16.mxu0 %v9824_v61  ;;  %v9858_v61 = vld [vmem:[#allocation2 + $0xae8] ss:$72 sps:$4 sm:$0xff]  }
 0x5aa   :  { %5812 = vmatpush2.bf16.msra.mxu1 %v9819_v32  ;;  %v9864_v32 = vld [vmem:[#allocation2 + $0xa58] ss:$72 sps:$4 sm:$0xff]  }
 0x5ab   :  { %5813 = vmatprep.subr.bf16.mxu1 %v9827_v22  ;;  %v9872_v22 = vld [vmem:[#allocation2 + $0x9cc] ss:$72 sps:$4 sm:$0xff]  }
 0x5ac   :  { %5853 = vmatpush2.bf16.msra.mxu0 %v9822_v45  ;;  %v9867_v45 = vld [vmem:[#allocation2 + $0xc8] ss:$72 sps:$4 sm:$0xff]  }
 0x5ad   :  { %5854 = vmatprep.subr.bf16.mxu0 %v9830_v53  ;;  %v9875_v53 = vld [vmem:[#allocation2 + $0x3c] ss:$72 sps:$4 sm:$0xff]  }
 0x5ae   :  { %5814 = vmatpush2.bf16.msra.mxu1 %v9825_v40  ;;  %v9870_v40 = vld [vmem:[#allocation2 + $0x9c8] ss:$72 sps:$4 sm:$0xff]  }
 0x5af   :  { %5865 = vmatprep.subr.bf16.mxu1 %v9833_v34  ;;  %v9878_v34 = vld [vmem:[#allocation2 + $0x93c] ss:$72 sps:$4 sm:$0xff]  }
 0x5b0   :  { %5855 = vmatpush2.bf16.msra.mxu0 %v9828_v52  ;;  %v9873_v52 = vld [vmem:[#allocation2 + $0x38] ss:$72 sps:$4 sm:$0xff]  }
 0x5b1   :  { %v5571_v35 = vpop.f32.mrf.mxu1  ;;  %5816 = vmatmul.mubr.bf16.vlgmr.msra.gmra.mxu1 %v11020_v18  ;;  %5906 = vmatprep.subr.bf16.mxu0 %v9836_v57  ;;  %v9881_v57 = vld [vmem:[#allocation2 + $0x8ac] ss:$72 sps:$4 sm:$0xff]  }
 0x5b2   :  { %v5572_v33 = vadd.f32 %v5571_v35, %v2348_v47  ;;  %5866 = vmatpush1.bf16.msra.mxu1 %v9831_v50  ;;  %5897 = vmatprep.mubr.bf16.mxu1 %v11007_v6  ;;  %v9876_v47 = vld [vmem:[#allocation2 + $0x938] ss:$72 sps:$4 sm:$0xff]   ;;  %v9884_v50 = vld [vmem:[#allocation2 + $0x11ac] ss:$72 sps:$4 sm:$0xff]   ;;  %v9890_v35 = vld [vmem:[#allocation2 + $0x111c] ss:$72 sps:$4 sm:$0xff]  }
 0x5b3   :  { %v5573_v37 = vpop.f32.mrf.mxu1  ;;  %v5612_v56 = vpop.f32.mrf.mxu0  ;;  %5857 = vmatmul.mubr.bf16.vlgmr.msra.gmra.mxu0 %v11024_v21  ;;  %5867 = vmatprep.subr.bf16.mxu1 %v9839_v51  ;;  %v9879_v51 = vld [vmem:[#allocation2 + $0x8a8] ss:$72 sps:$4 sm:$0xff]  }
 0x5b4   :  { %v5574_v63 = vadd.f32 %v5573_v37, %v2352_v4  ;;  %v5613_v0 = vadd.f32 %v5612_v56, %v5572_v33  ;;  %5907 = vmatpush1.bf16.msra.mxu0 %v9834_v20  ;;  %5938 = vmatprep.mubr.bf16.mxu0 %v11009_v12  ;;  %v9887_v4 = vld [vmem:[#allocation2 + $0x81c] ss:$72 sps:$4 sm:$0xff]   ;;  %v9882_v20 = vld [vmem:[#allocation2 + $0x11a8] ss:$72 sps:$4 sm:$0xff]   ;;  %v9893_v33 = vld [vmem:[#allocation2 + $0x78c] ss:$72 sps:$4 sm:$0xff]  }
 0x5b5   :  { %v5575_v49 = vpop.f32.mrf.mxu1  ;;  %v5614_v3 = vpop.f32.mrf.mxu0  ;;  %5908 = vmatprep.subr.bf16.mxu0 %v9842_v30  ;;  %v9885_v30 = vld [vmem:[#allocation2 + $0x818] ss:$72 sps:$4 sm:$0xff]   ;;  %v9896_v37 = vld [vmem:[#allocation2 + $0x108c] ss:$72 sps:$4 sm:$0xff]   ;;  %v9891_v56 = vld [vmem:[#allocation2 + $0x788] ss:$72 sps:$4 sm:$0xff]  }
 0x5b6   :  { %v5615_v38 = vadd.f32 %v5614_v3, %v5574_v63  ;;  %5868 = vmatpush1.bf16.msra.mxu1 %v9837_v29  ;;  %v9888_v29 = vld [vmem:[#allocation2 + $0x1118] ss:$72 sps:$4 sm:$0xff]   ;;  %v9894_v63 = vld [vmem:[#allocation2 + $0x1088] ss:$72 sps:$4 sm:$0xff]   ;;  %v9905_v49 = vld [vmem:[#allocation2 + $0x66c] ss:$72 sps:$4 sm:$0xff]  }
 0x5b7   :  { %v5576_v14 = vpop.f32.mrf.mxu1  ;;  %5869 = vmatprep.subr.bf16.mxu1 %v9845_v36  ;;  %v5616_v17 = vpop.f32.mrf.mxu0  ;;  %v9899_v36 = vld [vmem:[#allocation2 + $0x6fc] ss:$72 sps:$4 sm:$0xff]   ;;  %v9900_v3 = vld [vmem:[#allocation2 + $0xff8] ss:$72 sps:$4 sm:$0xff]  }
 0x5b8   :  { %v6065_v24 = vcombine.low %v5613_v0, %v5615_v38  ;;  %5909 = vmatpush1.bf16.msra.mxu0 %v9840_v1  ;;  %v9902_v0 = vld [vmem:[#allocation2 + $0xffc] ss:$72 sps:$4 sm:$0xff]   ;;  %v9897_v1 = vld [vmem:[#allocation2 + $0x6f8] ss:$72 sps:$4 sm:$0xff]   ;;  %v9903_v38 = vld [vmem:[#allocation2 + $0x668] ss:$72 sps:$4 sm:$0xff]  }
 0x5b9   :  { %5910 = vmatprep.subr.bf16.mxu0 %v9848_v59  ;;  %v5617_v41 = vpop.f32.mrf.mxu0  ;;  %v9908_v59 = vld [vmem:[#allocation2 + $0xf6c] ss:$72 sps:$4 sm:$0xff]   ;;  %v9906_v14 = vld [vmem:[#allocation2 + $0xf68] ss:$72 sps:$4 sm:$0xff]   ;;  %v9909_v17 = vld [vmem:[#allocation2 + $0x5d8] ss:$72 sps:$4 sm:$0xff]  }
 0x5ba   :  { %v6079_v26 = vrot.slane %v6065_v24, %v10994_v60  ;;  %5870 = vmatpush1.bf16.msra.mxu1 %v9843_v7  ;;  %v9911_v7 = vld [vmem:[#allocation2 + $0x5dc] ss:$72 sps:$4 sm:$0xff]   ;;  %v9917_v24 = vld [vmem:[#allocation2 + $0x54c] ss:$72 sps:$4 sm:$0xff]   ;;  %v9915_v41 = vld [vmem:[#allocation2 + $0x548] ss:$72 sps:$4 sm:$0xff]  }
 0x5bb   :  { %5871 = vmatprep.subr.bf16.mxu1 %v9851_v19  ;;  %v9914_v19 = vld [vmem:[#allocation2 + $0xedc] ss:$72 sps:$4 sm:$0xff]  }
 0x5bc   :  { %v6080_v23 = vcombine.low %v6072_v11, %v6079_v26  ;;  %5911 = vmatpush1.bf16.msra.mxu0 %v9846_v9  ;;  %v9912_v9 = vld [vmem:[#allocation2 + $0xed8] ss:$72 sps:$4 sm:$0xff]   ;;  %v9923_v11 = vld [vmem:[#allocation2 + $0x4bc] ss:$72 sps:$4 sm:$0xff]   ;;  %v9918_v26 = vld [vmem:[#allocation2 + $0xe48] ss:$72 sps:$4 sm:$0xff]  }
 0x5bd   :  { %5912 = vmatprep.subr.bf16.mxu0 %v9854_v10  ;;  %v9920_v10 = vld [vmem:[#allocation2 + $0xe4c] ss:$72 sps:$4 sm:$0xff]  }
 0x5be   :  { %6129 = vst [vmem:[#allocation3 + $0x8] sm:$0xff] %v6080_v23  ;;  %5872 = vmatpush1.bf16.msra.mxu1 %v9849_v62  ;;  %v9926_v62 = vld [vmem:[#allocation2 + $0xdbc] ss:$72 sps:$4 sm:$0xff]  }
 0x5bf   :  { %5873 = vmatprep.subr.bf16.mxu1 %v9857_v54  ;;  %v9921_v54 = vld [vmem:[#allocation2 + $0x4b8] ss:$72 sps:$4 sm:$0xff]  }
 0x5c0   :  { %5913 = vmatpush1.bf16.msra.mxu0 %v9852_v31  ;;  %v11115_v23 = vld [vmem:[#allocation14 + $0x8] sm:$0xff] }
 0x5c1   :  { %5914 = vmatprep.subr.bf16.mxu0 %v9860_v48  ;;  %v9929_v31 = vld [vmem:[#allocation2 + $0x434] ss:$72 sps:$4 sm:$0xff]   ;;  %v9924_v48 = vld [vmem:[#allocation2 + $0xdb8] ss:$72 sps:$4 sm:$0xff]  }
 0x5c2   :  { %5874 = vmatpush1.bf16.msra.mxu1 %v9855_v5  ;;  %v9932_v5 = vld [vmem:[#allocation2 + $0xd34] ss:$72 sps:$4 sm:$0xff]  }
 0x5c3   :  { %5875 = vmatprep.subr.bf16.mxu1 %v9863_v27  ;;  %v2356_v27 = vrot.slane %v11115_v23, %v11041_v55 }
 0x5c4   :  { %5915 = vmatpush1.bf16.msra.mxu0 %v9858_v61  ;;  %v9927_v61 = vld [vmem:[#allocation2 + $0x430] ss:$72 sps:$4 sm:$0xff]  }
 0x5c5   :  { %5916 = vmatprep.subr.bf16.mxu0 %v9866_v15  ;;  %v9935_v15 = vld [vmem:[#allocation2 + $0x3a4] ss:$72 sps:$4 sm:$0xff]  }
 0x5c6   :  { %5876 = vmatpush1.bf16.msra.mxu1 %v9861_v25  ;;  %v2360_v25 = vrot.slane %v11115_v23, %v11044_v58 }
 0x5c7   :  { %5877 = vmatprep.subr.bf16.mxu1 %v9869_v28  ;;  %v9930_v28 = vld [vmem:[#allocation2 + $0xd30] ss:$72 sps:$4 sm:$0xff]  }
 0x5c8   :  { %5917 = vmatpush1.bf16.msra.mxu0 %v9864_v32 }
 0x5c9   :  { %5918 = vmatprep.subr.bf16.mxu0 %v9872_v22  ;;  %v9938_v22 = vld [vmem:[#allocation2 + $0xca4] ss:$72 sps:$4 sm:$0xff]  }
 0x5ca   :  { %5878 = vmatpush1.bf16.msra.mxu1 %v9867_v45 }
 0x5cb   :  { %5879 = vmatprep.subr.bf16.mxu1 %v9875_v53  ;;  %v9933_v53 = vld [vmem:[#allocation2 + $0x3a0] ss:$72 sps:$4 sm:$0xff]  }
 0x5cc   :  { %5919 = vmatpush1.bf16.msra.mxu0 %v9870_v40 }
 0x5cd   :  { %5920 = vmatprep.subr.bf16.mxu0 %v9878_v34 }
 0x5ce   :  { %5880 = vmatpush1.bf16.msra.mxu1 %v9873_v52  ;;  %v9941_v52 = vld [vmem:[#allocation2 + $0x314] ss:$72 sps:$4 sm:$0xff]  }
 0x5cf   :  { %5881 = vmatprep.subr.bf16.mxu1 %v9881_v57  ;;  %v6139_v57 = vpop.xlane.xlu0 %6138 }
 0x5d0   :  { %5921 = vmatpush1.bf16.msra.mxu0 %v9876_v47 }
 0x5d1   :  { %5922 = vmatprep.subr.bf16.mxu0 %v9884_v50 }
 0x5d2   :  { %5882 = vmatpush2.bf16.msra.mxu1 %v9879_v51  ;;  %v9936_v51 = vld [vmem:[#allocation2 + $0xca0] ss:$72 sps:$4 sm:$0xff]  }
 0x5d3   :  { %5883 = vmatprep.subr.bf16.mxu1 %v9887_v4 }
 0x5d4   :  { %5923 = vmatpush2.bf16.msra.mxu0 %v9882_v20 }
 0x5d5   :  { %5924 = vmatprep.subr.bf16.mxu0 %v9890_v35  ;;  %v9944_v35 = vld [vmem:[#allocation2 + $0xc14] ss:$72 sps:$4 sm:$0xff]  }
 0x5d6   :  { %5884 = vmatpush2.bf16.msra.mxu1 %v9885_v30 }
 0x5d7   :  { %5885 = vmatprep.subr.bf16.mxu1 %v9893_v33 }
 0x5d8   :  { %5925 = vmatpush2.bf16.msra.mxu0 %v9888_v29  ;;  %v9947_v29 = vld [vmem:[#allocation2 + $0x284] ss:$72 sps:$4 sm:$0xff]  }
 0x5d9   :  { %5926 = vmatprep.subr.bf16.mxu0 %v9896_v37 }
 0x5da   :  { %5886 = vmatpush2.bf16.msra.mxu1 %v9891_v56 }
 0x5db   :  { %5887 = vmatprep.subr.bf16.mxu1 %v9899_v36  ;;  %v9942_v36 = vld [vmem:[#allocation2 + $0xc10] ss:$72 sps:$4 sm:$0xff]  }
 0x5dc   :  { %5927 = vmatpush2.bf16.msra.mxu0 %v9894_v63  ;;  %v11131_v63 = vmul.f32 0.015625, %v6139_v57 }
 0x5dd   :  { %5928 = vmatprep.subr.bf16.mxu0 %v9902_v0 }
 0x5de   :  { %5888 = vmatpush2.bf16.msra.mxu1 %v9897_v1  ;;  %v6145_v1 = vpop.xlane.xlu0 %6144  ;;  %v6149_v57 = vsub.f32 %v10987_v42, %v11131_v63 }
 0x5df   :  { %5889 = vmatprep.subr.bf16.mxu1 %v9905_v49  ;;  %v9945_v49 = vld [vmem:[#allocation2 + $0x280] ss:$72 sps:$4 sm:$0xff]  }
 0x5e0   :  { %5929 = vmatpush2.bf16.msra.mxu0 %v9900_v3  ;;  %v9953_v3 = vld [vmem:[#allocation2 + $0x1f4] ss:$72 sps:$4 sm:$0xff]  }
 0x5e1   :  { %5930 = vmatprep.subr.bf16.mxu0 %v9908_v59  ;;  %v9948_v59 = vld [vmem:[#allocation2 + $0xb80] ss:$72 sps:$4 sm:$0xff]  }
 0x5e2   :  { %5890 = vmatpush2.bf16.msra.mxu1 %v9903_v38  ;;  %v6147_v38 = vmul.f32 %v11131_v63, %v11131_v63  ;;  %v10150_v63 = vld [vmem:[#allocation3] sm:$0x3] }
 0x5e3   :  { %5891 = vmatprep.subr.bf16.mxu1 %v9911_v7  ;;  %v6146_v7 = vmul.f32 0.015625, %v6145_v1  ;;  %v10004_v1 = vld [vmem:[#allocation2 + $0xf74] ss:$72 sps:$4 sm:$0xff]  }
 0x5e4   :  { %5931 = vmatpush2.bf16.msra.mxu0 %v9906_v14  ;;  %v9956_v14 = vld [vmem:[#allocation2 + $0xaf4] ss:$72 sps:$4 sm:$0xff]  }
 0x5e5   :  { %5932 = vmatprep.subr.bf16.mxu0 %v9914_v19  ;;  %v9951_v19 = vld [vmem:[#allocation2 + $0x1f0] ss:$72 sps:$4 sm:$0xff]  }
 0x5e6   :  { %5892 = vmatpush2.bf16.msra.mxu1 %v9909_v17  ;;  %v9959_v17 = vld [vmem:[#allocation2 + $0x164] ss:$72 sps:$4 sm:$0xff]  }
 0x5e7   :  { %5893 = vmatprep.subr.bf16.mxu1 %v9917_v24  ;;  %v9954_v24 = vld [vmem:[#allocation2 + $0xaf0] ss:$72 sps:$4 sm:$0xff]  }
 0x5e8   :  { %5933 = vmatpush2.bf16.msra.mxu0 %v9912_v9  ;;  %v6148_v9 = vsub.f32 %v6146_v7, %v6147_v38  ;;  %v10002_v38 = vld [vmem:[#allocation2 + $0xf70] ss:$72 sps:$4 sm:$0xff]   ;;  %v10010_v7 = vld [vmem:[#allocation2 + $0xee4] ss:$72 sps:$4 sm:$0xff]  }
 0x5e9   :  { %5934 = vmatprep.subr.bf16.mxu0 %v9920_v10  ;;  %v9962_v10 = vld [vmem:[#allocation2 + $0xa64] ss:$72 sps:$4 sm:$0xff]  }
 0x5ea   :  { %5894 = vmatpush2.bf16.msra.mxu1 %v9915_v41  ;;  %v9957_v41 = vld [vmem:[#allocation2 + $0x160] ss:$72 sps:$4 sm:$0xff]  }
 0x5eb   :  { %5895 = vmatprep.subr.bf16.mxu1 %v9923_v11  ;;  %v9965_v11 = vld [vmem:[#allocation2 + $0xd4] ss:$72 sps:$4 sm:$0xff]  }
 0x5ec   :  { %5935 = vmatpush2.bf16.msra.mxu0 %v9918_v26  ;;  %v9960_v26 = vld [vmem:[#allocation2 + $0xa60] ss:$72 sps:$4 sm:$0xff]  }
 0x5ed   :  { %5936 = vmatprep.subr.bf16.mxu0 %v9926_v62  ;;  %v6150_v62 = vadd.f32 1e-05, %v6148_v9  ;;  %v10016_v9 = vld [vmem:[#allocation2 + $0xe54] ss:$72 sps:$4 sm:$0xff]  }
 0x5ee   :  { %5896 = vmatpush2.bf16.msra.mxu1 %v9921_v54  ;;  %v9968_v54 = vld [vmem:[#allocation2 + $0x9d4] ss:$72 sps:$4 sm:$0xff]  }
 0x5ef   :  { %5947 = vmatprep.subr.bf16.mxu1 %v9929_v31  ;;  %v9963_v31 = vld [vmem:[#allocation2 + $0xd0] ss:$72 sps:$4 sm:$0xff]   ;;  %10099 = vrsqrt.f32 %v6150_v62  ;;  %v10017_v62 = vld [vmem:[#allocation2 + $0x4c0] ss:$72 sps:$4 sm:$0xff]  }
 0x5f0   :  { %5937 = vmatpush2.bf16.msra.mxu0 %v9924_v48  ;;  %v9971_v48 = vld [vmem:[#allocation2 + $0x44] ss:$72 sps:$4 sm:$0xff]  }
 0x5f1   :  { %v5653_v32 = vpop.f32.mrf.mxu1  ;;  %5898 = vmatmul.mubr.bf16.vlgmr.msra.gmra.mxu1 %v11020_v18  ;;  %5988 = vmatprep.subr.bf16.mxu0 %v9932_v5  ;;  %v9966_v5 = vld [vmem:[#allocation2 + $0x9d0] ss:$72 sps:$4 sm:$0xff]  }
 0x5f2   :  { %v5654_v45 = vadd.f32 %v5653_v32, %v2356_v27  ;;  %5948 = vmatpush1.bf16.msra.mxu1 %v9927_v61  ;;  %5979 = vmatprep.mubr.bf16.mxu1 %v11007_v6  ;;  %v9939_v6 = vld [vmem:[#allocation2 + $0x310] ss:$72 sps:$4 sm:$0xff]   ;;  %v9974_v27 = vld [vmem:[#allocation2 + $0x944] ss:$72 sps:$4 sm:$0xff]   ;;  %v9969_v61 = vld [vmem:[#allocation2 + $0x40] ss:$72 sps:$4 sm:$0xff]  }
 0x5f3   :  { %v5655_v40 = vpop.f32.mrf.mxu1  ;;  %v5694_v34 = vpop.f32.mrf.mxu0  ;;  %5939 = vmatmul.mubr.bf16.vlgmr.msra.gmra.mxu0 %v11024_v21  ;;  %5949 = vmatprep.subr.bf16.mxu1 %v9935_v15  ;;  %v9977_v15 = vld [vmem:[#allocation2 + $0x8b4] ss:$72 sps:$4 sm:$0xff]   ;;  %v9975_v32 = vld [vmem:[#allocation2 + $0x8b0] ss:$72 sps:$4 sm:$0xff]  }
 0x5f4   :  { %v5656_v47 = vadd.f32 %v5655_v40, %v2360_v25  ;;  %v11124_v50 = vadd.f32 %v5694_v34, %v5654_v45  ;;  %5989 = vmatpush1.bf16.msra.mxu0 %v9930_v28  ;;  %6020 = vmatprep.mubr.bf16.mxu0 %v11009_v12  ;;  %v9950_v12 = vld [vmem:[#allocation2 + $0xb84] ss:$72 sps:$4 sm:$0xff]   ;;  %v9972_v25 = vld [vmem:[#allocation2 + $0x940] ss:$72 sps:$4 sm:$0xff]   ;;  %v9980_v28 = vld [vmem:[#allocation2 + $0x11b4] ss:$72 sps:$4 sm:$0xff]  }
 0x5f5   :  { %v5657_v4 = vpop.f32.mrf.mxu1  ;;  %v5696_v20 = vpop.f32.mrf.mxu0  ;;  %5990 = vmatprep.subr.bf16.mxu0 %v9938_v22  ;;  %v9983_v22 = vld [vmem:[#allocation2 + $0x824] ss:$72 sps:$4 sm:$0xff]   ;;  %v9978_v45 = vld [vmem:[#allocation2 + $0x11b0] ss:$72 sps:$4 sm:$0xff]   ;;  %v9981_v40 = vld [vmem:[#allocation2 + $0x820] ss:$72 sps:$4 sm:$0xff]  }
 0x5f6   :  { %v11127_v30 = vadd.f32 %v5696_v20, %v5656_v47  ;;  %5950 = vmatpush1.bf16.msra.mxu1 %v9933_v53  ;;  %v9986_v53 = vld [vmem:[#allocation2 + $0x1124] ss:$72 sps:$4 sm:$0xff]   ;;  %v9989_v34 = vld [vmem:[#allocation2 + $0x794] ss:$72 sps:$4 sm:$0xff]   ;;  %v9987_v4 = vld [vmem:[#allocation2 + $0x790] ss:$72 sps:$4 sm:$0xff]  }
 0x5f7   :  { %v5658_v33 = vpop.f32.mrf.mxu1  ;;  %5951 = vmatprep.subr.bf16.mxu1 %v9941_v52  ;;  %v5698_v37 = vpop.f32.mrf.mxu0  ;;  %v9984_v52 = vld [vmem:[#allocation2 + $0x1120] ss:$72 sps:$4 sm:$0xff]   ;;  %v9992_v47 = vld [vmem:[#allocation2 + $0x1094] ss:$72 sps:$4 sm:$0xff]   ;;  %v9995_v20 = vld [vmem:[#allocation2 + $0x704] ss:$72 sps:$4 sm:$0xff]  }
 0x5f8   :  { %v6081_v56 = vcombine.low %v11124_v50, %v11127_v30  ;;  %5991 = vmatpush1.bf16.msra.mxu0 %v9936_v51  ;;  %v9998_v33 = vld [vmem:[#allocation2 + $0x1004] ss:$72 sps:$4 sm:$0xff]   ;;  %v10001_v37 = vld [vmem:[#allocation2 + $0x674] ss:$72 sps:$4 sm:$0xff]   ;;  %v2372_v50 = vrot.slane %v11115_v23, %v2339_v43  ;;  %v2376_v30 = vrot.slane %v11115_v23, %v2343_v39  ;;  %v2380_v43 = vrot.slane %v11115_v23, %v2347_v44 }
 0x5f9   :  { %5992 = vmatprep.subr.bf16.mxu0 %v9944_v35  ;;  %v5699_v0 = vpop.f32.mrf.mxu0  ;;  %v9990_v35 = vld [vmem:[#allocation2 + $0x1090] ss:$72 sps:$4 sm:$0xff]   ;;  %v2384_v39 = vrot.slane %v11115_v23, %v2351_v46  ;;  %v2317_v46 = vld [vmem:[#allocation14 + $0x10] sm:$0x3] }
 0x5fa   :  { %5952 = vmatpush1.bf16.msra.mxu1 %v9939_v6 }
 0x5fb   :  { %5953 = vmatprep.subr.bf16.mxu1 %v9947_v29  ;;  %v9993_v29 = vld [vmem:[#allocation2 + $0x700] ss:$72 sps:$4 sm:$0xff]  }
 0x5fc   :  { %5993 = vmatpush1.bf16.msra.mxu0 %v9942_v36  ;;  %v10100_v51 = vpop.eup %10099  ;;  %v6163_v36 = vpop.permute.xlu1 %6162 }
 0x5fd   :  { %5994 = vmatprep.subr.bf16.mxu0 %v9950_v12  ;;  %v6152_v6 = vmul.f32 %v10100_v51, %v6149_v57  ;;  %v9996_v12 = vld [vmem:[#allocation2 + $0x1000] ss:$72 sps:$4 sm:$0xff]  }
 0x5fe   :  { %5954 = vmatpush1.bf16.msra.mxu1 %v9945_v49  ;;  %v9999_v49 = vld [vmem:[#allocation2 + $0x670] ss:$72 sps:$4 sm:$0xff]  }
 0x5ff   :  { %5955 = vmatprep.subr.bf16.mxu1 %v9953_v3  ;;  %v6153_v0 = vmul.f32 %v10150_v63, %v6152_v6 }
 0x600   :  { %5995 = vmatpush1.bf16.msra.mxu0 %v9948_v59  ;;  %v10007_v59 = vld [vmem:[#allocation2 + $0x5e4] ss:$72 sps:$4 sm:$0xff]  }
 0x601   :  { %5996 = vmatprep.subr.bf16.mxu0 %v9956_v14  ;;  %v6165_v3 = vadd.f32 %v6163_v36, %v6153_v0  ;;  %v10005_v14 = vld [vmem:[#allocation2 + $0x5e0] ss:$72 sps:$4 sm:$0xff]  }
 0x602   :  { %5956 = vmatpush1.bf16.msra.mxu1 %v9951_v19 }
 0x603   :  { %5957 = vmatprep.subr.bf16.mxu1 %v9959_v17  ;;  %v6166_v19 = vmul.f32 0.5, %v6165_v3  ;;  %v10013_v17 = vld [vmem:[#allocation2 + $0x554] ss:$72 sps:$4 sm:$0xff]  }
 0x604   :  { %5997 = vmatpush1.bf16.msra.mxu0 %v9954_v24  ;;  %v10008_v24 = vld [vmem:[#allocation2 + $0xee0] ss:$72 sps:$4 sm:$0xff]  }
 0x605   :  { %5998 = vmatprep.subr.bf16.mxu0 %v9962_v10  ;;  %v10011_v10 = vld [vmem:[#allocation2 + $0x550] ss:$72 sps:$4 sm:$0xff]   ;;  %10101 = vtanh.f32 %v6166_v19 }
 0x606   :  { %5958 = vmatpush1.bf16.msra.mxu1 %v9957_v41  ;;  %v10019_v41 = vld [vmem:[#allocation2 + $0x4c4] ss:$72 sps:$4 sm:$0xff]  }
 0x607   :  { %5959 = vmatprep.subr.bf16.mxu1 %v9965_v11  ;;  %v10014_v11 = vld [vmem:[#allocation2 + $0xe50] ss:$72 sps:$4 sm:$0xff]  }
 0x608   :  { %5999 = vmatpush1.bf16.msra.mxu0 %v9960_v26  ;;  %v10022_v26 = vld [vmem:[#allocation2 + $0xdc4] ss:$72 sps:$4 sm:$0xff]  }
 0x609   :  { %6000 = vmatprep.subr.bf16.mxu0 %v9968_v54  ;;  %v10020_v54 = vld [vmem:[#allocation2 + $0xdc0] ss:$72 sps:$4 sm:$0xff]  }
 0x60a   :  { %5960 = vmatpush1.bf16.msra.mxu1 %v9963_v31  ;;  %v2364_v31 = vrot.slane %v11115_v23, %v2331_v16 }
 0x60b   :  { %5961 = vmatprep.subr.bf16.mxu1 %v9971_v48  ;;  %v10023_v48 = vld [vmem:[#allocation11 + $0x18] sm:$0xff]  }
 0x60c   :  { %6001 = vmatpush1.bf16.msra.mxu0 %v9966_v5  ;;  %v2368_v5 = vrot.slane %v11115_v23, %v2335_v13  ;;  %v2388_v23 = vrot.slane %v2317_v46, %v11041_v55 }
 0x60d   :  { %6002 = vmatprep.subr.bf16.mxu0 %v9974_v27 }
 0x60e   :  { %5962 = vmatpush1.bf16.msra.mxu1 %v9969_v61 }
 0x60f   :  { %5963 = vmatprep.subr.bf16.mxu1 %v9977_v15  ;;  %v10024_v15 = vld [vmem:[#allocation11 + $0x10] sm:$0xff]  }
 0x610   :  { %6003 = vmatpush1.bf16.msra.mxu0 %v9972_v25 }
 0x611   :  { %6004 = vmatprep.subr.bf16.mxu0 %v9980_v28 }
 0x612   :  { %5964 = vmatpush2.bf16.msra.mxu1 %v9975_v32  ;;  %v10102_v28 = vpop.eup %10101 }
 0x613   :  { %5965 = vmatprep.subr.bf16.mxu1 %v9983_v22 }
 0x614   :  { %6005 = vmatpush2.bf16.msra.mxu0 %v9978_v45 }
 0x615   :  { %6006 = vmatprep.subr.bf16.mxu0 %v9986_v53  ;;  %v10025_v53 = vld [vmem:[#allocation11 + $0x8] sm:$0xff]  }
 0x616   :  { %5966 = vmatpush2.bf16.msra.mxu1 %v9981_v40  ;;  %v6168_v40 = vadd.f32 1.0, %v10102_v28 }
 0x617   :  { %5967 = vmatprep.subr.bf16.mxu1 %v9989_v34 }
 0x618   :  { %6007 = vmatpush2.bf16.msra.mxu0 %v9984_v52 }
 0x619   :  { %6008 = vmatprep.subr.bf16.mxu0 %v9992_v47  ;;  %v6089_v47 = vrot.slane %v6081_v56, %v10994_v60 }
 0x61a   :  { %5968 = vmatpush2.bf16.msra.mxu1 %v9987_v4  ;;  %v10026_v4 = vld [vmem:[#allocation11] sm:$0xff]  }
 0x61b   :  { %5969 = vmatprep.subr.bf16.mxu1 %v9995_v20  ;;  %v6169_v20 = vmul.f32 %v6168_v40, %v6166_v19 }
 0x61c   :  { %6009 = vmatpush2.bf16.msra.mxu0 %v9990_v35 }
 0x61d   :  { %6010 = vmatprep.subr.bf16.mxu0 %v9998_v33  ;;  %v6170_v6 = vpack.c.bf16 %v6169_v20, %v6169_v20  ;;  %v10027_v20 = vld [vmem:[%s11511_s7 + $0x38] sm:$0xff]  }
 0x61e   :  { %5970 = vmatpush2.bf16.msra.mxu1 %v9993_v29 }
 0x61f   :  { %5971 = vmatprep.subr.bf16.mxu1 %v10001_v37 }
 0x620   :  { %6011 = vmatpush2.bf16.msra.mxu0 %v9996_v12 }
 0x621   :  { %6012 = vmatprep.subr.bf16.mxu0 %v10004_v1 }
 0x622   :  { %5972 = vmatpush2.bf16.msra.mxu1 %v9999_v49 }
 0x623   :  { %5973 = vmatprep.subr.bf16.mxu1 %v10007_v59 }
 0x624   :  { %6013 = vmatpush2.bf16.msra.mxu0 %v10002_v38 }
 0x625   :  { %6014 = vmatprep.subr.bf16.mxu0 %v10010_v7 }
 0x626   :  { %5974 = vmatpush2.bf16.msra.mxu1 %v10005_v14 }
 0x627   :  { %5975 = vmatprep.subr.bf16.mxu1 %v10013_v17 }
 0x628   :  { %6015 = vmatpush2.bf16.msra.mxu0 %v10008_v24 }
 0x629   :  { %6016 = vmatprep.subr.bf16.mxu0 %v10016_v9 }
 0x62a   :  { %5976 = vmatpush2.bf16.msra.mxu1 %v10011_v10 }
 0x62b   :  { %5977 = vmatprep.subr.bf16.mxu1 %v10019_v41 }
 0x62c   :  { %6017 = vmatpush2.bf16.msra.mxu0 %v10014_v11 }
 0x62d   :  { %6018 = vmatprep.subr.bf16.mxu0 %v10022_v26 }
 0x62e   :  { %5978 = vmatpush2.bf16.msra.mxu1 %v10017_v62 }
 0x62f   :  { %8826 = vmatprep.subr.bf16.mxu1 %v10337_v8 }
 0x630   :  { %6019 = vmatpush2.bf16.msra.mxu0 %v10020_v54 }
 0x631   :  { %v5735_v27 = vpop.f32.mrf.mxu1  ;;  %5980 = vmatmul.mubr.bf16.vlgmr.msra.gmra.mxu1 %v11020_v18  ;;  %8858 = vmatprep.subr.bf16.mxu0 %v10337_v8 }
 0x632   :  { %v5736_v61 = vadd.f32 %v5735_v27, %v2364_v31  ;;  %8827 = vmatpush3.bf16.msra.mxu1 %v10023_v48  ;;  %8834 = vmatprep.mubr.msk.bf16.mxu1 %vm10338_vm0, %v10337_v8 }
 0x633   :  { %v5737_v16 = vpop.f32.mrf.mxu1  ;;  %v5776_v25 = vpop.f32.mrf.mxu0  ;;  %6021 = vmatmul.mubr.bf16.vlgmr.msra.gmra.mxu0 %v11024_v21  ;;  %8828 = vmatprep.subr.bf16.mxu1 %v10337_v8 }
 0x634   :  { %v5738_v32 = vadd.f32 %v5737_v16, %v2368_v5  ;;  %v5777_v13 = vadd.f32 %v5776_v25, %v5736_v61  ;;  %8866 = vmatprep.mubr.msk.bf16.mxu0 %vm10338_vm0, %v10337_v8  ;;  %v2392_v5 = vrot.slane %v2317_v46, %v11044_v58 }
 0x635   :  { %v5739_v18 = vpop.f32.mrf.mxu1  ;;  %v5778_v22 = vpop.f32.mrf.mxu0 }
 0x636   :  { %v5779_v45 = vadd.f32 %v5778_v22, %v5738_v32  ;;  %8829 = vmatpush3.bf16.msra.mxu1 %v10024_v15 }
 0x637   :  { %v5740_v34 = vpop.f32.mrf.mxu1  ;;  %8830 = vmatprep.subr.bf16.mxu1 %v10337_v8  ;;  %v5780_v52 = vpop.f32.mrf.mxu0 }
 0x638   :  { %v6082_v57 = vcombine.low %v5777_v13, %v5779_v45  ;;  %v8426_v34 = vld [vmem:[#allocation13] ss:$0 sm:$0xff] }
 0x639   :  { %v5781_v21 = vpop.f32.mrf.mxu0 }
 0x63a   :  { %v6096_v51 = vrot.slane %v6082_v57, %v10994_v60  ;;  %8831 = vmatpush3.bf16.msra.mxu1 %v10025_v53 }
 0x63b   :  { %8832 = vmatprep.subr.bf16.mxu1 %v10337_v8 }
 0x63c   :  { %v6097_v35 = vcombine.low %v6089_v47, %v6096_v51 }
 0x63e   :  { %6130 = vst [vmem:[#allocation3 + $0x10] sm:$0xff] %v6097_v35  ;;  %8833 = vmatpush3.bf16.msra.mxu1 %v10026_v4  ;;  %v10028_v35 = vld [vmem:[%s11511_s7 + $0x30] sm:$0xff]  }
 0x63f   :  { %8838 = vmatprep.subr.bf16.mxu1 %v10337_v8 }
 0x641   :  { %8835 = vmatmul.mubr.msk.bf16.vlgmr.msra.gmra.mxu1 %vm285_vm15, %v6170_v6  ;;  %v10029_v6 = vld [vmem:[%s11511_s7 + $0x28] sm:$0xff]  }
 0x642   :  { %8854 = vmatprep.mubr.msk.bf16.mxu1 %vm10338_vm0, %v10337_v8  ;;  %8839 = vmatpush3.bf16.msra.mxu1 %v10027_v20 }
 0x643   :  { %8840 = vmatprep.subr.bf16.mxu1 %v10337_v8 }
 0x646   :  { %8841 = vmatpush3.bf16.msra.mxu1 %v10028_v35 }
 0x647   :  { %8842 = vmatprep.subr.bf16.mxu1 %v10337_v8 }
 0x64a   :  { %8843 = vmatpush3.bf16.msra.mxu1 %v10029_v6 }
 0x64b   :  { %8844 = vmatprep.subr.bf16.mxu1 %v10337_v8 }
 0x671   :  { %v5817_v56 = vpop.f32.mrf.mxu1 }
 0x672   :  { %v5818_v33 = vadd.f32 %v5817_v56, %v2372_v50  ;;  %v10030_v50 = vld [vmem:[%s11511_s7 + $0x20] sm:$0xff]   ;;  %v10032_v56 = vld [vmem:[%s11511_s7 + $0x10] sm:$0xff]  }
 0x673   :  { %v5819_v29 = vpop.f32.mrf.mxu1  ;;  %v5858_v37 = vpop.f32.mrf.mxu0  ;;  %8845 = vmatpush3.bf16.msra.mxu1 %v10030_v50 }
 0x674   :  { %v5820_v36 = vadd.f32 %v5819_v29, %v2376_v30  ;;  %v5859_v12 = vadd.f32 %v5858_v37, %v5818_v33  ;;  %v10031_v30 = vld [vmem:[%s11511_s7 + $0x18] sm:$0xff]   ;;  %8846 = vmatprep.subr.bf16.mxu1 %v10337_v8  ;;  %v10033_v33 = vld [vmem:[%s11511_s7 + $0x8] sm:$0xff]   ;;  %v10034_v29 = vld [vmem:[%s11511_s7] sm:$0xff]  }
 0x675   :  { %v5821_v63 = vpop.f32.mrf.mxu1  ;;  %v5860_v0 = vpop.f32.mrf.mxu0 }
 0x676   :  { %v5861_v1 = vadd.f32 %v5860_v0, %v5820_v36 }
 0x677   :  { %v5822_v49 = vpop.f32.mrf.mxu1  ;;  %v5862_v3 = vpop.f32.mrf.mxu0  ;;  %8847 = vmatpush3.bf16.msra.mxu1 %v10031_v30 }
 0x678   :  { %v6098_v59 = vcombine.low %v5859_v12, %v5861_v1  ;;  %8848 = vmatprep.subr.bf16.mxu1 %v10337_v8 }
 0x679   :  { %v5863_v38 = vpop.f32.mrf.mxu0 }
 0x67a   :  { %v6106_v48 = vrot.slane %v6098_v59, %v10994_v60 }
 0x67b   :  { %8849 = vmatpush3.bf16.msra.mxu1 %v10032_v56 }
 0x67c   :  { %8850 = vmatprep.subr.bf16.mxu1 %v10337_v8 }
 0x67f   :  { %8851 = vmatpush3.bf16.msra.mxu1 %v10033_v33 }
 0x680   :  { %8852 = vmatprep.subr.bf16.mxu1 %v10337_v8 }
 0x683   :  { %8853 = vmatpush3.bf16.msra.mxu1 %v10034_v29 }
 0x684   :  { %8890 = vmatprep.subr.bf16.mxu1 %v10337_v8 }
 0x6b1   :  { %v5899_v7 = vpop.f32.mrf.mxu1 }
 0x6b2   :  { %v5900_v14 = vadd.f32 %v5899_v7, %v2380_v43  ;;  %v6134_v43 = vld [vmem:[#allocation3 + $0x2] sm:$0x3]  ;;  %v6135_v7 = vld [vmem:[#allocation3 + $0x4] sm:$0x3] }
 0x6b3   :  { %v5901_v19 = vpop.f32.mrf.mxu1  ;;  %v5940_v17 = vpop.f32.mrf.mxu0 }
 0x6b4   :  { %v5902_v24 = vadd.f32 %v5901_v19, %v2384_v39  ;;  %v5941_v9 = vadd.f32 %v5940_v17, %v5900_v14 }
 0x6b5   :  { %v5903_v10 = vpop.f32.mrf.mxu1  ;;  %v5942_v41 = vpop.f32.mrf.mxu0 }
 0x6b6   :  { %v5943_v11 = vadd.f32 %v5942_v41, %v5902_v24  ;;  %v8432_v41 = vld [vmem:[#allocation13 + $0x6] ss:$0 sm:$0xff] }
 0x6b7   :  { %v5904_v26 = vpop.f32.mrf.mxu1  ;;  %v5944_v62 = vpop.f32.mrf.mxu0 }
 0x6b8   :  { %v6099_v54 = vcombine.low %v5941_v9, %v5943_v11 }
 0x6b9   :  { %v5945_v31 = vpop.f32.mrf.mxu0 }
 0x6ba   :  { %v6113_v44 = vrot.slane %v6099_v54, %v10994_v60 }
 0x6bc   :  { %v6114_v2 = vcombine.low %v6106_v48, %v6113_v44 }
 0x6be   :  { %6131 = vst [vmem:[#allocation3 + $0x18] sm:$0xff] %v6114_v2 }
 0x6f1   :  { %v5981_v27 = vpop.f32.mrf.mxu1 }
 0x6f2   :  { %v5982_v61 = vadd.f32 %v5981_v27, %v2388_v23  ;;  %v6385_v23 = vld [vmem:[#allocation3 + $0x6] sm:$0x3]  ;;  %v10035_v27 = vld [vmem:[#allocation11 + $0x38] sm:$0xff]  }
 0x6f3   :  { %v5983_v15 = vpop.f32.mrf.mxu1  ;;  %v6022_v16 = vpop.f32.mrf.mxu0  ;;  %8859 = vmatpush3.bf16.msra.mxu0 %v10035_v27 }
 0x6f4   :  { %v5984_v25 = vadd.f32 %v5983_v15, %v2392_v5  ;;  %v6023_v28 = vadd.f32 %v6022_v16, %v5982_v61  ;;  %v6411_v5 = vrot.slane %v6385_v23, %v10994_v60  ;;  %8860 = vmatprep.subr.bf16.mxu0 %v10337_v8  ;;  %v10037_v61 = vld [vmem:[#allocation11 + $0x28] sm:$0xff]   ;;  %v10038_v15 = vld [vmem:[#allocation11 + $0x20] sm:$0xff]  }
 0x6f5   :  { %v5985_v32 = vpop.f32.mrf.mxu1  ;;  %v6024_v13 = vpop.f32.mrf.mxu0 }
 0x6f6   :  { %v6025_v18 = vadd.f32 %v6024_v13, %v5984_v25 }
 0x6f7   :  { %v5986_v22 = vpop.f32.mrf.mxu1  ;;  %v6026_v45 = vpop.f32.mrf.mxu0 }
 0x6f8   :  { %v6115_v53 = vcombine.low %v6023_v28, %v6025_v18 }
 0x6f9   :  { %v6027_v40 = vpop.f32.mrf.mxu0 }
 0x6fa   :  { %8425 = vst.sshfl [vmem:[#allocation3 + $0x20] sm:$0x33 pattern:$0x76325410] %v6115_v53 }
 0x701   :  { %v6245_v52 = vpop.f32.mrf.mxu1 }
 0x702   :  { %v6246_v55 = vadd.f32 %v8426_v34, %v6245_v52 }
 0x703   :  { %v8836_v57 = vpop.f32.mrf.mxu1 }
 0x704   :  { %v6252_v58 = vsel %vm6251_vm12, %v6246_v55, 0.0  ;;  %v6257_v21 = vmul.f32 %v6246_v55, %v6246_v55 }
 0x705   :  { %6253 = vadd.xlane.f32.xlu1 %v6252_v58  ;;  %v6248_v47 = vpop.f32.mrf.mxu1 }
 0x706   :  { %v6258_v51 = vsel %vm6251_vm12, %v6257_v21, 0.0 }
 0x707   :  { %6259 = vadd.xlane.f32.xlu0 %v6258_v51  ;;  %v8837_v4 = vpop.f32.mrf.mxu1 }
 0x708   :  { %v8441_v4 = vld [vmem:[#allocation13 + $0x1] ss:$0 sm:$0xff] }
 0x78e   :  { %v6254_v37 = vpop.xlane.xlu1 %6253 }
 0x78f   :  { %v6256_v36 = vmul.f32 0.0078125, %v6254_v37  ;;  %v10039_v37 = vld [vmem:[%s11511_s7 + $0x78] sm:$0xff]  }
 0x790   :  { %v6260_v12 = vpop.xlane.xlu0 %6259 }
 0x791   :  { %v6262_v63 = vmul.f32 %v6256_v36, %v6256_v36  ;;  %v6261_v0 = vmul.f32 0.0078125, %v6260_v12  ;;  %v6264_v3 = vsub.f32 %v6246_v55, %v6256_v36  ;;  %v10040_v36 = vld [vmem:[%s11511_s7 + $0x70] sm:$0xff]   ;;  %v10041_v12 = vld [vmem:[%s11511_s7 + $0x68] sm:$0xff]  }
 0x793   :  { %v6263_v1 = vsub.f32 %v6261_v0, %v6262_v63  ;;  %v10042_v63 = vld [vmem:[%s11511_s7 + $0x60] sm:$0xff]   ;;  %v10043_v0 = vld [vmem:[%s11511_s7 + $0x58] sm:$0xff]  }
 0x795   :  { %v6265_v49 = vadd.f32 1e-05, %v6263_v1  ;;  %v10044_v1 = vld [vmem:[%s11511_s7 + $0x50] sm:$0xff]  }
 0x797   :  { %10103 = vrsqrt.f32 %v6265_v49  ;;  %v10045_v49 = vld [vmem:[%s11511_s7 + $0x48] sm:$0xff]  }
 0x7a4   :  { %v10104_v59 = vpop.eup %10103 }
 0x7a5   :  { %v6267_v38 = vmul.f32 %v10104_v59, %v6264_v3  ;;  %v10046_v3 = vld [vmem:[%s11511_s7 + $0x40] sm:$0xff]  }
 0x7a7   :  { %v6268_v39 = vmul.f32 %v6267_v38, %v6134_v43 }
 0x7a9   :  { %v6269_v14 = vadd.f32 %v6268_v39, %v6135_v7 }
 0x7ab   :  { %v6270_v19 = vmul.f32 0.5, %v6269_v14 }
 0x7ad   :  { %10105 = vtanh.f32 %v6270_v19 }
 0x7ba   :  { %v10106_v17 = vpop.eup %10105 }
 0x7bb   :  { %v6272_v24 = vadd.f32 1.0, %v10106_v17 }
 0x7bd   :  { %v6273_v9 = vmul.f32 %v6272_v24, %v6270_v19 }
 0x7bf   :  { %v6274_v10 = vpack.c.bf16 %v6273_v9, %v6273_v9 }
 0x7c1   :  { %8855 = vmatmul.mubr.bf16.vlgmr.msra.gmra.mxu1 %v6274_v10  ;;  %v6386_v10 = vld [vmem:[#allocation3 + $0x8] sm:$0x3] }
 0x7c2   :  { %8898 = vmatprep.mubr.msk.bf16.mxu1 %vm10338_vm0, %v10337_v8 }
 0x881   :  { %v6378_v11 = vpop.f32.mrf.mxu1 }
 0x882   :  { %v6379_v26 = vadd.f32 %v8432_v41, %v6378_v11  ;;  %v6387_v11 = vld [vmem:[#allocation3 + $0xa] sm:$0x3] }
 0x883   :  { %v8856_v62 = vpop.f32.mrf.mxu1 }
 0x884   :  { %v11216_v54 = vadd.f32 %v6379_v26, %v10987_v42  ;;  %v10036_v42 = vld [vmem:[#allocation11 + $0x30] sm:$0xff]  }
 0x885   :  { %v6381_v31 = vpop.f32.mrf.mxu1  ;;  %8861 = vmatpush3.bf16.msra.mxu0 %v10036_v42 }
 0x886   :  { %v6388_v48 = vsel %vm6136_vm11, %v11216_v54, 0.0  ;;  %v6392_v44 = vmul.f32 %v11216_v54, %v11216_v54  ;;  %8862 = vmatprep.subr.bf16.mxu0 %v10337_v8 }
 0x887   :  { %6389 = vadd.xlane.f32.xlu0 %v6388_v48  ;;  %v8857_v2 = vpop.f32.mrf.mxu1 }
 0x888   :  { %v6393_v46 = vsel %vm6136_vm11, %v6392_v44, 0.0 }
 0x889   :  { %8863 = vmatpush3.bf16.msra.mxu0 %v10037_v61 }
 0x88a   :  { %8864 = vmatprep.subr.bf16.mxu0 %v10337_v8 }
 0x88b   :  { %6394 = vadd.xlane.f32.xlu0 %v6393_v46  ;;  %v8463_v46 = vld [vmem:[#allocation13 + $0x7] ss:$0 sm:$0xff] }
 0x88d   :  { %8865 = vmatpush3.bf16.msra.mxu0 %v10038_v15 }
 0x88e   :  { %8870 = vmatprep.subr.bf16.mxu0 %v10337_v8 }
 0x8a1   :  { %6412 = vrot.lane.b32.xlu0 %v6411_v5, %s10328_s27 }
 0x910   :  { %v6390_v16 = vpop.xlane.xlu0 %6389 }
 0x911   :  { %v6391_v25 = vmul.f32 0.015625, %v6390_v16 }
 0x913   :  { %v6397_v32 = vmul.f32 %v6391_v25, %v6391_v25  ;;  %v6399_v45 = vsub.f32 %v11216_v54, %v6391_v25 }
 0x914   :  { %v6395_v28 = vpop.xlane.xlu0 %6394 }
 0x915   :  { %v6396_v13 = vmul.f32 0.015625, %v6395_v28 }
 0x917   :  { %v6398_v18 = vsub.f32 %v6396_v13, %v6397_v32  ;;  %v6635_v32 = vld [vmem:[#allocation3 + $0xc] sm:$0x3] }
 0x918   :  { %v6413_v52 = vpop.permute.xlu0 %6412  ;;  %v6661_v13 = vrot.slane %v6635_v32, %v10994_v60 }
 0x919   :  { %v6400_v22 = vadd.f32 1e-05, %v6398_v18  ;;  %v10047_v18 = vld [vmem:[#allocation11 + $0x58] sm:$0xff]  }
 0x91a   :  { %8891 = vmatpush3.bf16.msra.mxu1 %v10047_v18 }
 0x91b   :  { %10107 = vrsqrt.f32 %v6400_v22  ;;  %8892 = vmatprep.subr.bf16.mxu1 %v10337_v8  ;;  %v10049_v22 = vld [vmem:[#allocation11 + $0x48] sm:$0xff]  }
 0x928   :  { %v10108_v53 = vpop.eup %10107 }
 0x929   :  { %v6402_v40 = vmul.f32 %v10108_v53, %v6399_v45  ;;  %v10050_v45 = vld [vmem:[#allocation11 + $0x40] sm:$0xff]  }
 0x92b   :  { %v6403_v34 = vmul.f32 %v6402_v40, %v6385_v23 }
 0x92d   :  { %v6415_v55 = vadd.f32 %v6413_v52, %v6403_v34 }
 0x92f   :  { %v6416_v57 = vmul.f32 0.5, %v6415_v55 }
 0x931   :  { %10109 = vtanh.f32 %v6416_v57 }
 0x93e   :  { %v10110_v58 = vpop.eup %10109 }
 0x93f   :  { %v6418_v21 = vadd.f32 1.0, %v10110_v58 }
 0x941   :  { %v6419_v47 = vmul.f32 %v6418_v21, %v6416_v57 }
 0x943   :  { %v6420_v51 = vpack.c.bf16 %v6419_v47, %v6419_v47 }
 0x945   :  { %8867 = vmatmul.mubr.msk.bf16.vlgmr.msra.gmra.mxu0 %vm285_vm15, %v6420_v51 }
 0x946   :  { %8886 = vmatprep.mubr.msk.bf16.mxu0 %vm10338_vm0, %v10337_v8  ;;  %8871 = vmatpush3.bf16.msra.mxu0 %v10039_v37 }
 0x947   :  { %8872 = vmatprep.subr.bf16.mxu0 %v10337_v8 }
 0x94a   :  { %8873 = vmatpush3.bf16.msra.mxu0 %v10040_v36 }
 0x94b   :  { %8874 = vmatprep.subr.bf16.mxu0 %v10337_v8 }
 0x94e   :  { %8875 = vmatpush3.bf16.msra.mxu0 %v10041_v12 }
 0x94f   :  { %8876 = vmatprep.subr.bf16.mxu0 %v10337_v8 }
 0x952   :  { %8877 = vmatpush3.bf16.msra.mxu0 %v10042_v63 }
 0x953   :  { %8878 = vmatprep.subr.bf16.mxu0 %v10337_v8 }
 0x956   :  { %8879 = vmatpush3.bf16.msra.mxu0 %v10043_v0 }
 0x957   :  { %8880 = vmatprep.subr.bf16.mxu0 %v10337_v8 }
 0x95a   :  { %8881 = vmatpush3.bf16.msra.mxu0 %v10044_v1 }
 0x95b   :  { %8882 = vmatprep.subr.bf16.mxu0 %v10337_v8 }
 0x95e   :  { %8883 = vmatpush3.bf16.msra.mxu0 %v10045_v49 }
 0x95f   :  { %8884 = vmatprep.subr.bf16.mxu0 %v10337_v8 }
 0x962   :  { %8885 = vmatpush3.bf16.msra.mxu0 %v10046_v3 }
 0x963   :  { %8922 = vmatprep.subr.bf16.mxu0 %v10337_v8 }
 0xa05   :  { %v6496_v20 = vpop.f32.mrf.mxu0 }
 0xa06   :  { %v6497_v35 = vadd.f32 %v8441_v4, %v6496_v20 }
 0xa07   :  { %v8868_v6 = vpop.f32.mrf.mxu0 }
 0xa08   :  { %v6502_v50 = vsel %vm6251_vm12, %v6497_v35, 0.0  ;;  %v6506_v30 = vmul.f32 %v6497_v35, %v6497_v35 }
 0xa09   :  { %6503 = vadd.xlane.f32.xlu1 %v6502_v50  ;;  %v6499_v56 = vpop.f32.mrf.mxu0 }
 0xa0a   :  { %v6507_v33 = vsel %vm6251_vm12, %v6506_v30, 0.0 }
 0xa0b   :  { %6508 = vadd.xlane.f32.xlu0 %v6507_v33  ;;  %v8869_v29 = vpop.f32.mrf.mxu0 }
 0xa0c   :  { %v8472_v29 = vld [vmem:[#allocation13 + $0x2] ss:$0 sm:$0xff] }
 0xa92   :  { %v6504_v59 = vpop.xlane.xlu1 %6503 }
 0xa93   :  { %v6505_v38 = vmul.f32 0.0078125, %v6504_v59  ;;  %v10051_v59 = vld [vmem:[%s11511_s7 + $0xb8] sm:$0xff]  }
 0xa94   :  { %v6509_v43 = vpop.xlane.xlu0 %6508 }
 0xa95   :  { %v6511_v39 = vmul.f32 %v6505_v38, %v6505_v38  ;;  %v6510_v7 = vmul.f32 0.0078125, %v6509_v43  ;;  %v6513_v17 = vsub.f32 %v6497_v35, %v6505_v38  ;;  %v10052_v38 = vld [vmem:[%s11511_s7 + $0xb0] sm:$0xff]   ;;  %v10053_v43 = vld [vmem:[%s11511_s7 + $0xa8] sm:$0xff]  }
 0xa97   :  { %v6512_v14 = vsub.f32 %v6510_v7, %v6511_v39  ;;  %v10054_v39 = vld [vmem:[%s11511_s7 + $0xa0] sm:$0xff]   ;;  %v10055_v7 = vld [vmem:[%s11511_s7 + $0x98] sm:$0xff]  }
 0xa99   :  { %v6514_v19 = vadd.f32 1e-05, %v6512_v14  ;;  %v10056_v14 = vld [vmem:[%s11511_s7 + $0x90] sm:$0xff]  }
 0xa9b   :  { %10111 = vrsqrt.f32 %v6514_v19  ;;  %v10057_v19 = vld [vmem:[%s11511_s7 + $0x88] sm:$0xff]  }
 0xaa8   :  { %v10112_v24 = vpop.eup %10111 }
 0xaa9   :  { %v6516_v9 = vmul.f32 %v10112_v24, %v6513_v17  ;;  %v10058_v17 = vld [vmem:[%s11511_s7 + $0x80] sm:$0xff]  }
 0xaab   :  { %v6517_v41 = vmul.f32 %v6516_v9, %v6386_v10 }
 0xaad   :  { %v6518_v26 = vadd.f32 %v6517_v41, %v6387_v11 }
 0xaaf   :  { %v6519_v62 = vmul.f32 0.5, %v6518_v26 }
 0xab1   :  { %10113 = vtanh.f32 %v6519_v62 }
 0xabe   :  { %v10114_v31 = vpop.eup %10113 }
 0xabf   :  { %v6521_v48 = vadd.f32 1.0, %v10114_v31 }
 0xac1   :  { %v6522_v44 = vmul.f32 %v6521_v48, %v6519_v62 }
 0xac3   :  { %v6523_v2 = vpack.c.bf16 %v6522_v44, %v6522_v44 }
 0xac5   :  { %8887 = vmatmul.mubr.bf16.vlgmr.msra.gmra.mxu0 %v6523_v2  ;;  %v6636_v2 = vld [vmem:[#allocation3 + $0xe] sm:$0x3] }
 0xac6   :  { %8930 = vmatprep.mubr.msk.bf16.mxu0 %vm10338_vm0, %v10337_v8 }
 0xb85   :  { %v6628_v23 = vpop.f32.mrf.mxu0 }
 0xb86   :  { %v6629_v5 = vadd.f32 %v8463_v46, %v6628_v23  ;;  %v6637_v23 = vld [vmem:[#allocation3 + $0x10] sm:$0x3] }
 0xb87   :  { %v8888_v27 = vpop.f32.mrf.mxu0 }
 0xb88   :  { %v11270_v42 = vadd.f32 %v6629_v5, %v11216_v54  ;;  %v10048_v54 = vld [vmem:[#allocation11 + $0x50] sm:$0xff]  }
 0xb89   :  { %v6631_v61 = vpop.f32.mrf.mxu0  ;;  %8893 = vmatpush3.bf16.msra.mxu1 %v10048_v54 }
 0xb8a   :  { %v6638_v15 = vsel %vm6136_vm11, %v11270_v42, 0.0  ;;  %v6642_v16 = vmul.f32 %v11270_v42, %v11270_v42  ;;  %8894 = vmatprep.subr.bf16.mxu1 %v10337_v8 }
 0xb8b   :  { %6639 = vadd.xlane.f32.xlu1 %v6638_v15  ;;  %v8889_v25 = vpop.f32.mrf.mxu0 }
 0xb8c   :  { %v6643_v28 = vsel %vm6136_vm11, %v6642_v16, 0.0 }
 0xb8d   :  { %8895 = vmatpush3.bf16.msra.mxu1 %v10049_v22 }
 0xb8e   :  { %8896 = vmatprep.subr.bf16.mxu1 %v10337_v8 }
 0xb8f   :  { %6644 = vadd.xlane.f32.xlu1 %v6643_v28  ;;  %v8494_v28 = vld [vmem:[#allocation13 + $0x8] ss:$0 sm:$0xff] }
 0xb91   :  { %8897 = vmatpush3.bf16.msra.mxu1 %v10050_v45 }
 0xb92   :  { %8902 = vmatprep.subr.bf16.mxu1 %v10337_v8 }
 0xba0   :  { %6662 = vrot.lane.b32.xlu1 %v6661_v13, %s10328_s27 }
 0xc14   :  { %v6640_v53 = vpop.xlane.xlu1 %6639 }
 0xc15   :  { %v6641_v40 = vmul.f32 0.015625, %v6640_v53 }
 0xc17   :  { %v6647_v52 = vmul.f32 %v6641_v40, %v6641_v40  ;;  %v6649_v21 = vsub.f32 %v11270_v42, %v6641_v40 }
 0xc18   :  { %v6645_v34 = vpop.xlane.xlu1 %6644 }
 0xc19   :  { %v6646_v55 = vmul.f32 0.015625, %v6645_v34 }
 0xc1b   :  { %v6648_v57 = vsub.f32 %v6646_v55, %v6647_v52  ;;  %v6885_v52 = vld [vmem:[#allocation3 + $0x12] sm:$0x3] }
 0xc1c   :  { %v6663_v20 = vpop.permute.xlu1 %6662  ;;  %v6911_v55 = vrot.slane %v6885_v52, %v10994_v60 }
 0xc1d   :  { %v6650_v58 = vadd.f32 1e-05, %v6648_v57  ;;  %v10059_v57 = vld [vmem:[#allocation11 + $0x78] sm:$0xff]  }
 0xc1e   :  { %8923 = vmatpush3.bf16.msra.mxu0 %v10059_v57 }
 0xc1f   :  { %10115 = vrsqrt.f32 %v6650_v58  ;;  %8924 = vmatprep.subr.bf16.mxu0 %v10337_v8  ;;  %v10061_v58 = vld [vmem:[#allocation11 + $0x68] sm:$0xff]  }
 0xc2c   :  { %v10116_v47 = vpop.eup %10115 }
 0xc2d   :  { %v6652_v51 = vmul.f32 %v10116_v47, %v6649_v21  ;;  %v10062_v21 = vld [vmem:[#allocation11 + $0x60] sm:$0xff]  }
 0xc2f   :  { %v6653_v4 = vmul.f32 %v6652_v51, %v6635_v32 }
 0xc31   :  { %v6665_v35 = vadd.f32 %v6663_v20, %v6653_v4 }
 0xc33   :  { %v6666_v6 = vmul.f32 0.5, %v6665_v35 }
 0xc35   :  { %10117 = vtanh.f32 %v6666_v6 }
 0xc42   :  { %v10118_v50 = vpop.eup %10117 }
 0xc43   :  { %v6668_v30 = vadd.f32 1.0, %v10118_v50 }
 0xc45   :  { %v6669_v56 = vmul.f32 %v6668_v30, %v6666_v6 }
 0xc47   :  { %v6670_v33 = vpack.c.bf16 %v6669_v56, %v6669_v56 }
 0xc49   :  { %8899 = vmatmul.mubr.msk.bf16.vlgmr.msra.gmra.mxu1 %vm285_vm15, %v6670_v33 }
 0xc4a   :  { %8918 = vmatprep.mubr.msk.bf16.mxu1 %vm10338_vm0, %v10337_v8  ;;  %8903 = vmatpush3.bf16.msra.mxu1 %v10051_v59 }
 0xc4b   :  { %8904 = vmatprep.subr.bf16.mxu1 %v10337_v8 }
 0xc4e   :  { %8905 = vmatpush3.bf16.msra.mxu1 %v10052_v38 }
 0xc4f   :  { %8906 = vmatprep.subr.bf16.mxu1 %v10337_v8 }
 0xc52   :  { %8907 = vmatpush3.bf16.msra.mxu1 %v10053_v43 }
 0xc53   :  { %8908 = vmatprep.subr.bf16.mxu1 %v10337_v8 }
 0xc56   :  { %8909 = vmatpush3.bf16.msra.mxu1 %v10054_v39 }
 0xc57   :  { %8910 = vmatprep.subr.bf16.mxu1 %v10337_v8 }
 0xc5a   :  { %8911 = vmatpush3.bf16.msra.mxu1 %v10055_v7 }
 0xc5b   :  { %8912 = vmatprep.subr.bf16.mxu1 %v10337_v8 }
 0xc5e   :  { %8913 = vmatpush3.bf16.msra.mxu1 %v10056_v14 }
 0xc5f   :  { %8914 = vmatprep.subr.bf16.mxu1 %v10337_v8 }
 0xc62   :  { %8915 = vmatpush3.bf16.msra.mxu1 %v10057_v19 }
 0xc63   :  { %8916 = vmatprep.subr.bf16.mxu1 %v10337_v8 }
 0xc66   :  { %8917 = vmatpush3.bf16.msra.mxu1 %v10058_v17 }
 0xc67   :  { %8954 = vmatprep.subr.bf16.mxu1 %v10337_v8 }
 0xd09   :  { %v6746_v37 = vpop.f32.mrf.mxu1 }
 0xd0a   :  { %v6747_v36 = vadd.f32 %v8472_v29, %v6746_v37 }
 0xd0b   :  { %v8900_v12 = vpop.f32.mrf.mxu1 }
 0xd0c   :  { %v6752_v63 = vsel %vm6251_vm12, %v6747_v36, 0.0  ;;  %v6756_v0 = vmul.f32 %v6747_v36, %v6747_v36 }
 0xd0d   :  { %6753 = vadd.xlane.f32.xlu1 %v6752_v63  ;;  %v6749_v1 = vpop.f32.mrf.mxu1 }
 0xd0e   :  { %v6757_v49 = vsel %vm6251_vm12, %v6756_v0, 0.0 }
 0xd0f   :  { %6758 = vadd.xlane.f32.xlu0 %v6757_v49  ;;  %v8901_v3 = vpop.f32.mrf.mxu1 }
 0xd10   :  { %v8503_v3 = vld [vmem:[#allocation13 + $0x3] ss:$0 sm:$0xff] }
 0xd96   :  { %v6754_v24 = vpop.xlane.xlu1 %6753 }
 0xd97   :  { %v6755_v9 = vmul.f32 0.0078125, %v6754_v24  ;;  %v10063_v24 = vld [vmem:[%s11511_s7 + $0xf8] sm:$0xff]  }
 0xd98   :  { %v6759_v10 = vpop.xlane.xlu0 %6758 }
 0xd99   :  { %v6761_v41 = vmul.f32 %v6755_v9, %v6755_v9  ;;  %v6760_v11 = vmul.f32 0.0078125, %v6759_v10  ;;  %v6763_v31 = vsub.f32 %v6747_v36, %v6755_v9  ;;  %v10064_v9 = vld [vmem:[%s11511_s7 + $0xf0] sm:$0xff]   ;;  %v10065_v10 = vld [vmem:[%s11511_s7 + $0xe8] sm:$0xff]  }
 0xd9b   :  { %v6762_v26 = vsub.f32 %v6760_v11, %v6761_v41  ;;  %v10066_v41 = vld [vmem:[%s11511_s7 + $0xe0] sm:$0xff]   ;;  %v10067_v11 = vld [vmem:[%s11511_s7 + $0xd8] sm:$0xff]  }
 0xd9d   :  { %v6764_v62 = vadd.f32 1e-05, %v6762_v26  ;;  %v10068_v26 = vld [vmem:[%s11511_s7 + $0xd0] sm:$0xff]  }
 0xd9f   :  { %10119 = vrsqrt.f32 %v6764_v62  ;;  %v10069_v62 = vld [vmem:[%s11511_s7 + $0xc8] sm:$0xff]  }
 0xdac   :  { %v10120_v48 = vpop.eup %10119 }
 0xdad   :  { %v6766_v44 = vmul.f32 %v10120_v48, %v6763_v31  ;;  %v10070_v31 = vld [vmem:[%s11511_s7 + $0xc0] sm:$0xff]  }
 0xdaf   :  { %v6767_v46 = vmul.f32 %v6766_v44, %v6636_v2 }
 0xdb1   :  { %v6768_v5 = vadd.f32 %v6767_v46, %v6637_v23 }
 0xdb3   :  { %v6769_v27 = vmul.f32 0.5, %v6768_v5 }
 0xdb5   :  { %10121 = vtanh.f32 %v6769_v27 }
 0xdc2   :  { %v10122_v61 = vpop.eup %10121 }
 0xdc3   :  { %v6771_v15 = vadd.f32 1.0, %v10122_v61 }
 0xdc5   :  { %v6772_v16 = vmul.f32 %v6771_v15, %v6769_v27 }
 0xdc7   :  { %v6773_v25 = vpack.c.bf16 %v6772_v16, %v6772_v16 }
 0xdc9   :  { %8919 = vmatmul.mubr.bf16.vlgmr.msra.gmra.mxu1 %v6773_v25  ;;  %v6886_v25 = vld [vmem:[#allocation3 + $0x14] sm:$0x3] }
 0xdca   :  { %8962 = vmatprep.mubr.msk.bf16.mxu1 %vm10338_vm0, %v10337_v8 }
 0xe89   :  { %v6878_v32 = vpop.f32.mrf.mxu1 }
 0xe8a   :  { %v6879_v13 = vadd.f32 %v8494_v28, %v6878_v32  ;;  %v6887_v32 = vld [vmem:[#allocation3 + $0x16] sm:$0x3] }
 0xe8b   :  { %v8920_v18 = vpop.f32.mrf.mxu1 }
 0xe8c   :  { %v11324_v54 = vadd.f32 %v6879_v13, %v11270_v42  ;;  %v10060_v42 = vld [vmem:[#allocation11 + $0x70] sm:$0xff]  }
 0xe8d   :  { %v6881_v22 = vpop.f32.mrf.mxu1  ;;  %8925 = vmatpush3.bf16.msra.mxu0 %v10060_v42 }
 0xe8e   :  { %v6888_v45 = vsel %vm6136_vm11, %v11324_v54, 0.0  ;;  %v6892_v53 = vmul.f32 %v11324_v54, %v11324_v54  ;;  %8926 = vmatprep.subr.bf16.mxu0 %v10337_v8 }
 0xe8f   :  { %6889 = vadd.xlane.f32.xlu0 %v6888_v45  ;;  %v8921_v40 = vpop.f32.mrf.mxu1 }
 0xe90   :  { %v6893_v34 = vsel %vm6136_vm11, %v6892_v53, 0.0 }
 0xe91   :  { %8927 = vmatpush3.bf16.msra.mxu0 %v10061_v58 }
 0xe92   :  { %8928 = vmatprep.subr.bf16.mxu0 %v10337_v8 }
 0xe93   :  { %6894 = vadd.xlane.f32.xlu0 %v6893_v34  ;;  %v8525_v34 = vld [vmem:[#allocation13 + $0x9] ss:$0 sm:$0xff] }
 0xe95   :  { %8929 = vmatpush3.bf16.msra.mxu0 %v10062_v21 }
 0xe96   :  { %8934 = vmatprep.subr.bf16.mxu0 %v10337_v8 }
 0xea9   :  { %6912 = vrot.lane.b32.xlu0 %v6911_v55, %s10328_s27 }
 0xf18   :  { %v6890_v47 = vpop.xlane.xlu0 %6889 }
 0xf19   :  { %v6891_v51 = vmul.f32 0.015625, %v6890_v47 }
 0xf1b   :  { %v6897_v20 = vmul.f32 %v6891_v51, %v6891_v51  ;;  %v6899_v30 = vsub.f32 %v11324_v54, %v6891_v51 }
 0xf1c   :  { %v6895_v4 = vpop.xlane.xlu0 %6894 }
 0xf1d   :  { %v6896_v35 = vmul.f32 0.015625, %v6895_v4 }
 0xf1f   :  { %v6898_v6 = vsub.f32 %v6896_v35, %v6897_v20  ;;  %v7135_v20 = vld [vmem:[#allocation3 + $0x18] sm:$0x3] }
 0xf20   :  { %v6913_v37 = vpop.permute.xlu0 %6912  ;;  %v7161_v35 = vrot.slane %v7135_v20, %v10994_v60 }
 0xf21   :  { %v6900_v50 = vadd.f32 1e-05, %v6898_v6  ;;  %v10071_v6 = vld [vmem:[#allocation11 + $0x98] sm:$0xff]  }
 0xf22   :  { %8955 = vmatpush3.bf16.msra.mxu1 %v10071_v6 }
 0xf23   :  { %10123 = vrsqrt.f32 %v6900_v50  ;;  %8956 = vmatprep.subr.bf16.mxu1 %v10337_v8  ;;  %v10073_v50 = vld [vmem:[#allocation11 + $0x88] sm:$0xff]  }
 0xf30   :  { %v10124_v56 = vpop.eup %10123 }
 0xf31   :  { %v6902_v33 = vmul.f32 %v10124_v56, %v6899_v30  ;;  %v10074_v30 = vld [vmem:[#allocation11 + $0x80] sm:$0xff]  }
 0xf33   :  { %v6903_v29 = vmul.f32 %v6902_v33, %v6885_v52 }
 0xf35   :  { %v6915_v36 = vadd.f32 %v6913_v37, %v6903_v29 }
 0xf37   :  { %v6916_v12 = vmul.f32 0.5, %v6915_v36 }
 0xf39   :  { %10125 = vtanh.f32 %v6916_v12 }
 0xf46   :  { %v10126_v63 = vpop.eup %10125 }
 0xf47   :  { %v6918_v0 = vadd.f32 1.0, %v10126_v63 }
 0xf49   :  { %v6919_v1 = vmul.f32 %v6918_v0, %v6916_v12 }
 0xf4b   :  { %v6920_v49 = vpack.c.bf16 %v6919_v1, %v6919_v1 }
 0xf4d   :  { %8931 = vmatmul.mubr.msk.bf16.vlgmr.msra.gmra.mxu0 %vm285_vm15, %v6920_v49 }
 0xf4e   :  { %8950 = vmatprep.mubr.msk.bf16.mxu0 %vm10338_vm0, %v10337_v8  ;;  %8935 = vmatpush3.bf16.msra.mxu0 %v10063_v24 }
 0xf4f   :  { %8936 = vmatprep.subr.bf16.mxu0 %v10337_v8 }
 0xf52   :  { %8937 = vmatpush3.bf16.msra.mxu0 %v10064_v9 }
 0xf53   :  { %8938 = vmatprep.subr.bf16.mxu0 %v10337_v8 }
 0xf56   :  { %8939 = vmatpush3.bf16.msra.mxu0 %v10065_v10 }
 0xf57   :  { %8940 = vmatprep.subr.bf16.mxu0 %v10337_v8 }
 0xf5a   :  { %8941 = vmatpush3.bf16.msra.mxu0 %v10066_v41 }
 0xf5b   :  { %8942 = vmatprep.subr.bf16.mxu0 %v10337_v8 }
 0xf5e   :  { %8943 = vmatpush3.bf16.msra.mxu0 %v10067_v11 }
 0xf5f   :  { %8944 = vmatprep.subr.bf16.mxu0 %v10337_v8 }
 0xf62   :  { %8945 = vmatpush3.bf16.msra.mxu0 %v10068_v26 }
 0xf63   :  { %8946 = vmatprep.subr.bf16.mxu0 %v10337_v8 }
 0xf66   :  { %8947 = vmatpush3.bf16.msra.mxu0 %v10069_v62 }
 0xf67   :  { %8948 = vmatprep.subr.bf16.mxu0 %v10337_v8 }
 0xf6a   :  { %8949 = vmatpush3.bf16.msra.mxu0 %v10070_v31 }
 0xf6b   :  { %8986 = vmatprep.subr.bf16.mxu0 %v10337_v8 }
0x100d   :  { %v6996_v59 = vpop.f32.mrf.mxu0 }
0x100e   :  { %v6997_v38 = vadd.f32 %v8503_v3, %v6996_v59 }
0x100f   :  { %v8932_v43 = vpop.f32.mrf.mxu0 }
0x1010   :  { %v7002_v39 = vsel %vm6251_vm12, %v6997_v38, 0.0  ;;  %v7006_v7 = vmul.f32 %v6997_v38, %v6997_v38 }
0x1011   :  { %7003 = vadd.xlane.f32.xlu1 %v7002_v39  ;;  %v6999_v14 = vpop.f32.mrf.mxu0 }
0x1012   :  { %v7007_v19 = vsel %vm6251_vm12, %v7006_v7, 0.0 }
0x1013   :  { %7008 = vadd.xlane.f32.xlu0 %v7007_v19  ;;  %v8933_v17 = vpop.f32.mrf.mxu0 }
0x1014   :  { %v8534_v17 = vld [vmem:[#allocation13 + $0x4] ss:$0 sm:$0xff] }
0x109a   :  { %v7004_v48 = vpop.xlane.xlu1 %7003 }
0x109b   :  { %v7005_v44 = vmul.f32 0.0078125, %v7004_v48  ;;  %v10075_v48 = vld [vmem:[%s11511_s7 + $0x138] sm:$0xff]  }
0x109c   :  { %v7009_v2 = vpop.xlane.xlu0 %7008 }
0x109d   :  { %v7011_v46 = vmul.f32 %v7005_v44, %v7005_v44  ;;  %v7010_v23 = vmul.f32 0.0078125, %v7009_v2  ;;  %v7013_v61 = vsub.f32 %v6997_v38, %v7005_v44  ;;  %v10076_v44 = vld [vmem:[%s11511_s7 + $0x130] sm:$0xff]   ;;  %v10077_v2 = vld [vmem:[%s11511_s7 + $0x128] sm:$0xff]  }
0x109f   :  { %v7012_v5 = vsub.f32 %v7010_v23, %v7011_v46  ;;  %v10078_v46 = vld [vmem:[%s11511_s7 + $0x120] sm:$0xff]   ;;  %v10079_v23 = vld [vmem:[%s11511_s7 + $0x118] sm:$0xff]  }
0x10a1   :  { %v7014_v27 = vadd.f32 1e-05, %v7012_v5  ;;  %v10080_v5 = vld [vmem:[%s11511_s7 + $0x110] sm:$0xff]  }
0x10a3   :  { %10127 = vrsqrt.f32 %v7014_v27  ;;  %v10081_v27 = vld [vmem:[%s11511_s7 + $0x108] sm:$0xff]  }
0x10b0   :  { %v10128_v15 = vpop.eup %10127 }
0x10b1   :  { %v7016_v16 = vmul.f32 %v10128_v15, %v7013_v61  ;;  %v10082_v61 = vld [vmem:[%s11511_s7 + $0x100] sm:$0xff]  }
0x10b3   :  { %v7017_v28 = vmul.f32 %v7016_v16, %v6886_v25 }
0x10b5   :  { %v7018_v13 = vadd.f32 %v7017_v28, %v6887_v32 }
0x10b7   :  { %v7019_v18 = vmul.f32 0.5, %v7018_v13 }
0x10b9   :  { %10129 = vtanh.f32 %v7019_v18 }
0x10c6   :  { %v10130_v22 = vpop.eup %10129 }
0x10c7   :  { %v7021_v45 = vadd.f32 1.0, %v10130_v22 }
0x10c9   :  { %v7022_v53 = vmul.f32 %v7021_v45, %v7019_v18 }
0x10cb   :  { %v7023_v40 = vpack.c.bf16 %v7022_v53, %v7022_v53 }
0x10cd   :  { %8951 = vmatmul.mubr.bf16.vlgmr.msra.gmra.mxu0 %v7023_v40  ;;  %v7136_v40 = vld [vmem:[#allocation3 + $0x1a] sm:$0x3] }
0x10ce   :  { %8994 = vmatprep.mubr.msk.bf16.mxu0 %vm10338_vm0, %v10337_v8 }
0x118d   :  { %v7128_v52 = vpop.f32.mrf.mxu0 }
0x118e   :  { %v7129_v55 = vadd.f32 %v8525_v34, %v7128_v52  ;;  %v7137_v52 = vld [vmem:[#allocation3 + $0x1c] sm:$0x3] }
0x118f   :  { %v8952_v57 = vpop.f32.mrf.mxu0 }
0x1190   :  { %v11378_v42 = vadd.f32 %v7129_v55, %v11324_v54  ;;  %v10072_v54 = vld [vmem:[#allocation11 + $0x90] sm:$0xff]  }
0x1191   :  { %v7131_v58 = vpop.f32.mrf.mxu0  ;;  %8957 = vmatpush3.bf16.msra.mxu1 %v10072_v54 }
0x1192   :  { %v7138_v21 = vsel %vm6136_vm11, %v11378_v42, 0.0  ;;  %v7142_v47 = vmul.f32 %v11378_v42, %v11378_v42  ;;  %8958 = vmatprep.subr.bf16.mxu1 %v10337_v8 }
0x1193   :  { %7139 = vadd.xlane.f32.xlu1 %v7138_v21  ;;  %v8953_v51 = vpop.f32.mrf.mxu0 }
0x1194   :  { %v7143_v4 = vsel %vm6136_vm11, %v7142_v47, 0.0 }
0x1195   :  { %8959 = vmatpush3.bf16.msra.mxu1 %v10073_v50 }
0x1196   :  { %8960 = vmatprep.subr.bf16.mxu1 %v10337_v8 }
0x1197   :  { %7144 = vadd.xlane.f32.xlu1 %v7143_v4  ;;  %v8556_v4 = vld [vmem:[#allocation13 + $0xa] ss:$0 sm:$0xff] }
0x1199   :  { %8961 = vmatpush3.bf16.msra.mxu1 %v10074_v30 }
0x119a   :  { %8966 = vmatprep.subr.bf16.mxu1 %v10337_v8 }
0x11a8   :  { %7162 = vrot.lane.b32.xlu1 %v7161_v35, %s10328_s27 }
0x121c   :  { %v7140_v56 = vpop.xlane.xlu1 %7139 }
0x121d   :  { %v7141_v33 = vmul.f32 0.015625, %v7140_v56 }
0x121f   :  { %v7147_v37 = vmul.f32 %v7141_v33, %v7141_v33  ;;  %v7149_v0 = vsub.f32 %v11378_v42, %v7141_v33 }
0x1220   :  { %v7145_v29 = vpop.xlane.xlu1 %7144 }
0x1221   :  { %v7146_v36 = vmul.f32 0.015625, %v7145_v29 }
0x1223   :  { %v7148_v12 = vsub.f32 %v7146_v36, %v7147_v37  ;;  %v7385_v37 = vld [vmem:[#allocation3 + $0x1e] sm:$0x3] }
0x1224   :  { %v7163_v59 = vpop.permute.xlu1 %7162  ;;  %v7411_v36 = vrot.slane %v7385_v37, %v10994_v60 }
0x1225   :  { %v7150_v63 = vadd.f32 1e-05, %v7148_v12  ;;  %v10083_v12 = vld [vmem:[#allocation11 + $0xb8] sm:$0xff]  }
0x1226   :  { %8987 = vmatpush3.bf16.msra.mxu0 %v10083_v12 }
0x1227   :  { %10131 = vrsqrt.f32 %v7150_v63  ;;  %8988 = vmatprep.subr.bf16.mxu0 %v10337_v8  ;;  %v10085_v63 = vld [vmem:[#allocation11 + $0xa8] sm:$0xff]  }
0x1234   :  { %v10132_v1 = vpop.eup %10131 }
0x1235   :  { %v7152_v49 = vmul.f32 %v10132_v1, %v7149_v0  ;;  %v10086_v0 = vld [vmem:[#allocation11 + $0xa0] sm:$0xff]  }
0x1237   :  { %v7153_v3 = vmul.f32 %v7152_v49, %v7135_v20 }
0x1239   :  { %v7165_v38 = vadd.f32 %v7163_v59, %v7153_v3 }
0x123b   :  { %v7166_v43 = vmul.f32 0.5, %v7165_v38 }
0x123d   :  { %10133 = vtanh.f32 %v7166_v43 }
0x124a   :  { %v10134_v39 = vpop.eup %10133 }
0x124b   :  { %v7168_v7 = vadd.f32 1.0, %v10134_v39 }
0x124d   :  { %v7169_v14 = vmul.f32 %v7168_v7, %v7166_v43 }
0x124f   :  { %v7170_v19 = vpack.c.bf16 %v7169_v14, %v7169_v14 }
0x1251   :  { %8963 = vmatmul.mubr.msk.bf16.vlgmr.msra.gmra.mxu1 %vm285_vm15, %v7170_v19 }
0x1252   :  { %8982 = vmatprep.mubr.msk.bf16.mxu1 %vm10338_vm0, %v10337_v8  ;;  %8967 = vmatpush3.bf16.msra.mxu1 %v10075_v48 }
0x1253   :  { %8968 = vmatprep.subr.bf16.mxu1 %v10337_v8 }
0x1256   :  { %8969 = vmatpush3.bf16.msra.mxu1 %v10076_v44 }
0x1257   :  { %8970 = vmatprep.subr.bf16.mxu1 %v10337_v8 }
0x125a   :  { %8971 = vmatpush3.bf16.msra.mxu1 %v10077_v2 }
0x125b   :  { %8972 = vmatprep.subr.bf16.mxu1 %v10337_v8 }
0x125e   :  { %8973 = vmatpush3.bf16.msra.mxu1 %v10078_v46 }
0x125f   :  { %8974 = vmatprep.subr.bf16.mxu1 %v10337_v8 }
0x1262   :  { %8975 = vmatpush3.bf16.msra.mxu1 %v10079_v23 }
0x1263   :  { %8976 = vmatprep.subr.bf16.mxu1 %v10337_v8 }
0x1266   :  { %8977 = vmatpush3.bf16.msra.mxu1 %v10080_v5 }
0x1267   :  { %8978 = vmatprep.subr.bf16.mxu1 %v10337_v8 }
0x126a   :  { %8979 = vmatpush3.bf16.msra.mxu1 %v10081_v27 }
0x126b   :  { %8980 = vmatprep.subr.bf16.mxu1 %v10337_v8 }
0x126e   :  { %8981 = vmatpush3.bf16.msra.mxu1 %v10082_v61  ;;  %v10087_v61 = vld [vmem:[%s11511_s7 + $0x178] sm:$0xff]  }
0x126f   :  { %9018 = vmatprep.subr.bf16.mxu1 %v10337_v8 }
0x1311   :  { %v7246_v24 = vpop.f32.mrf.mxu1 }
0x1312   :  { %v7247_v9 = vadd.f32 %v8534_v17, %v7246_v24 }
0x1313   :  { %v8964_v10 = vpop.f32.mrf.mxu1 }
0x1314   :  { %v7252_v41 = vsel %vm6251_vm12, %v7247_v9, 0.0  ;;  %v7256_v11 = vmul.f32 %v7247_v9, %v7247_v9 }
0x1315   :  { %7253 = vadd.xlane.f32.xlu1 %v7252_v41  ;;  %v7249_v26 = vpop.f32.mrf.mxu1 }
0x1316   :  { %v7257_v62 = vsel %vm6251_vm12, %v7256_v11, 0.0 }
0x1317   :  { %7258 = vadd.xlane.f32.xlu0 %v7257_v62  ;;  %v8965_v31 = vpop.f32.mrf.mxu1  ;;  %v8565_v62 = vld [vmem:[#allocation13 + $0x5] ss:$0 sm:$0xff] }
0x139e   :  { %v7254_v15 = vpop.xlane.xlu1 %7253 }
0x139f   :  { %v7255_v16 = vmul.f32 0.0078125, %v7254_v15  ;;  %v10088_v15 = vld [vmem:[%s11511_s7 + $0x170] sm:$0xff]  }
0x13a0   :  { %v7259_v25 = vpop.xlane.xlu0 %7258 }
0x13a1   :  { %v7261_v28 = vmul.f32 %v7255_v16, %v7255_v16  ;;  %v7260_v32 = vmul.f32 0.0078125, %v7259_v25  ;;  %v7263_v22 = vsub.f32 %v7247_v9, %v7255_v16  ;;  %v10089_v16 = vld [vmem:[%s11511_s7 + $0x168] sm:$0xff]   ;;  %v10090_v25 = vld [vmem:[%s11511_s7 + $0x160] sm:$0xff]  }
0x13a3   :  { %v7262_v13 = vsub.f32 %v7260_v32, %v7261_v28  ;;  %v10091_v28 = vld [vmem:[%s11511_s7 + $0x158] sm:$0xff]   ;;  %v10092_v32 = vld [vmem:[%s11511_s7 + $0x150] sm:$0xff]  }
0x13a5   :  { %v7264_v18 = vadd.f32 1e-05, %v7262_v13  ;;  %v10093_v13 = vld [vmem:[%s11511_s7 + $0x148] sm:$0xff]  }
0x13a7   :  { %10135 = vrsqrt.f32 %v7264_v18  ;;  %v10094_v18 = vld [vmem:[%s11511_s7 + $0x140] sm:$0xff]  }
0x13b4   :  { %v10136_v45 = vpop.eup %10135 }
0x13b5   :  { %v7266_v53 = vmul.f32 %v10136_v45, %v7263_v22 }
0x13b7   :  { %v7267_v34 = vmul.f32 %v7266_v53, %v7136_v40 }
0x13b9   :  { %v7268_v55 = vadd.f32 %v7267_v34, %v7137_v52 }
0x13bb   :  { %v7269_v57 = vmul.f32 0.5, %v7268_v55 }
0x13bd   :  { %10137 = vtanh.f32 %v7269_v57 }
0x13ca   :  { %v10138_v58 = vpop.eup %10137 }
0x13cb   :  { %v7271_v21 = vadd.f32 1.0, %v10138_v58 }
0x13cd   :  { %v7272_v47 = vmul.f32 %v7271_v21, %v7269_v57 }
0x13cf   :  { %v7273_v51 = vpack.c.bf16 %v7272_v47, %v7272_v47  ;;  %v7386_v47 = vld [vmem:[#allocation3 + $0x20] sm:$0x3] }
0x13d1   :  { %8983 = vmatmul.mubr.bf16.vlgmr.msra.gmra.mxu1 %v7273_v51 }
0x13d2   :  { %9026 = vmatprep.mubr.msk.bf16.mxu1 %vm10338_vm0, %v10337_v8 }
0x1491   :  { %v7378_v20 = vpop.f32.mrf.mxu1 }
0x1492   :  { %v7379_v35 = vadd.f32 %v8556_v4, %v7378_v20  ;;  %v7387_v4 = vld [vmem:[#allocation3 + $0x22] sm:$0x3] }
0x1493   :  { %v8984_v6 = vpop.f32.mrf.mxu1 }
0x1494   :  { %v11432_v54 = vadd.f32 %v7379_v35, %v11378_v42  ;;  %v10084_v42 = vld [vmem:[#allocation11 + $0xb0] sm:$0xff]  }
0x1495   :  { %v7381_v50 = vpop.f32.mrf.mxu1  ;;  %8989 = vmatpush3.bf16.msra.mxu0 %v10084_v42 }
0x1496   :  { %v7388_v30 = vsel %vm6136_vm11, %v11432_v54, 0.0  ;;  %v7392_v56 = vmul.f32 %v11432_v54, %v11432_v54  ;;  %8990 = vmatprep.subr.bf16.mxu0 %v10337_v8 }
0x1497   :  { %7389 = vadd.xlane.f32.xlu0 %v7388_v30  ;;  %v8985_v33 = vpop.f32.mrf.mxu1 }
0x1498   :  { %v7393_v29 = vsel %vm6136_vm11, %v7392_v56, 0.0  ;;  %v8587_v33 = vld [vmem:[#allocation13 + $0xb] ss:$0 sm:$0xff] }
0x1499   :  { %8991 = vmatpush3.bf16.msra.mxu0 %v10085_v63 }
0x149a   :  { %8992 = vmatprep.subr.bf16.mxu0 %v10337_v8 }
0x149b   :  { %7394 = vadd.xlane.f32.xlu0 %v7393_v29 }
0x149d   :  { %8993 = vmatpush3.bf16.msra.mxu0 %v10086_v0 }
0x149e   :  { %8998 = vmatprep.subr.bf16.mxu0 %v10337_v8 }
0x14b1   :  { %7412 = vrot.lane.b32.xlu0 %v7411_v36, %s10328_s27 }
0x1520   :  { %v7390_v1 = vpop.xlane.xlu0 %7389 }
0x1521   :  { %v7391_v60 = vmul.f32 0.015625, %v7390_v1 }
0x1523   :  { %v7397_v3 = vmul.f32 %v7391_v60, %v7391_v60  ;;  %v7399_v39 = vsub.f32 %v11432_v54, %v7391_v60 }
0x1524   :  { %v7395_v49 = vpop.xlane.xlu0 %7394 }
0x1525   :  { %v7396_v59 = vmul.f32 0.015625, %v7395_v49  ;;  %v10095_v49 = vld [vmem:[%s11509_s5 + $0x1b8] sm:$0xff]  }
0x1526   :  { %9019 = vmatpush3.bf16.msra.mxu1 %v10095_v49 }
0x1527   :  { %v7398_v38 = vsub.f32 %v7396_v59, %v7397_v3  ;;  %v10096_v3 = vld [vmem:[%s11509_s5 + $0x1b0] sm:$0xff]   ;;  %9020 = vmatprep.subr.bf16.mxu1 %v10337_v8  ;;  %v10098_v59 = vld [vmem:[%s11509_s5 + $0x1a0] sm:$0xff]  }
0x1528   :  { %v7413_v17 = vpop.permute.xlu0 %7412 }
0x1529   :  { %v7400_v43 = vadd.f32 1e-05, %v7398_v38 }
0x152a   :  { %9021 = vmatpush3.bf16.msra.mxu1 %v10096_v3 }
0x152b   :  { %10139 = vrsqrt.f32 %v7400_v43  ;;  %9022 = vmatprep.subr.bf16.mxu1 %v10337_v8 }
0x1538   :  { %v10140_v7 = vpop.eup %10139 }
0x1539   :  { %v7402_v14 = vmul.f32 %v10140_v7, %v7399_v39 }
0x153b   :  { %v7403_v19 = vmul.f32 %v7402_v14, %v7385_v37 }
0x153d   :  { %v7415_v24 = vadd.f32 %v7413_v17, %v7403_v19 }
0x153f   :  { %v7416_v9 = vmul.f32 0.5, %v7415_v24 }
0x1541   :  { %10141 = vtanh.f32 %v7416_v9 }
0x154e   :  { %v10142_v10 = vpop.eup %10141 }
0x154f   :  { %v7418_v41 = vadd.f32 1.0, %v10142_v10 }
0x1551   :  { %v7419_v11 = vmul.f32 %v7418_v41, %v7416_v9 }
0x1553   :  { %v7420_v26 = vpack.c.bf16 %v7419_v11, %v7419_v11  ;;  %v8596_v11 = vld [vmem:[#allocation10 + $0x3] ss:$0 sm:$0xff] }
0x1555   :  { %8995 = vmatmul.mubr.msk.bf16.vlgmr.msra.gmra.mxu0 %vm285_vm15, %v7420_v26 }
0x1556   :  { %9014 = vmatprep.mubr.msk.bf16.mxu0 %vm10338_vm0, %v10337_v8  ;;  %8999 = vmatpush3.bf16.msra.mxu0 %v10087_v61  ;;  %vm7731_vm0 = vcmask 74752  }
0x1557   :  { %9000 = vmatprep.subr.bf16.mxu0 %v10337_v8 }
0x155a   :  { %9001 = vmatpush3.bf16.msra.mxu0 %v10088_v15 }
0x155b   :  { %9002 = vmatprep.subr.bf16.mxu0 %v10337_v8 }
0x155e   :  { %9003 = vmatpush3.bf16.msra.mxu0 %v10089_v16 }
0x155f   :  { %9004 = vmatprep.subr.bf16.mxu0 %v10337_v8 }
0x1562   :  { %9005 = vmatpush3.bf16.msra.mxu0 %v10090_v25 }
0x1563   :  { %9006 = vmatprep.subr.bf16.mxu0 %v10337_v8 }
0x1566   :  { %9007 = vmatpush3.bf16.msra.mxu0 %v10091_v28 }
0x1567   :  { %9008 = vmatprep.subr.bf16.mxu0 %v10337_v8 }
0x156a   :  { %9009 = vmatpush3.bf16.msra.mxu0 %v10092_v32 }
0x156b   :  { %9010 = vmatprep.subr.bf16.mxu0 %v10337_v8 }
0x156e   :  { %9011 = vmatpush3.bf16.msra.mxu0 %v10093_v13 }
0x156f   :  { %9012 = vmatprep.subr.bf16.mxu0 %v10337_v8 }
0x1572   :  { %9013 = vmatpush3.bf16.msra.mxu0 %v10094_v18 }
0x1615   :  { %v7496_v31 = vpop.f32.mrf.mxu0 }
0x1616   :  { %v7497_v48 = vadd.f32 %v8565_v62, %v7496_v31 }
0x1617   :  { %v8996_v44 = vpop.f32.mrf.mxu0 }
0x1618   :  { %v7502_v2 = vsel %vm6251_vm12, %v7497_v48, 0.0  ;;  %v7506_v46 = vmul.f32 %v7497_v48, %v7497_v48 }
0x1619   :  { %7503 = vadd.xlane.f32.xlu1 %v7502_v2  ;;  %v7499_v23 = vpop.f32.mrf.mxu0 }
0x161a   :  { %v7507_v5 = vsel %vm6251_vm12, %v7506_v46, 0.0 }
0x161b   :  { %7508 = vadd.xlane.f32.xlu0 %v7507_v5  ;;  %v8997_v27 = vpop.f32.mrf.mxu0 }
0x16a2   :  { %v7504_v22 = vpop.xlane.xlu1 %7503 }
0x16a3   :  { %v7505_v45 = vmul.f32 0.0078125, %v7504_v22 }
0x16a4   :  { %v7509_v53 = vpop.xlane.xlu0 %7508 }
0x16a5   :  { %v7511_v40 = vmul.f32 %v7505_v45, %v7505_v45  ;;  %v7510_v34 = vmul.f32 0.0078125, %v7509_v53  ;;  %v7513_v57 = vsub.f32 %v7497_v48, %v7505_v45 }
0x16a7   :  { %v7512_v52 = vsub.f32 %v7510_v34, %v7511_v40 }
0x16a9   :  { %v7514_v55 = vadd.f32 1e-05, %v7512_v52 }
0x16ab   :  { %10143 = vrsqrt.f32 %v7514_v55 }
0x16b8   :  { %v10144_v58 = vpop.eup %10143 }
0x16b9   :  { %v7516_v21 = vmul.f32 %v10144_v58, %v7513_v57 }
0x16bb   :  { %v7517_v51 = vmul.f32 %v7516_v21, %v7386_v47 }
0x16bd   :  { %v7518_v20 = vadd.f32 %v7517_v51, %v7387_v4 }
0x16bf   :  { %v7519_v35 = vmul.f32 0.5, %v7518_v20 }
0x16c1   :  { %10145 = vtanh.f32 %v7519_v35 }
0x16ce   :  { %v10146_v6 = vpop.eup %10145 }
0x16cf   :  { %v7521_v50 = vadd.f32 1.0, %v10146_v6 }
0x16d1   :  { %v7522_v30 = vmul.f32 %v7521_v50, %v7519_v35 }
0x16d3   :  { %v7523_v56 = vpack.c.bf16 %v7522_v30, %v7522_v30 }
0x16d5   :  { %9015 = vmatmul.mubr.bf16.vlgmr.msra.gmra.mxu0 %v7523_v56 }
0x1795   :  { %v7628_v29 = vpop.f32.mrf.mxu0 }
0x1796   :  { %v7629_v37 = vadd.f32 %v8587_v33, %v7628_v29 }
0x1797   :  { %v9016_v36 = vpop.f32.mrf.mxu0 }
0x1798   :  { %v7634_v12 = vadd.f32 %v7629_v37, %v11432_v54  ;;  %v10097_v54 = vld [vmem:[%s11509_s5 + $0x1a8] sm:$0xff]   ;;  %s7739_s5 = sshll.u32 %s10347_s3, 4  ;;  %s7740_s5 = int_to_ptr.vmem [resolvable:$true] %s7739_s5 }
0x1799   :  { %v7631_v42 = vpop.f32.mrf.mxu0  ;;  %9023 = vmatpush3.bf16.msra.mxu1 %v10097_v54  ;;  %s10292_s1 = scalar_lea.vmem %s7740_s5, 32  ;;  %p10297_p8 = scmp.lt.s32.totalorder %s7740_s5, %s7740_s5 }
0x179a   :  { %v7635_v63 = vsel %vm6136_vm11, %v7634_v12, 0.0  ;;  %v7639_v0 = vmul.f32 %v7634_v12, %v7634_v12  ;;  %9024 = vmatprep.subr.bf16.mxu1 %v10337_v8  ;;  %p10293_p7 = scmp.ne.s32.totalorder %s7740_s5, %s10292_s1  ;;  %p10298_p9 = scmp.lt.s32.totalorder %s10292_s1, %s10292_s1 }
0x179b   :  { %7636 = vadd.xlane.f32.xlu1 %v7635_v63  ;;  %v9017_v1 = vpop.f32.mrf.mxu0 }
0x179c   :  { %v7640_v60 = vsel %vm6136_vm11, %v7639_v0, 0.0  ;;  %p10299_p10 = por %p10298_p9, %p10297_p8 }
0x179d   :  { %9025 = vmatpush3.bf16.msra.mxu1 %v10098_v59 }
0x179e   :  { %p10300_p11 = pnand %p10299_p10, %p10293_p7 }
0x179f   :  { %7641 = vadd.xlane.f32.xlu1 %v7640_v60 }
0x1824   :  { %v7637_v38 = vpop.xlane.xlu1 %7636 }
0x1825   :  { %v7638_v43 = vmul.f32 0.015625, %v7637_v38 }
0x1827   :  { %v7644_v7 = vmul.f32 %v7638_v43, %v7638_v43  ;;  %v7646_v24 = vsub.f32 %v7634_v12, %v7638_v43 }
0x1828   :  { %v7642_v39 = vpop.xlane.xlu1 %7641 }
0x1829   :  { %v7643_v14 = vmul.f32 0.015625, %v7642_v39 }
0x182b   :  { %v7645_v19 = vsub.f32 %v7643_v14, %v7644_v7 }
0x182d   :  { %v7647_v17 = vadd.f32 1e-05, %v7645_v19 }
0x182f   :  { %10147 = vrsqrt.f32 %v7647_v17 }
0x183c   :  { %v10148_v9 = vpop.eup %10147 }
0x183d   :  { %v7649_v10 = vmul.f32 %v10148_v9, %v7646_v24 }
0x183f   :  { %v7650_v41 = vpack.c.bf16 %v7649_v10, %v7649_v10 }
0x1841   :  { %9027 = vmatmul.mubr.msk.bf16.vlgmr.msra.gmra.mxu1 %vm285_vm15, %v7650_v41 }
0x1901   :  { %v7725_v26 = vpop.f32.mrf.mxu1 }
0x1902   :  { %v7726_v8 = vadd.f32 %v8596_v11, %v7725_v26 }
0x1903   :  { %v9028_v62 = vpop.f32.mrf.mxu1 }
0x1904   :  { %7732 = vst.msk [vmem:[#allocation16] sm:$0x3] %vm7731_vm0, %v7726_v8 }
0x1905   :  { %v7728_v31 = vpop.f32.mrf.mxu1 }
0x1906   :  { %10303 = shalt.err (!%p10300_p11)
}
0x1907   :  { %7742 = dma.vmem_to_hbm [thread:$0]  %s7740_s5, 32, %s11515_s11, [#allocation7]   ;;  %v9029_v48 = vpop.f32.mrf.mxu1 }
0x1908   :  { %10322 = dma.done.wait [#allocation7], 32  }
0x1909   :  { %10323 = vsyncadd [#allocation7], 4294967264 }
0x190a   :  { %7746 = vsyncpa [#allocation6], 1 }
0x190b   :  { %7747 = vsyncpa [#allocation9], 1 }
0x190c   :  { %7748 = vsyncpa [#allocation12], 1 }
0x190d   :  { %7749 = vsyncpa [#allocation15], 1 }
0x190e   :  { %7750 = vsyncpa [#allocation7], 1 }
0x190f   :  { %7751 = vsyncmov [#allocation4] }
0x1912   :  { %s7752_s15 = vpop.sfrf %7751 }
0x1913   :  { %p8602_p12 = scmp.ne.s32.totalorder %s7752_s15, 0 }
0x1915   :  { %7756 = shalt.err (%p8602_p12)  }

</bundles_post_ra>
